<compile_context>
chip_gen: v7x
topology: tpu7x:2x2x1
jax: 0.10.0
libtpu: 0.0.40
codegen_flags: <defaults>
</compile_context>

<pallas_src>
import jax
import jax.numpy as jnp
from jax.experimental import pallas as pl
from jax.experimental.pallas import tpu as pltpu

EPS = 1e-5


def _relu(a):
    return jnp.maximum(a, 0.0)


def _mmul(a, w_ref):
    """MXU matmul: bf16 operands, f32 accumulation."""
    return jnp.dot(a.astype(jnp.bfloat16), w_ref[...],
                   preferred_element_type=jnp.float32)


def _bridge_small_k(rows, w_ref, b_ref):
    """Pointwise conv with tiny K (= point_dim) via VPU broadcast MACs.

    rows[k]: (bt, N) f32 slab of input channel k (lane axis = N).
    Returns relu(x @ W + b) flattened to (bt*N, Cout) channels-last."""
    bt, n = rows[0].shape
    w = w_ref[...].astype(jnp.float32)                    # (K, Cout)
    cout = w.shape[-1]
    acc = rows[0][:, :, None] * w[0:1, :].reshape(1, 1, cout)
    for k in range(1, len(rows)):
        acc = acc + rows[k][:, :, None] * w[k:k + 1, :].reshape(1, 1, cout)
    acc = acc + b_ref[...]                                # (1, Cout) broadcasts
    return jnp.maximum(acc, 0.0).reshape(bt * n, cout)


# ---------------------------------------------------------------------------
# Kernel A (per batch tile): T-Net-1 backbone + FC head, input transform
# (tnet_out, channels-first), conv_1/conv_2, T-Net-2 backbone + FC head.
# ---------------------------------------------------------------------------
def _kernel_a(x_ref,
              aw1, ac1, aw2, ac2, aw3, ac3,            # T-Net-1 backbone
              af1w, af1c, af2w, af2c, af3w, af3c,      # T-Net-1 FC head
              cw1, cc1, cw2, cc2,                      # conv_1 / conv_2
              bw1, bc1, bw2, bc2, bw3, bc3,            # T-Net-2 backbone
              bf1w, bf1c, bf2w, bf2c, bf3w, bf3c,      # T-Net-2 FC head
              tnet_ref, h_ref, t2_ref):
    bt, c_in, n = x_ref.shape

    xf = x_ref[...].astype(jnp.float32)                  # (bt, C, N)
    x_rows = [xf[:, k, :] for k in range(c_in)]          # C x (bt, N)

    # ---- T-Net-1 backbone:  C -> 64 -> 128 -> 256, max over points ---------
    h = _bridge_small_k(x_rows, aw1, ac1)                # (bt*N, 64)
    h = _relu(_mmul(h, aw2) + ac2[...])
    h = _relu(_mmul(h, aw3) + ac3[...])
    g1 = jnp.max(h.reshape(bt, n, ac3.shape[-1]), axis=1)     # (bt, 256)

    # ---- T-Net-1 FC head (identity already folded into af3c) ---------------
    f = _relu(_mmul(g1, af1w) + af1c[...])
    f = _relu(_mmul(f, af2w) + af2c[...])
    t1v = _mmul(f, af3w) + af3c[...]                     # (bt, C*C), row-major

    # ---- input transform -> tnet_out, channels-first (lane axis = N) -------
    xt_rows = []
    for c in range(c_in):
        row = x_rows[0] * t1v[:, 0 * c_in + c:0 * c_in + c + 1]
        for k in range(1, c_in):
            row = row + x_rows[k] * t1v[:, k * c_in + c:k * c_in + c + 1]
        xt_rows.append(row)                              # (bt, N) f32
        tnet_ref[:, c:c + 1, :] = row[:, None, :]

    # ---- conv_1 / conv_2 ----------------------------------------------------
    z = _bridge_small_k(xt_rows, cw1, cc1)               # (bt*N, 64)
    z = _relu(_mmul(z, cw2) + cc2[...])
    h_ref[...] = z.reshape(bt, n, cc2.shape[-1]).astype(h_ref.dtype)

    # ---- T-Net-2 backbone + FC head -----------------------------------------
    t = _relu(_mmul(z, bw1) + bc1[...])
    t = _relu(_mmul(t, bw2) + bc2[...])
    t = _relu(_mmul(t, bw3) + bc3[...])
    g2 = jnp.max(t.reshape(bt, n, bc3.shape[-1]), axis=1)
    f = _relu(_mmul(g2, bf1w) + bf1c[...])
    f = _relu(_mmul(f, bf2w) + bf2c[...])
    t2v = _mmul(f, bf3w) + bf3c[...]                     # (bt, 64*64)
    t2_ref[:, 0:1, :] = t2v[:, None, :]


# ---------------------------------------------------------------------------
# Kernel B (per batch tile): feature transform folded into conv_3, then
# conv_4/conv_5 and the sum over points.
# ---------------------------------------------------------------------------
def _kernel_b(h_ref, t2_ref, cw3, cc3, cw4, cc4, cw5, cc5, out_ref):
    bt, n, c = h_ref.shape
    # fused per-batch weight: (t2 @ cw3)  -> one matmul over N instead of two.
    cw3_b = jnp.broadcast_to(cw3[...], (bt,) + cw3.shape)          # (bt,64,64)
    fused = jnp.einsum('bcd,bdo->bco', t2_ref[...], cw3_b,
                       preferred_element_type=jnp.float32)         # (bt,64,64)
    z = jnp.einsum('bnc,bco->bno', h_ref[...], fused.astype(jnp.bfloat16),
                   preferred_element_type=jnp.float32)             # (bt,N,64)
    z = _relu(z + cc3[...]).reshape(bt * n, c)
    z = _relu(_mmul(z, cw4) + cc4[...])
    z = _relu(_mmul(z, cw5) + cc5[...])
    out_ref[:, 0:1, :] = jnp.sum(z.reshape(bt, n, cc5.shape[-1]),
                                 axis=1)[:, None, :]


def _choose_bt(batch, n_points, row_target=2048):
    """Batch tile: ~row_target matmul rows per grid step, never exceeding the
    batch (no padded-clone waste), and VMEM-safe even on v7x's 64 MiB."""
    return max(1, min(batch, row_target // max(n_points, 1)))


def _w_spec(arr):
    return pl.BlockSpec(arr.shape, lambda i, n=arr.ndim: (0,) * n)


def base_point_net(x, p):
    """x: (B, N, point_dim) float32.
    Returns (global_feature (B, 256), feature_transform (B, 64, 64),
    tnet_out (B, point_dim, N)) matching the PyTorch module (eval-mode BN)."""
    B, N, C = x.shape
    bt = _choose_bt(B, N)
    nb = (B + bt - 1) // bt
    Bp = nb * bt

    # Channels-first, lane-dense input blocks (perf item: no lane-3 DMA).
    x_cf = jnp.transpose(x, (0, 2, 1)).astype(jnp.bfloat16)       # (B, C, N)
    if Bp != B:
        x_cf = jnp.concatenate(
            [x_cf, jnp.zeros((Bp - B, C, N), jnp.bfloat16)], axis=0)

    cparams = pltpu.CompilerParams(
        dimension_semantics=("parallel",),
        vmem_limit_bytes=64 * 1024 * 1024)

    wA = (p['t1_w1'], p['t1_c1'], p['t1_w2'], p['t1_c2'], p['t1_w3'], p['t1_c3'],
          p['t1_f1w'], p['t1_f1c'], p['t1_f2w'], p['t1_f2c'], p['t1_f3w'], p['t1_f3c'],
          p['cw1'], p['cc1'], p['cw2'], p['cc2'],
          p['t2_w1'], p['t2_c1'], p['t2_w2'], p['t2_c2'], p['t2_w3'], p['t2_c3'],
          p['t2_f1w'], p['t2_f1c'], p['t2_f2w'], p['t2_f2c'], p['t2_f3w'], p['t2_f3c'])

    tnet, h, t2v = pl.pallas_call(
        _kernel_a,
        out_shape=(jax.ShapeDtypeStruct((Bp, C, N), jnp.float32),
                   jax.ShapeDtypeStruct((Bp, N, 64), jnp.bfloat16),
                   jax.ShapeDtypeStruct((Bp, 1, 64 * 64), jnp.float32)),
        grid=(nb,),
        in_specs=[pl.BlockSpec((bt, C, N), lambda i: (i, 0, 0))]
                + [_w_spec(a) for a in wA],
        out_specs=(pl.BlockSpec((bt, C, N), lambda i: (i, 0, 0)),
                   pl.BlockSpec((bt, N, 64), lambda i: (i, 0, 0)),
                   pl.BlockSpec((bt, 1, 64 * 64), lambda i: (i, 0, 0))),
        compiler_params=cparams,
    )(x_cf, *wA)

    t2 = t2v.reshape(Bp, 64, 64)                 # free host-side reshape
    t2_bf = t2.astype(jnp.bfloat16)

    wB = (p['cw3'], p['cc3'], p['cw4'], p['cc4'], p['cw5'], p['cc5'])
    out3 = pl.pallas_call(
        _kernel_b,
        out_shape=jax.ShapeDtypeStruct((Bp, 1, 256), jnp.float32),
        grid=(nb,),
        in_specs=[pl.BlockSpec((bt, N, 64), lambda i: (i, 0, 0)),
                  pl.BlockSpec((bt, 64, 64), lambda i: (i, 0, 0))]
                + [_w_spec(a) for a in wB],
        out_specs=pl.BlockSpec((bt, 1, 256), lambda i: (i, 0, 0)),
        compiler_params=cparams,
    )(h, t2_bf, *wB)

    # tnet_out already in (B, point_dim, N) layout -- no host transpose.
    return out3[:B, 0, :], t2[:B], tnet[:B]


def make_params(key, point_dim):
    """Deterministic synthetic parameters with the module's shapes.
    Eval-mode BatchNorm is folded into the preceding weights; T-Net identity
    matrices are folded into the last FC biases. Weights bf16, biases f32."""
    state = {'key': key}

    def nxt():
        state['key'], k = jax.random.split(state['key'])
        return k

    def linear(cin, cout, scale=0.1):
        w = jax.random.normal(nxt(), (cin, cout), jnp.float32) * scale
        b = jax.random.normal(nxt(), (1, cout), jnp.float32) * scale
        return w, b

    def folded(cin, cout):
        w, b = linear(cin, cout)
        gamma = 1.0 + 0.1 * jax.random.normal(nxt(), (1, cout), jnp.float32)
        beta = 0.1 * jax.random.normal(nxt(), (1, cout), jnp.float32)
        mean = 0.1 * jax.random.normal(nxt(), (1, cout), jnp.float32)
        var = 0.5 + jnp.abs(jax.random.normal(nxt(), (1, cout), jnp.float32))
        s = gamma / jnp.sqrt(var + EPS)
        return (w * s).astype(jnp.bfloat16), (b - mean) * s + beta

    def final_fc(cin, dim):
        w, b = linear(cin, dim * dim)
        eye = jnp.eye(dim, dtype=jnp.float32).reshape(1, dim * dim)
        return w.astype(jnp.bfloat16), b + eye

    p = {}
    # TransformationNet(input_dim=point_dim, output_dim=point_dim)
    p['t1_w1'], p['t1_c1'] = folded(point_dim, 64)
    p['t1_w2'], p['t1_c2'] = folded(64, 128)
    p['t1_w3'], p['t1_c3'] = folded(128, 256)
    p['t1_f1w'], p['t1_f1c'] = folded(256, 256)
    p['t1_f2w'], p['t1_f2c'] = folded(256, 128)
    p['t1_f3w'], p['t1_f3c'] = final_fc(128, point_dim)
    # BasePointNet conv_1..conv_5 (+ bn_1..bn_5)
    p['cw1'], p['cc1'] = folded(point_dim, 64)
    p['cw2'], p['cc2'] = folded(64, 64)
    p['cw3'], p['cc3'] = folded(64, 64)
    p['cw4'], p['cc4'] = folded(64, 128)
    p['cw5'], p['cc5'] = folded(128, 256)
    # TransformationNet(input_dim=64, output_dim=64)
    p['t2_w1'], p['t2_c1'] = folded(64, 64)
    p['t2_w2'], p['t2_c2'] = folded(64, 128)
    p['t2_w3'], p['t2_c3'] = folded(128, 256)
    p['t2_f1w'], p['t2_f1c'] = folded(256, 256)
    p['t2_f2w'], p['t2_f2c'] = folded(256, 128)
    p['t2_f3w'], p['t2_f3c'] = final_fc(128, 64)
    return p


def reference(x, p):
    """Pure-JAX reference mirroring the kernel's precision policy
    (bf16 matmul operands / f32 accumulation, f32 first layer, folded conv_3)."""
    B, N, C = x.shape
    HI = jax.lax.Precision.HIGHEST
    xf = x.astype(jnp.bfloat16).astype(jnp.float32)          # bf16-rounded x

    def mm(a, w):
        return jnp.dot(a.astype(jnp.bfloat16), w.astype(jnp.bfloat16),
                       preferred_element_type=jnp.float32)

    def relu(a):
        return jnp.maximum(a, 0.0)

    # T-Net 1
    h = relu(jnp.dot(xf.reshape(B * N, C), p['t1_w1'].astype(jnp.float32),
                     precision=HI) + p['t1_c1'])
    h = relu(mm(h, p['t1_w2']) + p['t1_c2'])
    h = relu(mm(h, p['t1_w3']) + p['t1_c3'])
    g1 = jnp.max(h.reshape(B, N, 256), axis=1)
    f = relu(mm(g1, p['t1_f1w']) + p['t1_f1c'])
    f = relu(mm(f, p['t1_f2w']) + p['t1_f2c'])
    t1 = (mm(f, p['t1_f3w']) + p['t1_f3c']).reshape(B, C, C)

    xt = jnp.einsum('bnc,bcd->bnd', xf, t1, precision=HI)     # f32
    tnet_out = jnp.transpose(xt, (0, 2, 1))                   # (B, C, N)

    z = relu(jnp.dot(xt.reshape(B * N, C), p['cw1'].astype(jnp.float32),
                     precision=HI) + p['cc1'])
    z = relu(mm(z, p['cw2']) + p['cc2'])
    h64 = z.reshape(B, N, 64)

    # T-Net 2
    t = relu(mm(z, p['t2_w1']) + p['t2_c1'])
    t = relu(mm(t, p['t2_w2']) + p['t2_c2'])
    t = relu(mm(t, p['t2_w3']) + p['t2_c3'])
    g2 = jnp.max(t.reshape(B, N, 256), axis=1)
    f = relu(mm(g2, p['t2_f1w']) + p['t2_f1c'])
    f = relu(mm(f, p['t2_f2w']) + p['t2_f2c'])
    t2 = (mm(f, p['t2_f3w']) + p['t2_f3c']).reshape(B, 64, 64)

    # feature transform folded into conv_3: h @ (t2 @ cw3)
    fused = jnp.einsum('bcd,do->bco', t2.astype(jnp.bfloat16),
                       p['cw3'].astype(jnp.bfloat16),
                       preferred_element_type=jnp.float32)
    hx = jnp.einsum('bnc,bco->bno', h64.astype(jnp.bfloat16),
                    fused.astype(jnp.bfloat16),
                    preferred_element_type=jnp.float32)
    z = relu(hx + p['cc3']).reshape(B * N, 64)
    z = relu(mm(z, p['cw4']) + p['cc4'])
    z = relu(mm(z, p['cw5']) + p['cc5'])
    out = jnp.sum(z.reshape(B, N, 256), axis=1)
    return out, t2, tnet_out


if __name__ == "__main__":
    B, N, POINT_DIM = 2, 16, 3

    key = jax.random.PRNGKey(0)
    kx, kp = jax.random.split(key)
    x = jax.random.normal(kx, (B, N, POINT_DIM), jnp.float32)
    params = make_params(kp, POINT_DIM)

    out, feat_t, tnet_out = base_point_net(x, params)
    out, feat_t, tnet_out = jax.block_until_ready((out, feat_t, tnet_out))

    r_out, r_t2, r_tnet = reference(x, params)
    assert out.shape == (B, 256)
    assert feat_t.shape == (B, 64, 64)
    assert tnet_out.shape == (B, POINT_DIM, N)
    assert jnp.allclose(out, r_out, atol=1e-2, rtol=1e-2), "global feature mismatch"
    assert jnp.allclose(feat_t, r_t2, atol=1e-2, rtol=1e-2), "feature_transform mismatch"
    assert jnp.allclose(tnet_out, r_tnet, atol=1e-2, rtol=1e-2), "tnet_out mismatch"

    print("KERNEL_OK")
</pallas_src>

<mosaic_0001>
module attributes {stable_mosaic.version = 11 : i64} {
  func.func @_kernel_a(%arg0: i32, %arg1: memref<2x3x16xbf16, #tpu.memory_space<vmem>>, %arg2: memref<3x64xbf16, #tpu.memory_space<vmem>>, %arg3: memref<1x64xf32, #tpu.memory_space<vmem>>, %arg4: memref<64x128xbf16, #tpu.memory_space<vmem>>, %arg5: memref<1x128xf32, #tpu.memory_space<vmem>>, %arg6: memref<128x256xbf16, #tpu.memory_space<vmem>>, %arg7: memref<1x256xf32, #tpu.memory_space<vmem>>, %arg8: memref<256x256xbf16, #tpu.memory_space<vmem>>, %arg9: memref<1x256xf32, #tpu.memory_space<vmem>>, %arg10: memref<256x128xbf16, #tpu.memory_space<vmem>>, %arg11: memref<1x128xf32, #tpu.memory_space<vmem>>, %arg12: memref<128x9xbf16, #tpu.memory_space<vmem>>, %arg13: memref<1x9xf32, #tpu.memory_space<vmem>>, %arg14: memref<3x64xbf16, #tpu.memory_space<vmem>>, %arg15: memref<1x64xf32, #tpu.memory_space<vmem>>, %arg16: memref<64x64xbf16, #tpu.memory_space<vmem>>, %arg17: memref<1x64xf32, #tpu.memory_space<vmem>>, %arg18: memref<64x64xbf16, #tpu.memory_space<vmem>>, %arg19: memref<1x64xf32, #tpu.memory_space<vmem>>, %arg20: memref<64x128xbf16, #tpu.memory_space<vmem>>, %arg21: memref<1x128xf32, #tpu.memory_space<vmem>>, %arg22: memref<128x256xbf16, #tpu.memory_space<vmem>>, %arg23: memref<1x256xf32, #tpu.memory_space<vmem>>, %arg24: memref<256x256xbf16, #tpu.memory_space<vmem>>, %arg25: memref<1x256xf32, #tpu.memory_space<vmem>>, %arg26: memref<256x128xbf16, #tpu.memory_space<vmem>>, %arg27: memref<1x128xf32, #tpu.memory_space<vmem>>, %arg28: memref<128x4096xbf16, #tpu.memory_space<vmem>>, %arg29: memref<1x4096xf32, #tpu.memory_space<vmem>>, %arg30: memref<2x3x16xf32, #tpu.memory_space<vmem>>, %arg31: memref<2x16x64xbf16, #tpu.memory_space<vmem>>, %arg32: memref<2x1x4096xf32, #tpu.memory_space<vmem>>) attributes {dimension_semantics = [#tpu.dimension_semantics<parallel>], iteration_bounds = array<i64: 1>, scalar_prefetch = 0 : i64, scratch_operands = 0 : i64, tpu.core_type = #tpu.core_type<tc>, window_params = [{transform_indices = @transform_0, window_bounds = array<i64: 2, 3, 16>}, {pipeline_mode = #tpu.pipeline_mode<synchronous>, transform_indices = @transform_1, window_bounds = array<i64: 3, 64>}, {pipeline_mode = #tpu.pipeline_mode<synchronous>, transform_indices = @transform_2, window_bounds = array<i64: 1, 64>}, {pipeline_mode = #tpu.pipeline_mode<synchronous>, transform_indices = @transform_3, window_bounds = array<i64: 64, 128>}, {pipeline_mode = #tpu.pipeline_mode<synchronous>, transform_indices = @transform_4, window_bounds = array<i64: 1, 128>}, {pipeline_mode = #tpu.pipeline_mode<synchronous>, transform_indices = @transform_5, window_bounds = array<i64: 128, 256>}, {pipeline_mode = #tpu.pipeline_mode<synchronous>, transform_indices = @transform_6, window_bounds = array<i64: 1, 256>}, {pipeline_mode = #tpu.pipeline_mode<synchronous>, transform_indices = @transform_7, window_bounds = array<i64: 256, 256>}, {pipeline_mode = #tpu.pipeline_mode<synchronous>, transform_indices = @transform_8, window_bounds = array<i64: 1, 256>}, {pipeline_mode = #tpu.pipeline_mode<synchronous>, transform_indices = @transform_9, window_bounds = array<i64: 256, 128>}, {pipeline_mode = #tpu.pipeline_mode<synchronous>, transform_indices = @transform_10, window_bounds = array<i64: 1, 128>}, {pipeline_mode = #tpu.pipeline_mode<synchronous>, transform_indices = @transform_11, window_bounds = array<i64: 128, 9>}, {pipeline_mode = #tpu.pipeline_mode<synchronous>, transform_indices = @transform_12, window_bounds = array<i64: 1, 9>}, {pipeline_mode = #tpu.pipeline_mode<synchronous>, transform_indices = @transform_13, window_bounds = array<i64: 3, 64>}, {pipeline_mode = #tpu.pipeline_mode<synchronous>, transform_indices = @transform_14, window_bounds = array<i64: 1, 64>}, {pipeline_mode = #tpu.pipeline_mode<synchronous>, transform_indices = @transform_15, window_bounds = array<i64: 64, 64>}, {pipeline_mode = #tpu.pipeline_mode<synchronous>, transform_indices = @transform_16, window_bounds = array<i64: 1, 64>}, {pipeline_mode = #tpu.pipeline_mode<synchronous>, transform_indices = @transform_17, window_bounds = array<i64: 64, 64>}, {pipeline_mode = #tpu.pipeline_mode<synchronous>, transform_indices = @transform_18, window_bounds = array<i64: 1, 64>}, {pipeline_mode = #tpu.pipeline_mode<synchronous>, transform_indices = @transform_19, window_bounds = array<i64: 64, 128>}, {pipeline_mode = #tpu.pipeline_mode<synchronous>, transform_indices = @transform_20, window_bounds = array<i64: 1, 128>}, {pipeline_mode = #tpu.pipeline_mode<synchronous>, transform_indices = @transform_21, window_bounds = array<i64: 128, 256>}, {pipeline_mode = #tpu.pipeline_mode<synchronous>, transform_indices = @transform_22, window_bounds = array<i64: 1, 256>}, {pipeline_mode = #tpu.pipeline_mode<synchronous>, transform_indices = @transform_23, window_bounds = array<i64: 256, 256>}, {pipeline_mode = #tpu.pipeline_mode<synchronous>, transform_indices = @transform_24, window_bounds = array<i64: 1, 256>}, {pipeline_mode = #tpu.pipeline_mode<synchronous>, transform_indices = @transform_25, window_bounds = array<i64: 256, 128>}, {pipeline_mode = #tpu.pipeline_mode<synchronous>, transform_indices = @transform_26, window_bounds = array<i64: 1, 128>}, {pipeline_mode = #tpu.pipeline_mode<synchronous>, transform_indices = @transform_27, window_bounds = array<i64: 128, 4096>}, {pipeline_mode = #tpu.pipeline_mode<synchronous>, transform_indices = @transform_28, window_bounds = array<i64: 1, 4096>}, {transform_indices = @transform_29, window_bounds = array<i64: 2, 3, 16>}, {transform_indices = @transform_30, window_bounds = array<i64: 2, 16, 64>}, {transform_indices = @transform_31, window_bounds = array<i64: 2, 1, 4096>}]} {
    %c0 = arith.constant 0 : index
    %c0_0 = arith.constant 0 : index
    %c0_1 = arith.constant 0 : index
    %0 = vector.load %arg1[%c0, %c0_0, %c0_1] : memref<2x3x16xbf16, #tpu.memory_space<vmem>>, vector<2x3x16xbf16>
    %1 = arith.extf %0 : vector<2x3x16xbf16> to vector<2x3x16xf32>
    %2 = vector.extract_strided_slice %1 {offsets = [0, 0, 0], sizes = [2, 1, 16], strides = [1, 1, 1]} : vector<2x3x16xf32> to vector<2x1x16xf32>
    %3 = vector.shape_cast %2 : vector<2x1x16xf32> to vector<2x16xf32>
    %4 = vector.extract_strided_slice %1 {offsets = [0, 1, 0], sizes = [2, 1, 16], strides = [1, 1, 1]} : vector<2x3x16xf32> to vector<2x1x16xf32>
    %5 = vector.shape_cast %4 : vector<2x1x16xf32> to vector<2x16xf32>
    %6 = vector.extract_strided_slice %1 {offsets = [0, 2, 0], sizes = [2, 1, 16], strides = [1, 1, 1]} : vector<2x3x16xf32> to vector<2x1x16xf32>
    %7 = vector.shape_cast %6 : vector<2x1x16xf32> to vector<2x16xf32>
    %c0_2 = arith.constant 0 : index
    %c0_3 = arith.constant 0 : index
    %8 = vector.load %arg2[%c0_2, %c0_3] : memref<3x64xbf16, #tpu.memory_space<vmem>>, vector<3x64xbf16>
    %9 = arith.extf %8 : vector<3x64xbf16> to vector<3x64xf32>
    %10 = vector.shape_cast %3 : vector<2x16xf32> to vector<2x16x1xf32>
    %11 = vector.extract_strided_slice %9 {offsets = [0, 0], sizes = [1, 64], strides = [1, 1]} : vector<3x64xf32> to vector<1x64xf32>
    %12 = vector.shape_cast %11 : vector<1x64xf32> to vector<1x1x64xf32>
    %13 = vector.broadcast %10 : vector<2x16x1xf32> to vector<2x16x64xf32>
    %14 = vector.broadcast %12 : vector<1x1x64xf32> to vector<2x16x64xf32>
    %15 = arith.mulf %13, %14 : vector<2x16x64xf32>
    %16 = vector.shape_cast %5 : vector<2x16xf32> to vector<2x16x1xf32>
    %17 = vector.extract_strided_slice %9 {offsets = [1, 0], sizes = [1, 64], strides = [1, 1]} : vector<3x64xf32> to vector<1x64xf32>
    %18 = vector.shape_cast %17 : vector<1x64xf32> to vector<1x1x64xf32>
    %19 = vector.broadcast %16 : vector<2x16x1xf32> to vector<2x16x64xf32>
    %20 = vector.broadcast %18 : vector<1x1x64xf32> to vector<2x16x64xf32>
    %21 = arith.mulf %19, %20 : vector<2x16x64xf32>
    %22 = arith.addf %15, %21 : vector<2x16x64xf32>
    %23 = vector.shape_cast %7 : vector<2x16xf32> to vector<2x16x1xf32>
    %24 = vector.extract_strided_slice %9 {offsets = [2, 0], sizes = [1, 64], strides = [1, 1]} : vector<3x64xf32> to vector<1x64xf32>
    %25 = vector.shape_cast %24 : vector<1x64xf32> to vector<1x1x64xf32>
    %26 = vector.broadcast %23 : vector<2x16x1xf32> to vector<2x16x64xf32>
    %27 = vector.broadcast %25 : vector<1x1x64xf32> to vector<2x16x64xf32>
    %28 = arith.mulf %26, %27 : vector<2x16x64xf32>
    %29 = arith.addf %22, %28 : vector<2x16x64xf32>
    %c0_4 = arith.constant 0 : index
    %c0_5 = arith.constant 0 : index
    %30 = vector.load %arg3[%c0_4, %c0_5] : memref<1x64xf32, #tpu.memory_space<vmem>>, vector<1x64xf32>
    %31 = vector.shape_cast %30 : vector<1x64xf32> to vector<1x1x64xf32>
    %32 = vector.broadcast %31 : vector<1x1x64xf32> to vector<2x16x64xf32>
    %33 = arith.addf %29, %32 : vector<2x16x64xf32>
    %cst = arith.constant 0.000000e+00 : f32
    %34 = vector.broadcast %cst : f32 to vector<2x16x64xf32>
    %35 = arith.maximumf %33, %34 : vector<2x16x64xf32>
    %36 = vector.shape_cast %35 : vector<2x16x64xf32> to vector<32x64xf32>
    %37 = arith.truncf %36 : vector<32x64xf32> to vector<32x64xbf16>
    %c0_6 = arith.constant 0 : index
    %c0_7 = arith.constant 0 : index
    %38 = vector.load %arg4[%c0_6, %c0_7] : memref<64x128xbf16, #tpu.memory_space<vmem>>, vector<64x128xbf16>
    %cst_8 = arith.constant dense<0.000000e+00> : vector<32x128xf32>
    %39 = tpu.matmul %37, %38, %cst_8 {dimension_numbers = #tpu.dot_dimension_numbers<[1], [0], [0], [1], [0, 0, 1, 1], [], []>} : vector<32x64xbf16>, vector<64x128xbf16>, vector<32x128xf32> -> vector<32x128xf32>
    %c0_9 = arith.constant 0 : index
    %c0_10 = arith.constant 0 : index
    %40 = vector.load %arg5[%c0_9, %c0_10] : memref<1x128xf32, #tpu.memory_space<vmem>>, vector<1x128xf32>
    %41 = vector.broadcast %40 : vector<1x128xf32> to vector<32x128xf32>
    %42 = arith.addf %39, %41 : vector<32x128xf32>
    %cst_11 = arith.constant 0.000000e+00 : f32
    %43 = vector.broadcast %cst_11 : f32 to vector<32x128xf32>
    %44 = arith.maximumf %42, %43 : vector<32x128xf32>
    %45 = arith.truncf %44 : vector<32x128xf32> to vector<32x128xbf16>
    %c0_12 = arith.constant 0 : index
    %c0_13 = arith.constant 0 : index
    %46 = vector.load %arg6[%c0_12, %c0_13] : memref<128x256xbf16, #tpu.memory_space<vmem>>, vector<128x256xbf16>
    %cst_14 = arith.constant dense<0.000000e+00> : vector<32x256xf32>
    %47 = tpu.matmul %45, %46, %cst_14 {dimension_numbers = #tpu.dot_dimension_numbers<[1], [0], [0], [1], [0, 0, 1, 1], [], []>} : vector<32x128xbf16>, vector<128x256xbf16>, vector<32x256xf32> -> vector<32x256xf32>
    %c0_15 = arith.constant 0 : index
    %c0_16 = arith.constant 0 : index
    %48 = vector.load %arg7[%c0_15, %c0_16] : memref<1x256xf32, #tpu.memory_space<vmem>>, vector<1x256xf32>
    %49 = vector.broadcast %48 : vector<1x256xf32> to vector<32x256xf32>
    %50 = arith.addf %47, %49 : vector<32x256xf32>
    %cst_17 = arith.constant 0.000000e+00 : f32
    %51 = vector.broadcast %cst_17 : f32 to vector<32x256xf32>
    %52 = arith.maximumf %50, %51 : vector<32x256xf32>
    %53 = vector.shape_cast %52 : vector<32x256xf32> to vector<2x16x256xf32>
    %cst_18 = arith.constant dense<0xFF800000> : vector<2x256xf32>
    %54 = vector.multi_reduction <maximumf>, %53, %cst_18 [1] : vector<2x16x256xf32> to vector<2x256xf32>
    %55 = arith.truncf %54 : vector<2x256xf32> to vector<2x256xbf16>
    %c0_19 = arith.constant 0 : index
    %c0_20 = arith.constant 0 : index
    %56 = vector.load %arg8[%c0_19, %c0_20] : memref<256x256xbf16, #tpu.memory_space<vmem>>, vector<256x256xbf16>
    %cst_21 = arith.constant dense<0.000000e+00> : vector<2x256xf32>
    %57 = tpu.matmul %55, %56, %cst_21 {dimension_numbers = #tpu.dot_dimension_numbers<[1], [0], [0], [1], [0, 0, 1, 1], [], []>} : vector<2x256xbf16>, vector<256x256xbf16>, vector<2x256xf32> -> vector<2x256xf32>
    %c0_22 = arith.constant 0 : index
    %c0_23 = arith.constant 0 : index
    %58 = vector.load %arg9[%c0_22, %c0_23] : memref<1x256xf32, #tpu.memory_space<vmem>>, vector<1x256xf32>
    %59 = vector.broadcast %58 : vector<1x256xf32> to vector<2x256xf32>
    %60 = arith.addf %57, %59 : vector<2x256xf32>
    %cst_24 = arith.constant 0.000000e+00 : f32
    %61 = vector.broadcast %cst_24 : f32 to vector<2x256xf32>
    %62 = arith.maximumf %60, %61 : vector<2x256xf32>
    %63 = arith.truncf %62 : vector<2x256xf32> to vector<2x256xbf16>
    %c0_25 = arith.constant 0 : index
    %c0_26 = arith.constant 0 : index
    %64 = vector.load %arg10[%c0_25, %c0_26] : memref<256x128xbf16, #tpu.memory_space<vmem>>, vector<256x128xbf16>
    %cst_27 = arith.constant dense<0.000000e+00> : vector<2x128xf32>
    %65 = tpu.matmul %63, %64, %cst_27 {dimension_numbers = #tpu.dot_dimension_numbers<[1], [0], [0], [1], [0, 0, 1, 1], [], []>} : vector<2x256xbf16>, vector<256x128xbf16>, vector<2x128xf32> -> vector<2x128xf32>
    %c0_28 = arith.constant 0 : index
    %c0_29 = arith.constant 0 : index
    %66 = vector.load %arg11[%c0_28, %c0_29] : memref<1x128xf32, #tpu.memory_space<vmem>>, vector<1x128xf32>
    %67 = vector.broadcast %66 : vector<1x128xf32> to vector<2x128xf32>
    %68 = arith.addf %65, %67 : vector<2x128xf32>
    %cst_30 = arith.constant 0.000000e+00 : f32
    %69 = vector.broadcast %cst_30 : f32 to vector<2x128xf32>
    %70 = arith.maximumf %68, %69 : vector<2x128xf32>
    %71 = arith.truncf %70 : vector<2x128xf32> to vector<2x128xbf16>
    %c0_31 = arith.constant 0 : index
    %c0_32 = arith.constant 0 : index
    %72 = vector.load %arg12[%c0_31, %c0_32] : memref<128x9xbf16, #tpu.memory_space<vmem>>, vector<128x9xbf16>
    %cst_33 = arith.constant dense<0.000000e+00> : vector<2x9xf32>
    %73 = tpu.matmul %71, %72, %cst_33 {dimension_numbers = #tpu.dot_dimension_numbers<[1], [0], [0], [1], [0, 0, 1, 1], [], []>} : vector<2x128xbf16>, vector<128x9xbf16>, vector<2x9xf32> -> vector<2x9xf32>
    %c0_34 = arith.constant 0 : index
    %c0_35 = arith.constant 0 : index
    %74 = vector.load %arg13[%c0_34, %c0_35] : memref<1x9xf32, #tpu.memory_space<vmem>>, vector<1x9xf32>
    %75 = vector.broadcast %74 : vector<1x9xf32> to vector<2x9xf32>
    %76 = arith.addf %73, %75 : vector<2x9xf32>
    %77 = vector.extract_strided_slice %76 {offsets = [0, 0], sizes = [2, 1], strides = [1, 1]} : vector<2x9xf32> to vector<2x1xf32>
    %78 = vector.broadcast %77 : vector<2x1xf32> to vector<2x16xf32>
    %79 = arith.mulf %3, %78 : vector<2x16xf32>
    %80 = vector.extract_strided_slice %76 {offsets = [0, 3], sizes = [2, 1], strides = [1, 1]} : vector<2x9xf32> to vector<2x1xf32>
    %81 = vector.broadcast %80 : vector<2x1xf32> to vector<2x16xf32>
    %82 = arith.mulf %5, %81 : vector<2x16xf32>
    %83 = arith.addf %79, %82 : vector<2x16xf32>
    %84 = vector.extract_strided_slice %76 {offsets = [0, 6], sizes = [2, 1], strides = [1, 1]} : vector<2x9xf32> to vector<2x1xf32>
    %85 = vector.broadcast %84 : vector<2x1xf32> to vector<2x16xf32>
    %86 = arith.mulf %7, %85 : vector<2x16xf32>
    %87 = arith.addf %83, %86 : vector<2x16xf32>
    %88 = vector.shape_cast %87 : vector<2x16xf32> to vector<2x1x16xf32>
    %c0_36 = arith.constant 0 : index
    %c0_37 = arith.constant 0 : index
    %c0_38 = arith.constant 0 : index
    %89 = vector.load %arg30[%c0_36, %c0_37, %c0_38] : memref<2x3x16xf32, #tpu.memory_space<vmem>>, vector<2x1x16xf32>
    tpu.vector_store %arg30[%c0_36, %c0_37, %c0_38], %88 {strides = array<i32>} : memref<2x3x16xf32, #tpu.memory_space<vmem>>, vector<2x1x16xf32>,
    %90 = vector.extract_strided_slice %76 {offsets = [0, 1], sizes = [2, 1], strides = [1, 1]} : vector<2x9xf32> to vector<2x1xf32>
    %91 = vector.broadcast %90 : vector<2x1xf32> to vector<2x16xf32>
    %92 = arith.mulf %3, %91 : vector<2x16xf32>
    %93 = vector.extract_strided_slice %76 {offsets = [0, 4], sizes = [2, 1], strides = [1, 1]} : vector<2x9xf32> to vector<2x1xf32>
    %94 = vector.broadcast %93 : vector<2x1xf32> to vector<2x16xf32>
    %95 = arith.mulf %5, %94 : vector<2x16xf32>
    %96 = arith.addf %92, %95 : vector<2x16xf32>
    %97 = vector.extract_strided_slice %76 {offsets = [0, 7], sizes = [2, 1], strides = [1, 1]} : vector<2x9xf32> to vector<2x1xf32>
    %98 = vector.broadcast %97 : vector<2x1xf32> to vector<2x16xf32>
    %99 = arith.mulf %7, %98 : vector<2x16xf32>
    %100 = arith.addf %96, %99 : vector<2x16xf32>
    %101 = vector.shape_cast %100 : vector<2x16xf32> to vector<2x1x16xf32>
    %c0_39 = arith.constant 0 : index
    %c1 = arith.constant 1 : index
    %c0_40 = arith.constant 0 : index
    %102 = vector.load %arg30[%c0_39, %c1, %c0_40] : memref<2x3x16xf32, #tpu.memory_space<vmem>>, vector<2x1x16xf32>
    tpu.vector_store %arg30[%c0_39, %c1, %c0_40], %101 {strides = array<i32>} : memref<2x3x16xf32, #tpu.memory_space<vmem>>, vector<2x1x16xf32>,
    %103 = vector.extract_strided_slice %76 {offsets = [0, 2], sizes = [2, 1], strides = [1, 1]} : vector<2x9xf32> to vector<2x1xf32>
    %104 = vector.broadcast %103 : vector<2x1xf32> to vector<2x16xf32>
    %105 = arith.mulf %3, %104 : vector<2x16xf32>
    %106 = vector.extract_strided_slice %76 {offsets = [0, 5], sizes = [2, 1], strides = [1, 1]} : vector<2x9xf32> to vector<2x1xf32>
    %107 = vector.broadcast %106 : vector<2x1xf32> to vector<2x16xf32>
    %108 = arith.mulf %5, %107 : vector<2x16xf32>
    %109 = arith.addf %105, %108 : vector<2x16xf32>
    %110 = vector.extract_strided_slice %76 {offsets = [0, 8], sizes = [2, 1], strides = [1, 1]} : vector<2x9xf32> to vector<2x1xf32>
    %111 = vector.broadcast %110 : vector<2x1xf32> to vector<2x16xf32>
    %112 = arith.mulf %7, %111 : vector<2x16xf32>
    %113 = arith.addf %109, %112 : vector<2x16xf32>
    %114 = vector.shape_cast %113 : vector<2x16xf32> to vector<2x1x16xf32>
    %c0_41 = arith.constant 0 : index
    %c2 = arith.constant 2 : index
    %c0_42 = arith.constant 0 : index
    %115 = vector.load %arg30[%c0_41, %c2, %c0_42] : memref<2x3x16xf32, #tpu.memory_space<vmem>>, vector<2x1x16xf32>
    tpu.vector_store %arg30[%c0_41, %c2, %c0_42], %114 {strides = array<i32>} : memref<2x3x16xf32, #tpu.memory_space<vmem>>, vector<2x1x16xf32>,
    %c0_43 = arith.constant 0 : index
    %c0_44 = arith.constant 0 : index
    %116 = vector.load %arg14[%c0_43, %c0_44] : memref<3x64xbf16, #tpu.memory_space<vmem>>, vector<3x64xbf16>
    %117 = arith.extf %116 : vector<3x64xbf16> to vector<3x64xf32>
    %118 = vector.shape_cast %87 : vector<2x16xf32> to vector<2x16x1xf32>
    %119 = vector.extract_strided_slice %117 {offsets = [0, 0], sizes = [1, 64], strides = [1, 1]} : vector<3x64xf32> to vector<1x64xf32>
    %120 = vector.shape_cast %119 : vector<1x64xf32> to vector<1x1x64xf32>
    %121 = vector.broadcast %118 : vector<2x16x1xf32> to vector<2x16x64xf32>
    %122 = vector.broadcast %120 : vector<1x1x64xf32> to vector<2x16x64xf32>
    %123 = arith.mulf %121, %122 : vector<2x16x64xf32>
    %124 = vector.shape_cast %100 : vector<2x16xf32> to vector<2x16x1xf32>
    %125 = vector.extract_strided_slice %117 {offsets = [1, 0], sizes = [1, 64], strides = [1, 1]} : vector<3x64xf32> to vector<1x64xf32>
    %126 = vector.shape_cast %125 : vector<1x64xf32> to vector<1x1x64xf32>
    %127 = vector.broadcast %124 : vector<2x16x1xf32> to vector<2x16x64xf32>
    %128 = vector.broadcast %126 : vector<1x1x64xf32> to vector<2x16x64xf32>
    %129 = arith.mulf %127, %128 : vector<2x16x64xf32>
    %130 = arith.addf %123, %129 : vector<2x16x64xf32>
    %131 = vector.shape_cast %113 : vector<2x16xf32> to vector<2x16x1xf32>
    %132 = vector.extract_strided_slice %117 {offsets = [2, 0], sizes = [1, 64], strides = [1, 1]} : vector<3x64xf32> to vector<1x64xf32>
    %133 = vector.shape_cast %132 : vector<1x64xf32> to vector<1x1x64xf32>
    %134 = vector.broadcast %131 : vector<2x16x1xf32> to vector<2x16x64xf32>
    %135 = vector.broadcast %133 : vector<1x1x64xf32> to vector<2x16x64xf32>
    %136 = arith.mulf %134, %135 : vector<2x16x64xf32>
    %137 = arith.addf %130, %136 : vector<2x16x64xf32>
    %c0_45 = arith.constant 0 : index
    %c0_46 = arith.constant 0 : index
    %138 = vector.load %arg15[%c0_45, %c0_46] : memref<1x64xf32, #tpu.memory_space<vmem>>, vector<1x64xf32>
    %139 = vector.shape_cast %138 : vector<1x64xf32> to vector<1x1x64xf32>
    %140 = vector.broadcast %139 : vector<1x1x64xf32> to vector<2x16x64xf32>
    %141 = arith.addf %137, %140 : vector<2x16x64xf32>
    %cst_47 = arith.constant 0.000000e+00 : f32
    %142 = vector.broadcast %cst_47 : f32 to vector<2x16x64xf32>
    %143 = arith.maximumf %141, %142 : vector<2x16x64xf32>
    %144 = vector.shape_cast %143 : vector<2x16x64xf32> to vector<32x64xf32>
    %145 = arith.truncf %144 : vector<32x64xf32> to vector<32x64xbf16>
    %c0_48 = arith.constant 0 : index
    %c0_49 = arith.constant 0 : index
    %146 = vector.load %arg16[%c0_48, %c0_49] : memref<64x64xbf16, #tpu.memory_space<vmem>>, vector<64x64xbf16>
    %cst_50 = arith.constant dense<0.000000e+00> : vector<32x64xf32>
    %147 = tpu.matmul %145, %146, %cst_50 {dimension_numbers = #tpu.dot_dimension_numbers<[1], [0], [0], [1], [0, 0, 1, 1], [], []>} : vector<32x64xbf16>, vector<64x64xbf16>, vector<32x64xf32> -> vector<32x64xf32>
    %c0_51 = arith.constant 0 : index
    %c0_52 = arith.constant 0 : index
    %148 = vector.load %arg17[%c0_51, %c0_52] : memref<1x64xf32, #tpu.memory_space<vmem>>, vector<1x64xf32>
    %149 = vector.broadcast %148 : vector<1x64xf32> to vector<32x64xf32>
    %150 = arith.addf %147, %149 : vector<32x64xf32>
    %cst_53 = arith.constant 0.000000e+00 : f32
    %151 = vector.broadcast %cst_53 : f32 to vector<32x64xf32>
    %152 = arith.maximumf %150, %151 : vector<32x64xf32>
    %153 = vector.shape_cast %152 : vector<32x64xf32> to vector<2x16x64xf32>
    %154 = arith.truncf %153 : vector<2x16x64xf32> to vector<2x16x64xbf16>
    %c0_54 = arith.constant 0 : index
    %c0_55 = arith.constant 0 : index
    %c0_56 = arith.constant 0 : index
    %155 = vector.load %arg31[%c0_54, %c0_55, %c0_56] : memref<2x16x64xbf16, #tpu.memory_space<vmem>>, vector<2x16x64xbf16>
    tpu.vector_store %arg31[%c0_54, %c0_55, %c0_56], %154 {strides = array<i32>} : memref<2x16x64xbf16, #tpu.memory_space<vmem>>, vector<2x16x64xbf16>,
    %156 = arith.truncf %152 : vector<32x64xf32> to vector<32x64xbf16>
    %c0_57 = arith.constant 0 : index
    %c0_58 = arith.constant 0 : index
    %157 = vector.load %arg18[%c0_57, %c0_58] : memref<64x64xbf16, #tpu.memory_space<vmem>>, vector<64x64xbf16>
    %cst_59 = arith.constant dense<0.000000e+00> : vector<32x64xf32>
    %158 = tpu.matmul %156, %157, %cst_59 {dimension_numbers = #tpu.dot_dimension_numbers<[1], [0], [0], [1], [0, 0, 1, 1], [], []>} : vector<32x64xbf16>, vector<64x64xbf16>, vector<32x64xf32> -> vector<32x64xf32>
    %c0_60 = arith.constant 0 : index
    %c0_61 = arith.constant 0 : index
    %159 = vector.load %arg19[%c0_60, %c0_61] : memref<1x64xf32, #tpu.memory_space<vmem>>, vector<1x64xf32>
    %160 = vector.broadcast %159 : vector<1x64xf32> to vector<32x64xf32>
    %161 = arith.addf %158, %160 : vector<32x64xf32>
    %cst_62 = arith.constant 0.000000e+00 : f32
    %162 = vector.broadcast %cst_62 : f32 to vector<32x64xf32>
    %163 = arith.maximumf %161, %162 : vector<32x64xf32>
    %164 = arith.truncf %163 : vector<32x64xf32> to vector<32x64xbf16>
    %c0_63 = arith.constant 0 : index
    %c0_64 = arith.constant 0 : index
    %165 = vector.load %arg20[%c0_63, %c0_64] : memref<64x128xbf16, #tpu.memory_space<vmem>>, vector<64x128xbf16>
    %cst_65 = arith.constant dense<0.000000e+00> : vector<32x128xf32>
    %166 = tpu.matmul %164, %165, %cst_65 {dimension_numbers = #tpu.dot_dimension_numbers<[1], [0], [0], [1], [0, 0, 1, 1], [], []>} : vector<32x64xbf16>, vector<64x128xbf16>, vector<32x128xf32> -> vector<32x128xf32>
    %c0_66 = arith.constant 0 : index
    %c0_67 = arith.constant 0 : index
    %167 = vector.load %arg21[%c0_66, %c0_67] : memref<1x128xf32, #tpu.memory_space<vmem>>, vector<1x128xf32>
    %168 = vector.broadcast %167 : vector<1x128xf32> to vector<32x128xf32>
    %169 = arith.addf %166, %168 : vector<32x128xf32>
    %cst_68 = arith.constant 0.000000e+00 : f32
    %170 = vector.broadcast %cst_68 : f32 to vector<32x128xf32>
    %171 = arith.maximumf %169, %170 : vector<32x128xf32>
    %172 = arith.truncf %171 : vector<32x128xf32> to vector<32x128xbf16>
    %c0_69 = arith.constant 0 : index
    %c0_70 = arith.constant 0 : index
    %173 = vector.load %arg22[%c0_69, %c0_70] : memref<128x256xbf16, #tpu.memory_space<vmem>>, vector<128x256xbf16>
    %cst_71 = arith.constant dense<0.000000e+00> : vector<32x256xf32>
    %174 = tpu.matmul %172, %173, %cst_71 {dimension_numbers = #tpu.dot_dimension_numbers<[1], [0], [0], [1], [0, 0, 1, 1], [], []>} : vector<32x128xbf16>, vector<128x256xbf16>, vector<32x256xf32> -> vector<32x256xf32>
    %c0_72 = arith.constant 0 : index
    %c0_73 = arith.constant 0 : index
    %175 = vector.load %arg23[%c0_72, %c0_73] : memref<1x256xf32, #tpu.memory_space<vmem>>, vector<1x256xf32>
    %176 = vector.broadcast %175 : vector<1x256xf32> to vector<32x256xf32>
    %177 = arith.addf %174, %176 : vector<32x256xf32>
    %cst_74 = arith.constant 0.000000e+00 : f32
    %178 = vector.broadcast %cst_74 : f32 to vector<32x256xf32>
    %179 = arith.maximumf %177, %178 : vector<32x256xf32>
    %180 = vector.shape_cast %179 : vector<32x256xf32> to vector<2x16x256xf32>
    %cst_75 = arith.constant dense<0xFF800000> : vector<2x256xf32>
    %181 = vector.multi_reduction <maximumf>, %180, %cst_75 [1] : vector<2x16x256xf32> to vector<2x256xf32>
    %182 = arith.truncf %181 : vector<2x256xf32> to vector<2x256xbf16>
    %c0_76 = arith.constant 0 : index
    %c0_77 = arith.constant 0 : index
    %183 = vector.load %arg24[%c0_76, %c0_77] : memref<256x256xbf16, #tpu.memory_space<vmem>>, vector<256x256xbf16>
    %cst_78 = arith.constant dense<0.000000e+00> : vector<2x256xf32>
    %184 = tpu.matmul %182, %183, %cst_78 {dimension_numbers = #tpu.dot_dimension_numbers<[1], [0], [0], [1], [0, 0, 1, 1], [], []>} : vector<2x256xbf16>, vector<256x256xbf16>, vector<2x256xf32> -> vector<2x256xf32>
    %c0_79 = arith.constant 0 : index
    %c0_80 = arith.constant 0 : index
    %185 = vector.load %arg25[%c0_79, %c0_80] : memref<1x256xf32, #tpu.memory_space<vmem>>, vector<1x256xf32>
    %186 = vector.broadcast %185 : vector<1x256xf32> to vector<2x256xf32>
    %187 = arith.addf %184, %186 : vector<2x256xf32>
    %cst_81 = arith.constant 0.000000e+00 : f32
    %188 = vector.broadcast %cst_81 : f32 to vector<2x256xf32>
    %189 = arith.maximumf %187, %188 : vector<2x256xf32>
    %190 = arith.truncf %189 : vector<2x256xf32> to vector<2x256xbf16>
    %c0_82 = arith.constant 0 : index
    %c0_83 = arith.constant 0 : index
    %191 = vector.load %arg26[%c0_82, %c0_83] : memref<256x128xbf16, #tpu.memory_space<vmem>>, vector<256x128xbf16>
    %cst_84 = arith.constant dense<0.000000e+00> : vector<2x128xf32>
    %192 = tpu.matmul %190, %191, %cst_84 {dimension_numbers = #tpu.dot_dimension_numbers<[1], [0], [0], [1], [0, 0, 1, 1], [], []>} : vector<2x256xbf16>, vector<256x128xbf16>, vector<2x128xf32> -> vector<2x128xf32>
    %c0_85 = arith.constant 0 : index
    %c0_86 = arith.constant 0 : index
    %193 = vector.load %arg27[%c0_85, %c0_86] : memref<1x128xf32, #tpu.memory_space<vmem>>, vector<1x128xf32>
    %194 = vector.broadcast %193 : vector<1x128xf32> to vector<2x128xf32>
    %195 = arith.addf %192, %194 : vector<2x128xf32>
    %cst_87 = arith.constant 0.000000e+00 : f32
    %196 = vector.broadcast %cst_87 : f32 to vector<2x128xf32>
    %197 = arith.maximumf %195, %196 : vector<2x128xf32>
    %198 = arith.truncf %197 : vector<2x128xf32> to vector<2x128xbf16>
    %c0_88 = arith.constant 0 : index
    %c0_89 = arith.constant 0 : index
    %199 = vector.load %arg28[%c0_88, %c0_89] : memref<128x4096xbf16, #tpu.memory_space<vmem>>, vector<128x4096xbf16>
    %cst_90 = arith.constant dense<0.000000e+00> : vector<2x4096xf32>
    %200 = tpu.matmul %198, %199, %cst_90 {dimension_numbers = #tpu.dot_dimension_numbers<[1], [0], [0], [1], [0, 0, 1, 1], [], []>} : vector<2x128xbf16>, vector<128x4096xbf16>, vector<2x4096xf32> -> vector<2x4096xf32>
    %c0_91 = arith.constant 0 : index
    %c0_92 = arith.constant 0 : index
    %201 = vector.load %arg29[%c0_91, %c0_92] : memref<1x4096xf32, #tpu.memory_space<vmem>>, vector<1x4096xf32>
    %202 = vector.broadcast %201 : vector<1x4096xf32> to vector<2x4096xf32>
    %203 = arith.addf %200, %202 : vector<2x4096xf32>
    %204 = vector.shape_cast %203 : vector<2x4096xf32> to vector<2x1x4096xf32>
    %c0_93 = arith.constant 0 : index
    %c0_94 = arith.constant 0 : index
    %c0_95 = arith.constant 0 : index
    %205 = vector.load %arg32[%c0_93, %c0_94, %c0_95] : memref<2x1x4096xf32, #tpu.memory_space<vmem>>, vector<2x1x4096xf32>
    tpu.vector_store %arg32[%c0_93, %c0_94, %c0_95], %204 {strides = array<i32>} : memref<2x1x4096xf32, #tpu.memory_space<vmem>>, vector<2x1x4096xf32>,
    return
  }
  func.func @transform_0(%arg0: i32) -> (i32, i32, i32) {
    %c0_i32 = arith.constant 0 : i32
    %c0_i32_0 = arith.constant 0 : i32
    %c0_i32_1 = arith.constant 0 : i32
    return %arg0, %c0_i32, %c0_i32_0 : i32, i32, i32
  }
  func.func @transform_1(%arg0: i32) -> (i32, i32) {
    %c0_i32 = arith.constant 0 : i32
    %c0_i32_0 = arith.constant 0 : i32
    %c0_i32_1 = arith.constant 0 : i32
    return %c0_i32, %c0_i32_0 : i32, i32
  }
  func.func @transform_2(%arg0: i32) -> (i32, i32) {
    %c0_i32 = arith.constant 0 : i32
    %c0_i32_0 = arith.constant 0 : i32
    %c0_i32_1 = arith.constant 0 : i32
    return %c0_i32, %c0_i32_0 : i32, i32
  }
  func.func @transform_3(%arg0: i32) -> (i32, i32) {
    %c0_i32 = arith.constant 0 : i32
    %c0_i32_0 = arith.constant 0 : i32
    %c0_i32_1 = arith.constant 0 : i32
    return %c0_i32, %c0_i32_0 : i32, i32
  }
  func.func @transform_4(%arg0: i32) -> (i32, i32) {
    %c0_i32 = arith.constant 0 : i32
    %c0_i32_0 = arith.constant 0 : i32
    %c0_i32_1 = arith.constant 0 : i32
    return %c0_i32, %c0_i32_0 : i32, i32
  }
  func.func @transform_5(%arg0: i32) -> (i32, i32) {
    %c0_i32 = arith.constant 0 : i32
    %c0_i32_0 = arith.constant 0 : i32
    %c0_i32_1 = arith.constant 0 : i32
    return %c0_i32, %c0_i32_0 : i32, i32
  }
  func.func @transform_6(%arg0: i32) -> (i32, i32) {
    %c0_i32 = arith.constant 0 : i32
    %c0_i32_0 = arith.constant 0 : i32
    %c0_i32_1 = arith.constant 0 : i32
    return %c0_i32, %c0_i32_0 : i32, i32
  }
  func.func @transform_7(%arg0: i32) -> (i32, i32) {
    %c0_i32 = arith.constant 0 : i32
    %c0_i32_0 = arith.constant 0 : i32
    %c0_i32_1 = arith.constant 0 : i32
    return %c0_i32, %c0_i32_0 : i32, i32
  }
  func.func @transform_8(%arg0: i32) -> (i32, i32) {
    %c0_i32 = arith.constant 0 : i32
    %c0_i32_0 = arith.constant 0 : i32
    %c0_i32_1 = arith.constant 0 : i32
    return %c0_i32, %c0_i32_0 : i32, i32
  }
  func.func @transform_9(%arg0: i32) -> (i32, i32) {
    %c0_i32 = arith.constant 0 : i32
    %c0_i32_0 = arith.constant 0 : i32
    %c0_i32_1 = arith.constant 0 : i32
    return %c0_i32, %c0_i32_0 : i32, i32
  }
  func.func @transform_10(%arg0: i32) -> (i32, i32) {
    %c0_i32 = arith.constant 0 : i32
    %c0_i32_0 = arith.constant 0 : i32
    %c0_i32_1 = arith.constant 0 : i32
    return %c0_i32, %c0_i32_0 : i32, i32
  }
  func.func @transform_11(%arg0: i32) -> (i32, i32) {
    %c0_i32 = arith.constant 0 : i32
    %c0_i32_0 = arith.constant 0 : i32
    %c0_i32_1 = arith.constant 0 : i32
    return %c0_i32, %c0_i32_0 : i32, i32
  }
  func.func @transform_12(%arg0: i32) -> (i32, i32) {
    %c0_i32 = arith.constant 0 : i32
    %c0_i32_0 = arith.constant 0 : i32
    %c0_i32_1 = arith.constant 0 : i32
    return %c0_i32, %c0_i32_0 : i32, i32
  }
  func.func @transform_13(%arg0: i32) -> (i32, i32) {
    %c0_i32 = arith.constant 0 : i32
    %c0_i32_0 = arith.constant 0 : i32
    %c0_i32_1 = arith.constant 0 : i32
    return %c0_i32, %c0_i32_0 : i32, i32
  }
  func.func @transform_14(%arg0: i32) -> (i32, i32) {
    %c0_i32 = arith.constant 0 : i32
    %c0_i32_0 = arith.constant 0 : i32
    %c0_i32_1 = arith.constant 0 : i32
    return %c0_i32, %c0_i32_0 : i32, i32
  }
  func.func @transform_15(%arg0: i32) -> (i32, i32) {
    %c0_i32 = arith.constant 0 : i32
    %c0_i32_0 = arith.constant 0 : i32
    %c0_i32_1 = arith.constant 0 : i32
    return %c0_i32, %c0_i32_0 : i32, i32
  }
  func.func @transform_16(%arg0: i32) -> (i32, i32) {
    %c0_i32 = arith.constant 0 : i32
    %c0_i32_0 = arith.constant 0 : i32
    %c0_i32_1 = arith.constant 0 : i32
    return %c0_i32, %c0_i32_0 : i32, i32
  }
  func.func @transform_17(%arg0: i32) -> (i32, i32) {
    %c0_i32 = arith.constant 0 : i32
    %c0_i32_0 = arith.constant 0 : i32
    %c0_i32_1 = arith.constant 0 : i32
    return %c0_i32, %c0_i32_0 : i32, i32
  }
  func.func @transform_18(%arg0: i32) -> (i32, i32) {
    %c0_i32 = arith.constant 0 : i32
    %c0_i32_0 = arith.constant 0 : i32
    %c0_i32_1 = arith.constant 0 : i32
    return %c0_i32, %c0_i32_0 : i32, i32
  }
  func.func @transform_19(%arg0: i32) -> (i32, i32) {
    %c0_i32 = arith.constant 0 : i32
    %c0_i32_0 = arith.constant 0 : i32
    %c0_i32_1 = arith.constant 0 : i32
    return %c0_i32, %c0_i32_0 : i32, i32
  }
  func.func @transform_20(%arg0: i32) -> (i32, i32) {
    %c0_i32 = arith.constant 0 : i32
    %c0_i32_0 = arith.constant 0 : i32
    %c0_i32_1 = arith.constant 0 : i32
    return %c0_i32, %c0_i32_0 : i32, i32
  }
  func.func @transform_21(%arg0: i32) -> (i32, i32) {
    %c0_i32 = arith.constant 0 : i32
    %c0_i32_0 = arith.constant 0 : i32
    %c0_i32_1 = arith.constant 0 : i32
    return %c0_i32, %c0_i32_0 : i32, i32
  }
  func.func @transform_22(%arg0: i32) -> (i32, i32) {
    %c0_i32 = arith.constant 0 : i32
    %c0_i32_0 = arith.constant 0 : i32
    %c0_i32_1 = arith.constant 0 : i32
    return %c0_i32, %c0_i32_0 : i32, i32
  }
  func.func @transform_23(%arg0: i32) -> (i32, i32) {
    %c0_i32 = arith.constant 0 : i32
    %c0_i32_0 = arith.constant 0 : i32
    %c0_i32_1 = arith.constant 0 : i32
    return %c0_i32, %c0_i32_0 : i32, i32
  }
  func.func @transform_24(%arg0: i32) -> (i32, i32) {
    %c0_i32 = arith.constant 0 : i32
    %c0_i32_0 = arith.constant 0 : i32
    %c0_i32_1 = arith.constant 0 : i32
    return %c0_i32, %c0_i32_0 : i32, i32
  }
  func.func @transform_25(%arg0: i32) -> (i32, i32) {
    %c0_i32 = arith.constant 0 : i32
    %c0_i32_0 = arith.constant 0 : i32
    %c0_i32_1 = arith.constant 0 : i32
    return %c0_i32, %c0_i32_0 : i32, i32
  }
  func.func @transform_26(%arg0: i32) -> (i32, i32) {
    %c0_i32 = arith.constant 0 : i32
    %c0_i32_0 = arith.constant 0 : i32
    %c0_i32_1 = arith.constant 0 : i32
    return %c0_i32, %c0_i32_0 : i32, i32
  }
  func.func @transform_27(%arg0: i32) -> (i32, i32) {
    %c0_i32 = arith.constant 0 : i32
    %c0_i32_0 = arith.constant 0 : i32
    %c0_i32_1 = arith.constant 0 : i32
    return %c0_i32, %c0_i32_0 : i32, i32
  }
  func.func @transform_28(%arg0: i32) -> (i32, i32) {
    %c0_i32 = arith.constant 0 : i32
    %c0_i32_0 = arith.constant 0 : i32
    %c0_i32_1 = arith.constant 0 : i32
    return %c0_i32, %c0_i32_0 : i32, i32
  }
  func.func @transform_29(%arg0: i32) -> (i32, i32, i32) {
    %c0_i32 = arith.constant 0 : i32
    %c0_i32_0 = arith.constant 0 : i32
    %c0_i32_1 = arith.constant 0 : i32
    return %arg0, %c0_i32, %c0_i32_0 : i32, i32, i32
  }
  func.func @transform_30(%arg0: i32) -> (i32, i32, i32) {
    %c0_i32 = arith.constant 0 : i32
    %c0_i32_0 = arith.constant 0 : i32
    %c0_i32_1 = arith.constant 0 : i32
    return %arg0, %c0_i32, %c0_i32_0 : i32, i32, i32
  }
  func.func @transform_31(%arg0: i32) -> (i32, i32, i32) {
    %c0_i32 = arith.constant 0 : i32
    %c0_i32_0 = arith.constant 0 : i32
    %c0_i32_1 = arith.constant 0 : i32
    return %arg0, %c0_i32, %c0_i32_0 : i32, i32, i32
  }
}

</mosaic_0001>

<bundles_post_ra>
// kernel: tpu_custom_call.1
= control target key start
LH: loop header
LB: loop body
LE: loop exit
PB: predicated region body
PF: predicated region fallthrough
CT: control target
= control target key end

     0   :  { %s7135_s6 = smov 1   ;;  %s7136_s10 = smov 2   ;;  %s7788_s0 = inlined_call_operand.smem [shape: u32[32], index: -1, kind: input, shape index: {}] }
   0x1   :  { %s7227_s5 = sld [smem:[%s7788_s0]]   ;;  %s7137_s14 = smov 3  }
   0x2   :  { %s7232_s9 = sld [smem:[%s7788_s0 + %s7135_s6]]   ;;  %s7138_s18 = smov 4  }
   0x3   :  { %s7237_s13 = sld [smem:[%s7788_s0 + %s7136_s10]]   ;;  %s7139_s22 = smov 5  }
   0x4   :  { %s7242_s17 = sld [smem:[%s7788_s0 + %s7137_s14]]   ;;  %s7140_s26 = smov 6  }
   0x5   :  { %s7247_s21 = sld [smem:[%s7788_s0 + %s7138_s18]]   ;;  %s7141_s30 = smov 7  }
   0x6   :  { %s7252_s25 = sld [smem:[%s7788_s0 + %s7139_s22]]   ;;  %s7142_s4 = smov 8  }
   0x7   :  { %7803 = sst [smem:[#allocation68_spill]] %s7227_s5  ;;  %s7143_s10 = smov 9  }
   0x8   :  { %s7257_s29 = sld [smem:[%s7788_s0 + %s7140_s26]]   ;;  %s7144_s15 = smov 10  }
   0x9   :  { %7804 = sst [smem:[#allocation69_spill]] %s7237_s13  ;;  %s7145_s20 = smov 11  }
   0xa   :  { %s7262_s3 = sld [smem:[%s7788_s0 + %s7141_s30]]   ;;  %s7146_s26 = smov 12  }
   0xb   :  { %7805 = sst [smem:[#allocation70_spill]] %s7247_s21  ;;  %s7147_s1 = smov 13  }
   0xc   :  { %s7267_s8 = sld [smem:[%s7788_s0 + %s7142_s4]]   ;;  %s7148_s7 = smov 14  }
   0xd   :  { %s7272_s14 = sld [smem:[%s7788_s0 + %s7143_s10]]   ;;  %s7150_s22 = smov 16  }
   0xe   :  { %7806 = sst [smem:[#allocation71_spill]] %s7257_s29  ;;  %s7151_s28 = smov 17  }
   0xf   :  { %s7277_s19 = sld [smem:[%s7788_s0 + %s7144_s15]]   ;;  %s7149_s15 = smov 15  }
  0x10   :  { %s7282_s24 = sld [smem:[%s7788_s0 + %s7145_s20]]  }
  0x11   :  { %s7287_s30 = sld [smem:[%s7788_s0 + %s7146_s26]]  }
  0x12   :  { %7807 = sst [smem:[#allocation72_spill]] %s7267_s8 }
  0x13   :  { %s7292_s6 = sld [smem:[%s7788_s0 + %s7147_s1]]  }
  0x14   :  { %s7297_s12 = sld [smem:[%s7788_s0 + %s7148_s7]]   ;;  %s7152_s7 = smov 18  }
  0x15   :  { %7808 = sst [smem:[#allocation73_spill]] %s7277_s19 }
  0x16   :  { %s7302_s20 = sld [smem:[%s7788_s0 + %s7149_s15]]   ;;  %s7153_s15 = smov 19  }
  0x17   :  { %7809 = sst [smem:[#allocation74_spill]] %s7287_s30 }
  0x18   :  { %s7307_s27 = sld [smem:[%s7788_s0 + %s7150_s22]]   ;;  %s7154_s22 = smov 20  }
  0x19   :  { %s7312_s4 = sld [smem:[%s7788_s0 + %s7151_s28]]   ;;  %s7155_s28 = smov 21  }
  0x1a   :  { %7810 = sst [smem:[#allocation75_spill]] %s7297_s12 }
  0x1b   :  { %s7317_s12 = sld [smem:[%s7788_s0 + %s7152_s7]]   ;;  %s7156_s7 = smov 22  }
  0x1c   :  { %s7322_s30 = sld [smem:[%s7788_s0 + %s7153_s15]]   ;;  %s7157_s15 = smov 23  }
  0x1d   :  { %s7332_s19 = sld [smem:[%s7788_s0 + %s7155_s28]]   ;;  %s7159_s28 = smov 25  }
  0x1e   :  { %7811 = sst [smem:[#allocation76_spill]] %s7307_s27 }
  0x1f   :  { %s7327_s27 = sld [smem:[%s7788_s0 + %s7154_s22]]   ;;  %s7158_s22 = smov 24  }
  0x20   :  { %s7342_s8 = sld [smem:[%s7788_s0 + %s7157_s15]]   ;;  %s7161_s15 = smov 27  }
  0x21   :  { %7812 = sst [smem:[#allocation77_spill]] %s7317_s12 }
  0x22   :  { %s7337_s12 = sld [smem:[%s7788_s0 + %s7156_s7]]   ;;  %s7160_s7 = smov 26  }
  0x23   :  { %s7352_s29 = sld [smem:[%s7788_s0 + %s7159_s28]]   ;;  %s7163_s28 = smov 29  }
  0x24   :  { %s7362_s21 = sld [smem:[%s7788_s0 + %s7161_s15]]   ;;  %s7165_s15 = smov 31  }
  0x25   :  { %7813 = sst [smem:[#allocation78_spill]] %s7327_s27 }
  0x26   :  { %s7347_s27 = sld [smem:[%s7788_s0 + %s7158_s22]]   ;;  %s7162_s22 = smov 28  }
  0x27   :  { %s7372_s13 = sld [smem:[%s7788_s0 + %s7163_s28]]  }
  0x28   :  { %7814 = sst [smem:[#allocation79_spill]] %s7337_s12 }
  0x29   :  { %s7357_s12 = sld [smem:[%s7788_s0 + %s7160_s7]]   ;;  %s7164_s7 = smov 30  }
  0x2a   :  { %s7382_s5 = sld [smem:[%s7788_s0 + %s7165_s15]]  }
  0x2c   :  { %7815 = sst [smem:[#allocation80_spill]] %s7347_s27 }
  0x2d   :  { %s7367_s27 = sld [smem:[%s7788_s0 + %s7162_s22]]  }
  0x2f   :  { %7816 = sst [smem:[#allocation81_spill]] %s7357_s12 }
  0x30   :  { %s7377_s12 = sld [smem:[%s7788_s0 + %s7164_s7]]  }
  0x31   :  { %69 = vsyncpa [#allocation3], 0 }
  0x32   :  { %70 = vsyncpa [#allocation6], 0 }
  0x33   :  { %71 = vsyncpa [#allocation9], 0 }
  0x34   :  { %72 = vsyncpa [#allocation12], 0 }
  0x35   :  { %73 = vsyncpa [#allocation15], 0 }
  0x36   :  { %74 = vsyncpa [#allocation18], 0 }
  0x37   :  { %75 = vsyncpa [#allocation21], 0 }
  0x38   :  { %76 = vsyncpa [#allocation24], 0 }
  0x39   :  { %77 = vsyncpa [#allocation27], 0 }
  0x3a   :  { %78 = vsyncpa [#allocation30], 0 }
  0x3b   :  { %79 = vsyncpa [#allocation33], 0 }
  0x3c   :  { %80 = vsyncpa [#allocation36], 0 }
  0x3d   :  { %81 = vsyncpa [#allocation39], 0 }
  0x3e   :  { %82 = vsyncpa [#allocation42], 0 }
  0x3f   :  { %83 = vsyncpa [#allocation45], 0 }
  0x40   :  { %84 = vsyncpa [#allocation4], 0 }
  0x41   :  { %85 = vsyncpa [#allocation49], 0  ;;  %s7166_s0 = smov [#allocation5]   ;;  %s7167_s23 = smov [#allocation8]  }
  0x42   :  { %s104_s22 = sshll.u32 %s7166_s0, 4  ;;  %s123_s26 = sshll.u32 %s7167_s23, 4  ;;  %s105_s22 = int_to_ptr.vmem [resolvable:$true] %s104_s22  ;;  %s7384_s26 = int_to_ptr.vmem [resolvable:$true] %s123_s26 }
  0x43   :  { %s6397_s28 = scalar_lea.hbm %s7232_s9, 32 }
  0x44   :  { %p6398_p0 = scmp.ne.s32.totalorder %s7232_s9, %s6397_s28  ;;  %p6401_p1 = scmp.lt.u32.totalorder %s6397_s28, %s7232_s9 }
  0x46   :  { %p6403_p2 = pnand %p6401_p1, %p6398_p0 }
  0x48   :  { %6406 = shalt.err (!%p6403_p2)
}
  0x49   :  { %s6407_s1 = scalar_lea.vmem %s105_s22, 32  ;;  %p6412_p4 = scmp.lt.s32.totalorder %s105_s22, %s105_s22 }
  0x4a   :  { %p6408_p3 = scmp.ne.s32.totalorder %s105_s22, %s6407_s1  ;;  %p6413_p5 = scmp.lt.s32.totalorder %s6407_s1, %s6407_s1 }
  0x4c   :  { %p6414_p6 = por %p6413_p5, %p6412_p4 }
  0x4e   :  { %p6415_p7 = pnand %p6414_p6, %p6408_p3 }
  0x50   :  { %6418 = shalt.err (!%p6415_p7)
}
  0x51   :  { %107 = dma.hbm_to_vmem [thread:$0]  %s7232_s9, 32, %s105_s22, [#allocation6]  }
  0x52   :  { %s6419_s2 = scalar_lea.hbm %s7242_s17, 512 }
  0x53   :  { %p6420_p8 = scmp.ne.s32.totalorder %s7242_s17, %s6419_s2  ;;  %p6423_p9 = scmp.lt.u32.totalorder %s6419_s2, %s7242_s17 }
  0x55   :  { %p6425_p10 = pnand %p6423_p9, %p6420_p8 }
  0x57   :  { %6428 = shalt.err (!%p6425_p10)
}
  0x58   :  { %s6429_s7 = scalar_lea.vmem %s7384_s26, 512  ;;  %p6434_p12 = scmp.lt.s32.totalorder %s7384_s26, %s7384_s26 }
  0x59   :  { %p6430_p11 = scmp.ne.s32.totalorder %s7384_s26, %s6429_s7  ;;  %p6435_p13 = scmp.lt.s32.totalorder %s6429_s7, %s6429_s7 }
  0x5b   :  { %p6436_p0 = por %p6435_p13, %p6434_p12 }
  0x5d   :  { %p6437_p1 = pnand %p6436_p0, %p6430_p11 }
  0x5f   :  { %6440 = shalt.err (!%p6437_p1)
}
  0x60   :  { %s7168_s10 = smov 64   ;;  %s7169_s9 = smov 4  }
  0x61   :  { %129 = dma.hbm_to_vmem [thread:$0]  %s7242_s17, 512, %s7384_s26, [#allocation9], %s7168_s10, %s7168_s10, %s7169_s9  }
  0x62   :  { %s7170_s11 = smov [#allocation11]   ;;  %s6441_s16 = scalar_lea.hbm %s7252_s25, 2048 }
  0x63   :  { %s145_s15 = sshll.u32 %s7170_s11, 4  ;;  %p6442_p2 = scmp.ne.s32.totalorder %s7252_s25, %s6441_s16  ;;  %s146_s15 = int_to_ptr.vmem [resolvable:$true] %s145_s15 }
  0x64   :  { %p6445_p3 = scmp.lt.u32.totalorder %s6441_s16, %s7252_s25 }
  0x66   :  { %p6447_p4 = pnand %p6445_p3, %p6442_p2 }
  0x68   :  { %6450 = shalt.err (!%p6447_p4)
}
  0x69   :  { %s6451_s18 = scalar_lea.vmem %s146_s15, 2048  ;;  %p6456_p6 = scmp.lt.s32.totalorder %s146_s15, %s146_s15 }
  0x6a   :  { %p6452_p5 = scmp.ne.s32.totalorder %s146_s15, %s6451_s18  ;;  %p6457_p7 = scmp.lt.s32.totalorder %s6451_s18, %s6451_s18 }
  0x6c   :  { %p6458_p8 = por %p6457_p7, %p6456_p6 }
  0x6e   :  { %p6459_p9 = pnand %p6458_p8, %p6452_p5 }
  0x70   :  { %6462 = shalt.err (!%p6459_p9)
}
  0x71   :  { %s7171_s0 = smov 128   ;;  %s7172_s17 = smov 8  }
  0x72   :  { %151 = dma.hbm_to_vmem [thread:$0]  %s7252_s25, 2048, %s146_s15, [#allocation12], %s7171_s0, %s7171_s0, %s7172_s17  }
  0x73   :  { %s7173_s22 = smov [#allocation14]   ;;  %s7174_s26 = smov [#allocation17]  }
  0x74   :  { %s167_s23 = sshll.u32 %s7173_s22, 4  ;;  %s189_s28 = sshll.u32 %s7174_s26, 4  ;;  %s168_s23 = int_to_ptr.vmem [resolvable:$true] %s167_s23  ;;  %s190_s28 = int_to_ptr.vmem [resolvable:$true] %s189_s28 }
  0x75   :  { %s6463_s1 = scalar_lea.hbm %s7262_s3, 4096 }
  0x76   :  { %p6464_p10 = scmp.ne.s32.totalorder %s7262_s3, %s6463_s1  ;;  %p6467_p11 = scmp.lt.u32.totalorder %s6463_s1, %s7262_s3 }
  0x78   :  { %p6469_p12 = pnand %p6467_p11, %p6464_p10 }
  0x7a   :  { %6472 = shalt.err (!%p6469_p12)
}
  0x7b   :  { %s6473_s2 = scalar_lea.vmem %s168_s23, 4096  ;;  %p6478_p0 = scmp.lt.s32.totalorder %s168_s23, %s168_s23 }
  0x7c   :  { %p6474_p13 = scmp.ne.s32.totalorder %s168_s23, %s6473_s2  ;;  %p6479_p1 = scmp.lt.s32.totalorder %s6473_s2, %s6473_s2 }
  0x7e   :  { %p6480_p2 = por %p6479_p1, %p6478_p0 }
  0x80   :  { %p6481_p3 = pnand %p6480_p2, %p6474_p13 }
  0x82   :  { %6484 = shalt.err (!%p6481_p3)
}
  0x83   :  { %173 = dma.hbm_to_vmem [thread:$0]  %s7262_s3, 4096, %s168_s23, [#allocation15], %s7171_s0, %s7171_s0, %s7172_s17  }
  0x84   :  { %s6485_s25 = scalar_lea.hbm %s7272_s14, 2048 }
  0x85   :  { %p6486_p4 = scmp.ne.s32.totalorder %s7272_s14, %s6485_s25  ;;  %p6489_p5 = scmp.lt.u32.totalorder %s6485_s25, %s7272_s14 }
  0x87   :  { %p6491_p6 = pnand %p6489_p5, %p6486_p4 }
  0x89   :  { %6494 = shalt.err (!%p6491_p6)
}
  0x8a   :  { %s6495_s7 = scalar_lea.vmem %s190_s28, 2048  ;;  %p6500_p8 = scmp.lt.s32.totalorder %s190_s28, %s190_s28 }
  0x8b   :  { %p6496_p7 = scmp.ne.s32.totalorder %s190_s28, %s6495_s7  ;;  %p6501_p9 = scmp.lt.s32.totalorder %s6495_s7, %s6495_s7 }
  0x8d   :  { %p6502_p10 = por %p6501_p9, %p6500_p8 }
  0x8f   :  { %p6503_p11 = pnand %p6502_p10, %p6496_p7 }
  0x91   :  { %6506 = shalt.err (!%p6503_p11)
}
  0x92   :  { %195 = dma.hbm_to_vmem [thread:$0]  %s7272_s14, 2048, %s190_s28, [#allocation18], %s7168_s10, %s7168_s10, %s7169_s9  }
  0x93   :  { %s7175_s3 = smov [#allocation20]   ;;  %s7176_s15 = smov [#allocation23]  }
  0x94   :  { %s211_s11 = sshll.u32 %s7175_s3, 4  ;;  %s234_s16 = sshll.u32 %s7176_s15, 4  ;;  %s212_s11 = int_to_ptr.vmem [resolvable:$true] %s211_s11  ;;  %s235_s16 = int_to_ptr.vmem [resolvable:$true] %s234_s16 }
  0x95   :  { %s6507_s18 = scalar_lea.hbm %s7282_s24, 1024 }
  0x96   :  { %p6508_p12 = scmp.ne.s32.totalorder %s7282_s24, %s6507_s18  ;;  %p6511_p13 = scmp.lt.u32.totalorder %s6507_s18, %s7282_s24 }
  0x98   :  { %p6513_p0 = pnand %p6511_p13, %p6508_p12 }
  0x9a   :  { %6516 = shalt.err (!%p6513_p0)
}
  0x9b   :  { %s6517_s22 = scalar_lea.vmem %s212_s11, 1024  ;;  %p6522_p2 = scmp.lt.s32.totalorder %s212_s11, %s212_s11 }
  0x9c   :  { %p6518_p1 = scmp.ne.s32.totalorder %s212_s11, %s6517_s22  ;;  %p6523_p3 = scmp.lt.s32.totalorder %s6517_s22, %s6517_s22 }
  0x9e   :  { %p6524_p4 = por %p6523_p3, %p6522_p2 }
  0xa0   :  { %p6525_p5 = pnand %p6524_p4, %p6518_p1 }
  0xa2   :  { %6528 = shalt.err (!%p6525_p5)
}
  0xa3   :  { %217 = dma.hbm_to_vmem [thread:$0]  %s7282_s24, 1024, %s212_s11, [#allocation21], %s7168_s10, %s7168_s10, %s7169_s9  }
  0xa4   :  { %s6529_s14 = scalar_lea.hbm %s7292_s6, 32 }
  0xa5   :  { %p6530_p6 = scmp.ne.s32.totalorder %s7292_s6, %s6529_s14  ;;  %p6533_p7 = scmp.lt.u32.totalorder %s6529_s14, %s7292_s6 }
  0xa7   :  { %p6535_p8 = pnand %p6533_p7, %p6530_p6 }
  0xa9   :  { %6538 = shalt.err (!%p6535_p8)
}
  0xaa   :  { %s6539_s23 = scalar_lea.vmem %s235_s16, 32  ;;  %p6544_p10 = scmp.lt.s32.totalorder %s235_s16, %s235_s16 }
  0xab   :  { %p6540_p9 = scmp.ne.s32.totalorder %s235_s16, %s6539_s23  ;;  %p6545_p11 = scmp.lt.s32.totalorder %s6539_s23, %s6539_s23 }
  0xad   :  { %p6546_p12 = por %p6545_p11, %p6544_p10 }
  0xaf   :  { %p6547_p13 = pnand %p6546_p12, %p6540_p9 }
  0xb1   :  { %6550 = shalt.err (!%p6547_p13)
}
  0xb2   :  { %237 = dma.hbm_to_vmem [thread:$0]  %s7292_s6, 32, %s235_s16, [#allocation24]  }
  0xb3   :  { %s7177_s26 = smov [#allocation26]   ;;  %s7178_s28 = smov [#allocation29]  }
  0xb4   :  { %s253_s24 = sshll.u32 %s7177_s26, 4  ;;  %s275_s1 = sshll.u32 %s7178_s28, 4  ;;  %s254_s24 = int_to_ptr.vmem [resolvable:$true] %s253_s24  ;;  %s276_s1 = int_to_ptr.vmem [resolvable:$true] %s275_s1 }
  0xb5   :  { %s6551_s2 = scalar_lea.hbm %s7302_s20, 512 }
  0xb6   :  { %p6552_p0 = scmp.ne.s32.totalorder %s7302_s20, %s6551_s2  ;;  %p6555_p1 = scmp.lt.u32.totalorder %s6551_s2, %s7302_s20 }
  0xb8   :  { %p6557_p2 = pnand %p6555_p1, %p6552_p0 }
  0xba   :  { %6560 = shalt.err (!%p6557_p2)
}
  0xbb   :  { %s6561_s25 = scalar_lea.vmem %s254_s24, 512  ;;  %p6566_p4 = scmp.lt.s32.totalorder %s254_s24, %s254_s24 }
  0xbc   :  { %p6562_p3 = scmp.ne.s32.totalorder %s254_s24, %s6561_s25  ;;  %p6567_p5 = scmp.lt.s32.totalorder %s6561_s25, %s6561_s25 }
  0xbe   :  { %p6568_p6 = por %p6567_p5, %p6566_p4 }
  0xc0   :  { %p6569_p7 = pnand %p6568_p6, %p6562_p3 }
  0xc2   :  { %6572 = shalt.err (!%p6569_p7)
}
  0xc3   :  { %259 = dma.hbm_to_vmem [thread:$0]  %s7302_s20, 512, %s254_s24, [#allocation27], %s7168_s10, %s7168_s10, %s7169_s9  }
  0xc4   :  { %s6573_s6 = scalar_lea.hbm %s7312_s4, 512 }
  0xc5   :  { %p6574_p8 = scmp.ne.s32.totalorder %s7312_s4, %s6573_s6  ;;  %p6577_p9 = scmp.lt.u32.totalorder %s6573_s6, %s7312_s4 }
  0xc7   :  { %p6579_p10 = pnand %p6577_p9, %p6574_p8 }
  0xc9   :  { %6582 = shalt.err (!%p6579_p10)
}
  0xca   :  { %s6583_s7 = scalar_lea.vmem %s276_s1, 512  ;;  %p6588_p12 = scmp.lt.s32.totalorder %s276_s1, %s276_s1 }
  0xcb   :  { %p6584_p11 = scmp.ne.s32.totalorder %s276_s1, %s6583_s7  ;;  %p6589_p13 = scmp.lt.s32.totalorder %s6583_s7, %s6583_s7 }
  0xcd   :  { %p6590_p0 = por %p6589_p13, %p6588_p12 }
  0xcf   :  { %p6591_p1 = pnand %p6590_p0, %p6584_p11 }
  0xd1   :  { %6594 = shalt.err (!%p6591_p1)
}
  0xd2   :  { %281 = dma.hbm_to_vmem [thread:$0]  %s7312_s4, 512, %s276_s1, [#allocation30], %s7168_s10, %s7168_s10, %s7169_s9  }
  0xd3   :  { %s7179_s20 = smov [#allocation32]   ;;  %s7180_s11 = smov [#allocation35]  }
  0xd4   :  { %s297_s3 = sshll.u32 %s7179_s20, 4  ;;  %s319_s15 = sshll.u32 %s7180_s11, 4  ;;  %s298_s3 = int_to_ptr.vmem [resolvable:$true] %s297_s3  ;;  %s320_s15 = int_to_ptr.vmem [resolvable:$true] %s319_s15 }
  0xd5   :  { %s6595_s16 = scalar_lea.hbm %s7322_s30, 512 }
  0xd6   :  { %p6596_p2 = scmp.ne.s32.totalorder %s7322_s30, %s6595_s16  ;;  %p6599_p3 = scmp.lt.u32.totalorder %s6595_s16, %s7322_s30 }
  0xd8   :  { %p6601_p4 = pnand %p6599_p3, %p6596_p2 }
  0xda   :  { %6604 = shalt.err (!%p6601_p4)
}
  0xdb   :  { %s6605_s18 = scalar_lea.vmem %s298_s3, 512  ;;  %p6610_p6 = scmp.lt.s32.totalorder %s298_s3, %s298_s3 }
  0xdc   :  { %p6606_p5 = scmp.ne.s32.totalorder %s298_s3, %s6605_s18  ;;  %p6611_p7 = scmp.lt.s32.totalorder %s6605_s18, %s6605_s18 }
  0xde   :  { %p6612_p8 = por %p6611_p7, %p6610_p6 }
  0xe0   :  { %p6613_p9 = pnand %p6612_p8, %p6606_p5 }
  0xe2   :  { %6616 = shalt.err (!%p6613_p9)
}
  0xe3   :  { %303 = dma.hbm_to_vmem [thread:$0]  %s7322_s30, 512, %s298_s3, [#allocation33], %s7168_s10, %s7168_s10, %s7169_s9  }
  0xe4   :  { %s6617_s4 = scalar_lea.hbm %s7332_s19, 2048 }
  0xe5   :  { %p6618_p10 = scmp.ne.s32.totalorder %s7332_s19, %s6617_s4  ;;  %p6621_p11 = scmp.lt.u32.totalorder %s6617_s4, %s7332_s19 }
  0xe7   :  { %p6623_p12 = pnand %p6621_p11, %p6618_p10 }
  0xe9   :  { %6626 = shalt.err (!%p6623_p12)
}
  0xea   :  { %s6627_s22 = scalar_lea.vmem %s320_s15, 2048  ;;  %p6632_p0 = scmp.lt.s32.totalorder %s320_s15, %s320_s15 }
  0xeb   :  { %p6628_p13 = scmp.ne.s32.totalorder %s320_s15, %s6627_s22  ;;  %p6633_p1 = scmp.lt.s32.totalorder %s6627_s22, %s6627_s22 }
  0xed   :  { %p6634_p2 = por %p6633_p1, %p6632_p0 }
  0xef   :  { %p6635_p3 = pnand %p6634_p2, %p6628_p13 }
  0xf1   :  { %6638 = shalt.err (!%p6635_p3)
}
  0xf2   :  { %325 = dma.hbm_to_vmem [thread:$0]  %s7332_s19, 2048, %s320_s15, [#allocation36], %s7171_s0, %s7171_s0, %s7172_s17  }
  0xf3   :  { %s7181_s30 = smov [#allocation38]   ;;  %s7182_s23 = smov [#allocation41]  }
  0xf4   :  { %s341_s14 = sshll.u32 %s7181_s30, 4  ;;  %s363_s26 = sshll.u32 %s7182_s23, 4  ;;  %s342_s14 = int_to_ptr.vmem [resolvable:$true] %s341_s14  ;;  %s364_s26 = int_to_ptr.vmem [resolvable:$true] %s363_s26 }
  0xf5   :  { %s6639_s24 = scalar_lea.hbm %s7342_s8, 4096 }
  0xf6   :  { %p6640_p4 = scmp.ne.s32.totalorder %s7342_s8, %s6639_s24  ;;  %p6643_p5 = scmp.lt.u32.totalorder %s6639_s24, %s7342_s8 }
  0xf8   :  { %p6645_p6 = pnand %p6643_p5, %p6640_p4 }
  0xfa   :  { %6648 = shalt.err (!%p6645_p6)
}
  0xfb   :  { %s6649_s28 = scalar_lea.vmem %s342_s14, 4096  ;;  %p6654_p8 = scmp.lt.s32.totalorder %s342_s14, %s342_s14 }
  0xfc   :  { %p6650_p7 = scmp.ne.s32.totalorder %s342_s14, %s6649_s28  ;;  %p6655_p9 = scmp.lt.s32.totalorder %s6649_s28, %s6649_s28 }
  0xfe   :  { %p6656_p10 = por %p6655_p9, %p6654_p8 }
 0x100   :  { %p6657_p11 = pnand %p6656_p10, %p6650_p7 }
 0x102   :  { %6660 = shalt.err (!%p6657_p11)
}
 0x103   :  { %347 = dma.hbm_to_vmem [thread:$0]  %s7342_s8, 4096, %s342_s14, [#allocation39], %s7171_s0, %s7171_s0, %s7172_s17  }
 0x104   :  { %s6661_s19 = scalar_lea.hbm %s7352_s29, 2048 }
 0x105   :  { %p6662_p12 = scmp.ne.s32.totalorder %s7352_s29, %s6661_s19  ;;  %p6665_p13 = scmp.lt.u32.totalorder %s6661_s19, %s7352_s29 }
 0x107   :  { %p6667_p0 = pnand %p6665_p13, %p6662_p12 }
 0x109   :  { %6670 = shalt.err (!%p6667_p0)
}
 0x10a   :  { %s6671_s1 = scalar_lea.vmem %s364_s26, 2048  ;;  %p6676_p2 = scmp.lt.s32.totalorder %s364_s26, %s364_s26 }
 0x10b   :  { %p6672_p1 = scmp.ne.s32.totalorder %s364_s26, %s6671_s1  ;;  %p6677_p3 = scmp.lt.s32.totalorder %s6671_s1, %s6671_s1 }
 0x10d   :  { %p6678_p4 = por %p6677_p3, %p6676_p2 }
 0x10f   :  { %p6679_p5 = pnand %p6678_p4, %p6672_p1 }
 0x111   :  { %6682 = shalt.err (!%p6679_p5)
}
 0x112   :  { %369 = dma.hbm_to_vmem [thread:$0]  %s7352_s29, 2048, %s364_s26, [#allocation42], %s7168_s10, %s7168_s10, %s7169_s9  }
 0x113   :  { %s7183_s8 = smov [#allocation44]   ;;  %s6683_s2 = scalar_lea.hbm %s7362_s21, 32768 }
 0x114   :  { %s385_s17 = sshll.u32 %s7183_s8, 4  ;;  %p6684_p6 = scmp.ne.s32.totalorder %s7362_s21, %s6683_s2  ;;  %s386_s17 = int_to_ptr.vmem [resolvable:$true] %s385_s17 }
 0x115   :  { %p6687_p7 = scmp.lt.u32.totalorder %s6683_s2, %s7362_s21 }
 0x117   :  { %p6689_p8 = pnand %p6687_p7, %p6684_p6 }
 0x119   :  { %6692 = shalt.err (!%p6689_p8)
}
 0x11a   :  { %s6693_s25 = scalar_lea.vmem %s386_s17, 32768  ;;  %p6698_p10 = scmp.lt.s32.totalorder %s386_s17, %s386_s17 }
 0x11b   :  { %p6694_p9 = scmp.ne.s32.totalorder %s386_s17, %s6693_s25  ;;  %p6699_p11 = scmp.lt.s32.totalorder %s6693_s25, %s6693_s25 }
 0x11d   :  { %p6700_p12 = por %p6699_p11, %p6698_p10 }
 0x11f   :  { %p6701_p13 = pnand %p6700_p12, %p6694_p9 }
 0x121   :  { %6704 = shalt.err (!%p6701_p13)
}
 0x122   :  { %s7184_s6 = smov 2048   ;;  %s7817_s7 = sld [smem:[#allocation68_spill]] }
 0x123   :  { %391 = dma.hbm_to_vmem [thread:$0]  %s7362_s21, 32768, %s386_s17, [#allocation45], %s7184_s6, %s7184_s6, %s7171_s0  }
 0x124   :  { %s7185_s29 = smov [#allocation2]  }
 0x125   :  { %s91_s20 = sshll.u32 %s7185_s29, 4  ;;  %s92_s20 = int_to_ptr.vmem [resolvable:$true] %s91_s20 }
 0x128   :  { %s6705_s3 = scalar_lea.hbm %s7817_s7, 64 }
 0x129   :  { %p6706_p0 = scmp.ne.s32.totalorder %s7817_s7, %s6705_s3  ;;  %p6709_p1 = scmp.lt.u32.totalorder %s6705_s3, %s7817_s7 }
 0x12b   :  { %p6711_p2 = pnand %p6709_p1, %p6706_p0 }
 0x12d   :  { %6714 = shalt.err (!%p6711_p2)
}
 0x12e   :  { %s6715_s11 = scalar_lea.vmem %s92_s20, 64  ;;  %p6720_p4 = scmp.lt.s32.totalorder %s92_s20, %s92_s20 }
 0x12f   :  { %p6716_p3 = scmp.ne.s32.totalorder %s92_s20, %s6715_s11  ;;  %p6721_p5 = scmp.lt.s32.totalorder %s6715_s11, %s6715_s11 }
 0x131   :  { %p6722_p6 = por %p6721_p5, %p6720_p4 }
 0x133   :  { %p6723_p7 = pnand %p6722_p6, %p6716_p3 }
 0x135   :  { %6726 = shalt.err (!%p6723_p7)
}
 0x136   :  { %s7186_s15 = smov 32   ;;  %s7818_s16 = sld [smem:[#allocation69_spill]] }
 0x137   :  { %s7187_s21 = smov 2   ;;  %s7188_s0 = smov [#allocation7]  }
 0x138   :  { %97 = dma.hbm_to_vmem [thread:$0]  %s7817_s7, 64, %s92_s20, [#allocation3], %s7186_s15, %s7186_s15, %s7187_s21  }
 0x139   :  { %s114_s18 = sshll.u32 %s7188_s0, 4  ;;  %s7189_s4 = smov [#allocation10]   ;;  %s115_s18 = int_to_ptr.vmem [resolvable:$true] %s114_s18 }
 0x13a   :  { %s136_s22 = sshll.u32 %s7189_s4, 4  ;;  %s137_s22 = int_to_ptr.vmem [resolvable:$true] %s136_s22 }
 0x13c   :  { %s6727_s30 = scalar_lea.hbm %s7818_s16, 16 }
 0x13d   :  { %p6728_p8 = scmp.ne.s32.totalorder %s7818_s16, %s6727_s30  ;;  %p6731_p9 = scmp.lt.u32.totalorder %s6727_s30, %s7818_s16 }
 0x13f   :  { %p6733_p10 = pnand %p6731_p9, %p6728_p8 }
 0x141   :  { %6736 = shalt.err (!%p6733_p10)
}
 0x142   :  { %s6737_s14 = scalar_lea.vmem %s115_s18, 16  ;;  %s6741_s23 = scalar_lea.vmem %s115_s18, 32 }
 0x143   :  { %p6738_p11 = scmp.ne.s32.totalorder %s115_s18, %s6737_s14  ;;  %p6742_p12 = scmp.lt.s32.totalorder %s115_s18, %s115_s18 }
 0x144   :  { %p6743_p13 = scmp.lt.s32.totalorder %s6741_s23, %s6737_s14 }
 0x146   :  { %p6744_p0 = por %p6743_p13, %p6742_p12 }
 0x148   :  { %p6745_p1 = pnand %p6744_p0, %p6738_p11 }
 0x14a   :  { %6748 = shalt.err (!%p6745_p1)
}
 0x14b   :  { %s7819_s26 = sld [smem:[#allocation70_spill]] }
 0x14c   :  { %117 = dma.hbm_to_vmem [thread:$0]  %s7818_s16, 16, %s115_s18, [#allocation6]  }
 0x151   :  { %s6749_s24 = scalar_lea.hbm %s7819_s26, 16 }
 0x152   :  { %p6750_p2 = scmp.ne.s32.totalorder %s7819_s26, %s6749_s24  ;;  %p6753_p3 = scmp.lt.u32.totalorder %s6749_s24, %s7819_s26 }
 0x154   :  { %p6755_p4 = pnand %p6753_p3, %p6750_p2 }
 0x156   :  { %6758 = shalt.err (!%p6755_p4)
}
 0x157   :  { %s6759_s28 = scalar_lea.vmem %s137_s22, 16  ;;  %s6763_s19 = scalar_lea.vmem %s137_s22, 32 }
 0x158   :  { %p6760_p5 = scmp.ne.s32.totalorder %s137_s22, %s6759_s28  ;;  %p6764_p6 = scmp.lt.s32.totalorder %s137_s22, %s137_s22 }
 0x159   :  { %p6765_p7 = scmp.lt.s32.totalorder %s6763_s19, %s6759_s28 }
 0x15b   :  { %p6766_p8 = por %p6765_p7, %p6764_p6 }
 0x15d   :  { %p6767_p9 = pnand %p6766_p8, %p6760_p5 }
 0x15f   :  { %6770 = shalt.err (!%p6767_p9)
}
 0x160   :  { %s7820_s1 = sld [smem:[#allocation71_spill]]  ;;  %s7190_s8 = smov [#allocation13]  }
 0x161   :  { %139 = dma.hbm_to_vmem [thread:$0]  %s7819_s26, 16, %s137_s22, [#allocation9]  }
 0x162   :  { %s158_s17 = sshll.u32 %s7190_s8, 4  ;;  %s7191_s2 = smov [#allocation16]   ;;  %s159_s17 = int_to_ptr.vmem [resolvable:$true] %s158_s17 }
 0x163   :  { %s180_s25 = sshll.u32 %s7191_s2, 4  ;;  %s181_s25 = int_to_ptr.vmem [resolvable:$true] %s180_s25 }
 0x166   :  { %s6771_s6 = scalar_lea.hbm %s7820_s1, 32 }
 0x167   :  { %p6772_p10 = scmp.ne.s32.totalorder %s7820_s1, %s6771_s6  ;;  %p6775_p11 = scmp.lt.u32.totalorder %s6771_s6, %s7820_s1 }
 0x169   :  { %p6777_p12 = pnand %p6775_p11, %p6772_p10 }
 0x16b   :  { %6780 = shalt.err (!%p6777_p12)
}
 0x16c   :  { %s6781_s7 = scalar_lea.vmem %s159_s17, 32  ;;  %p6786_p0 = scmp.lt.s32.totalorder %s159_s17, %s159_s17 }
 0x16d   :  { %p6782_p13 = scmp.ne.s32.totalorder %s159_s17, %s6781_s7  ;;  %p6787_p1 = scmp.lt.s32.totalorder %s6781_s7, %s6781_s7 }
 0x16f   :  { %p6788_p2 = por %p6787_p1, %p6786_p0 }
 0x171   :  { %p6789_p3 = pnand %p6788_p2, %p6782_p13 }
 0x173   :  { %6792 = shalt.err (!%p6789_p3)
}
 0x174   :  { %s7821_s29 = sld [smem:[#allocation72_spill]] }
 0x175   :  { %161 = dma.hbm_to_vmem [thread:$0]  %s7820_s1, 32, %s159_s17, [#allocation12]  }
 0x17a   :  { %s6793_s20 = scalar_lea.hbm %s7821_s29, 32 }
 0x17b   :  { %p6794_p4 = scmp.ne.s32.totalorder %s7821_s29, %s6793_s20  ;;  %p6797_p5 = scmp.lt.u32.totalorder %s6793_s20, %s7821_s29 }
 0x17d   :  { %p6799_p6 = pnand %p6797_p5, %p6794_p4 }
 0x17f   :  { %6802 = shalt.err (!%p6799_p6)
}
 0x180   :  { %s6803_s3 = scalar_lea.vmem %s181_s25, 32  ;;  %p6808_p8 = scmp.lt.s32.totalorder %s181_s25, %s181_s25 }
 0x181   :  { %p6804_p7 = scmp.ne.s32.totalorder %s181_s25, %s6803_s3  ;;  %p6809_p9 = scmp.lt.s32.totalorder %s6803_s3, %s6803_s3 }
 0x183   :  { %p6810_p10 = por %p6809_p9, %p6808_p8 }
 0x185   :  { %p6811_p11 = pnand %p6810_p10, %p6804_p7 }
 0x187   :  { %6814 = shalt.err (!%p6811_p11)
}
 0x188   :  { %s7822_s11 = sld [smem:[#allocation73_spill]]  ;;  %s7192_s16 = smov [#allocation19]  }
 0x189   :  { %183 = dma.hbm_to_vmem [thread:$0]  %s7821_s29, 32, %s181_s25, [#allocation15]  }
 0x18a   :  { %s202_s21 = sshll.u32 %s7192_s16, 4  ;;  %s7193_s0 = smov [#allocation22]   ;;  %s203_s21 = int_to_ptr.vmem [resolvable:$true] %s202_s21 }
 0x18b   :  { %s224_s18 = sshll.u32 %s7193_s0, 4  ;;  %s225_s18 = int_to_ptr.vmem [resolvable:$true] %s224_s18 }
 0x18e   :  { %s6815_s4 = scalar_lea.hbm %s7822_s11, 16 }
 0x18f   :  { %p6816_p12 = scmp.ne.s32.totalorder %s7822_s11, %s6815_s4  ;;  %p6819_p13 = scmp.lt.u32.totalorder %s6815_s4, %s7822_s11 }
 0x191   :  { %p6821_p0 = pnand %p6819_p13, %p6816_p12 }
 0x193   :  { %6824 = shalt.err (!%p6821_p0)
}
 0x194   :  { %s6825_s22 = scalar_lea.vmem %s203_s21, 16  ;;  %s6829_s30 = scalar_lea.vmem %s203_s21, 32 }
 0x195   :  { %p6826_p1 = scmp.ne.s32.totalorder %s203_s21, %s6825_s22  ;;  %p6830_p2 = scmp.lt.s32.totalorder %s203_s21, %s203_s21 }
 0x196   :  { %p6831_p3 = scmp.lt.s32.totalorder %s6829_s30, %s6825_s22 }
 0x198   :  { %p6832_p4 = por %p6831_p3, %p6830_p2 }
 0x19a   :  { %p6833_p5 = pnand %p6832_p4, %p6826_p1 }
 0x19c   :  { %6836 = shalt.err (!%p6833_p5)
}
 0x19d   :  { %s7823_s14 = sld [smem:[#allocation74_spill]] }
 0x19e   :  { %205 = dma.hbm_to_vmem [thread:$0]  %s7822_s11, 16, %s203_s21, [#allocation18]  }
 0x1a3   :  { %s6837_s23 = scalar_lea.hbm %s7823_s14, 16 }
 0x1a4   :  { %p6838_p6 = scmp.ne.s32.totalorder %s7823_s14, %s6837_s23  ;;  %p6841_p7 = scmp.lt.u32.totalorder %s6837_s23, %s7823_s14 }
 0x1a6   :  { %p6843_p8 = pnand %p6841_p7, %p6838_p6 }
 0x1a8   :  { %6846 = shalt.err (!%p6843_p8)
}
 0x1a9   :  { %s6847_s26 = scalar_lea.vmem %s225_s18, 16  ;;  %s6851_s24 = scalar_lea.vmem %s225_s18, 32 }
 0x1aa   :  { %p6848_p9 = scmp.ne.s32.totalorder %s225_s18, %s6847_s26  ;;  %p6852_p10 = scmp.lt.s32.totalorder %s225_s18, %s225_s18 }
 0x1ab   :  { %p6853_p11 = scmp.lt.s32.totalorder %s6851_s24, %s6847_s26 }
 0x1ad   :  { %p6854_p12 = por %p6853_p11, %p6852_p10 }
 0x1af   :  { %p6855_p13 = pnand %p6854_p12, %p6848_p9 }
 0x1b1   :  { %6858 = shalt.err (!%p6855_p13)
}
 0x1b2   :  { %s7824_s28 = sld [smem:[#allocation75_spill]]  ;;  %s7194_s19 = smov [#allocation25]  }
 0x1b3   :  { %227 = dma.hbm_to_vmem [thread:$0]  %s7823_s14, 16, %s225_s18, [#allocation21]  }
 0x1b4   :  { %s244_s1 = sshll.u32 %s7194_s19, 4  ;;  %s7195_s8 = smov [#allocation28]   ;;  %s245_s1 = int_to_ptr.vmem [resolvable:$true] %s244_s1 }
 0x1b5   :  { %s266_s17 = sshll.u32 %s7195_s8, 4  ;;  %s267_s17 = int_to_ptr.vmem [resolvable:$true] %s266_s17 }
 0x1b8   :  { %s6859_s2 = scalar_lea.hbm %s7824_s28, 16 }
 0x1b9   :  { %p6860_p0 = scmp.ne.s32.totalorder %s7824_s28, %s6859_s2  ;;  %p6863_p1 = scmp.lt.u32.totalorder %s6859_s2, %s7824_s28 }
 0x1bb   :  { %p6865_p2 = pnand %p6863_p1, %p6860_p0 }
 0x1bd   :  { %6868 = shalt.err (!%p6865_p2)
}
 0x1be   :  { %s6869_s25 = scalar_lea.vmem %s245_s1, 16  ;;  %s6873_s6 = scalar_lea.vmem %s245_s1, 32 }
 0x1bf   :  { %p6870_p3 = scmp.ne.s32.totalorder %s245_s1, %s6869_s25  ;;  %p6874_p4 = scmp.lt.s32.totalorder %s245_s1, %s245_s1 }
 0x1c0   :  { %p6875_p5 = scmp.lt.s32.totalorder %s6873_s6, %s6869_s25 }
 0x1c2   :  { %p6876_p6 = por %p6875_p5, %p6874_p4 }
 0x1c4   :  { %p6877_p7 = pnand %p6876_p6, %p6870_p3 }
 0x1c6   :  { %6880 = shalt.err (!%p6877_p7)
}
 0x1c7   :  { %s7825_s7 = sld [smem:[#allocation76_spill]] }
 0x1c8   :  { %247 = dma.hbm_to_vmem [thread:$0]  %s7824_s28, 16, %s245_s1, [#allocation24]  }
 0x1cd   :  { %s6881_s29 = scalar_lea.hbm %s7825_s7, 16 }
 0x1ce   :  { %p6882_p8 = scmp.ne.s32.totalorder %s7825_s7, %s6881_s29  ;;  %p6885_p9 = scmp.lt.u32.totalorder %s6881_s29, %s7825_s7 }
 0x1d0   :  { %p6887_p10 = pnand %p6885_p9, %p6882_p8 }
 0x1d2   :  { %6890 = shalt.err (!%p6887_p10)
}
 0x1d3   :  { %s6891_s20 = scalar_lea.vmem %s267_s17, 16  ;;  %s6895_s3 = scalar_lea.vmem %s267_s17, 32 }
 0x1d4   :  { %p6892_p11 = scmp.ne.s32.totalorder %s267_s17, %s6891_s20  ;;  %p6896_p12 = scmp.lt.s32.totalorder %s267_s17, %s267_s17 }
 0x1d5   :  { %p6897_p13 = scmp.lt.s32.totalorder %s6895_s3, %s6891_s20 }
 0x1d7   :  { %p6898_p0 = por %p6897_p13, %p6896_p12 }
 0x1d9   :  { %p6899_p1 = pnand %p6898_p0, %p6892_p11 }
 0x1db   :  { %6902 = shalt.err (!%p6899_p1)
}
 0x1dc   :  { %s7826_s11 = sld [smem:[#allocation77_spill]]  ;;  %s7196_s16 = smov [#allocation31]  }
 0x1dd   :  { %269 = dma.hbm_to_vmem [thread:$0]  %s7825_s7, 16, %s267_s17, [#allocation27]  }
 0x1de   :  { %s288_s21 = sshll.u32 %s7196_s16, 4  ;;  %s7197_s0 = smov [#allocation34]   ;;  %s289_s21 = int_to_ptr.vmem [resolvable:$true] %s288_s21 }
 0x1df   :  { %s310_s18 = sshll.u32 %s7197_s0, 4  ;;  %s311_s18 = int_to_ptr.vmem [resolvable:$true] %s310_s18 }
 0x1e2   :  { %s6903_s4 = scalar_lea.hbm %s7826_s11, 16 }
 0x1e3   :  { %p6904_p2 = scmp.ne.s32.totalorder %s7826_s11, %s6903_s4  ;;  %p6907_p3 = scmp.lt.u32.totalorder %s6903_s4, %s7826_s11 }
 0x1e5   :  { %p6909_p4 = pnand %p6907_p3, %p6904_p2 }
 0x1e7   :  { %6912 = shalt.err (!%p6909_p4)
}
 0x1e8   :  { %s6913_s22 = scalar_lea.vmem %s289_s21, 16  ;;  %s6917_s30 = scalar_lea.vmem %s289_s21, 32 }
 0x1e9   :  { %p6914_p5 = scmp.ne.s32.totalorder %s289_s21, %s6913_s22  ;;  %p6918_p6 = scmp.lt.s32.totalorder %s289_s21, %s289_s21 }
 0x1ea   :  { %p6919_p7 = scmp.lt.s32.totalorder %s6917_s30, %s6913_s22 }
 0x1ec   :  { %p6920_p8 = por %p6919_p7, %p6918_p6 }
 0x1ee   :  { %p6921_p9 = pnand %p6920_p8, %p6914_p5 }
 0x1f0   :  { %6924 = shalt.err (!%p6921_p9)
}
 0x1f1   :  { %s7827_s14 = sld [smem:[#allocation78_spill]] }
 0x1f2   :  { %291 = dma.hbm_to_vmem [thread:$0]  %s7826_s11, 16, %s289_s21, [#allocation30]  }
 0x1f7   :  { %s6925_s23 = scalar_lea.hbm %s7827_s14, 16 }
 0x1f8   :  { %p6926_p10 = scmp.ne.s32.totalorder %s7827_s14, %s6925_s23  ;;  %p6929_p11 = scmp.lt.u32.totalorder %s6925_s23, %s7827_s14 }
 0x1fa   :  { %p6931_p12 = pnand %p6929_p11, %p6926_p10 }
 0x1fc   :  { %6934 = shalt.err (!%p6931_p12)
}
 0x1fd   :  { %s6935_s26 = scalar_lea.vmem %s311_s18, 16  ;;  %s6939_s24 = scalar_lea.vmem %s311_s18, 32 }
 0x1fe   :  { %p6936_p13 = scmp.ne.s32.totalorder %s311_s18, %s6935_s26  ;;  %p6940_p0 = scmp.lt.s32.totalorder %s311_s18, %s311_s18 }
 0x1ff   :  { %p6941_p1 = scmp.lt.s32.totalorder %s6939_s24, %s6935_s26 }
 0x201   :  { %p6942_p2 = por %p6941_p1, %p6940_p0 }
 0x203   :  { %p6943_p3 = pnand %p6942_p2, %p6936_p13 }
 0x205   :  { %6946 = shalt.err (!%p6943_p3)
}
 0x206   :  { %s7828_s28 = sld [smem:[#allocation79_spill]]  ;;  %s7198_s19 = smov [#allocation37]  }
 0x207   :  { %313 = dma.hbm_to_vmem [thread:$0]  %s7827_s14, 16, %s311_s18, [#allocation33]  }
 0x208   :  { %s332_s1 = sshll.u32 %s7198_s19, 4  ;;  %s7199_s8 = smov [#allocation40]   ;;  %s333_s1 = int_to_ptr.vmem [resolvable:$true] %s332_s1 }
 0x209   :  { %s354_s17 = sshll.u32 %s7199_s8, 4  ;;  %s355_s17 = int_to_ptr.vmem [resolvable:$true] %s354_s17 }
 0x20c   :  { %s6947_s2 = scalar_lea.hbm %s7828_s28, 32 }
 0x20d   :  { %p6948_p4 = scmp.ne.s32.totalorder %s7828_s28, %s6947_s2  ;;  %p6951_p5 = scmp.lt.u32.totalorder %s6947_s2, %s7828_s28 }
 0x20f   :  { %p6953_p6 = pnand %p6951_p5, %p6948_p4 }
 0x211   :  { %6956 = shalt.err (!%p6953_p6)
}
 0x212   :  { %s6957_s25 = scalar_lea.vmem %s333_s1, 32  ;;  %p6962_p8 = scmp.lt.s32.totalorder %s333_s1, %s333_s1 }
 0x213   :  { %p6958_p7 = scmp.ne.s32.totalorder %s333_s1, %s6957_s25  ;;  %p6963_p9 = scmp.lt.s32.totalorder %s6957_s25, %s6957_s25 }
 0x215   :  { %p6964_p10 = por %p6963_p9, %p6962_p8 }
 0x217   :  { %p6965_p11 = pnand %p6964_p10, %p6958_p7 }
 0x219   :  { %6968 = shalt.err (!%p6965_p11)
}
 0x21a   :  { %s7829_s6 = sld [smem:[#allocation80_spill]] }
 0x21b   :  { %335 = dma.hbm_to_vmem [thread:$0]  %s7828_s28, 32, %s333_s1, [#allocation36]  }
 0x220   :  { %s6969_s7 = scalar_lea.hbm %s7829_s6, 32 }
 0x221   :  { %p6970_p12 = scmp.ne.s32.totalorder %s7829_s6, %s6969_s7  ;;  %p6973_p13 = scmp.lt.u32.totalorder %s6969_s7, %s7829_s6 }
 0x223   :  { %p6975_p0 = pnand %p6973_p13, %p6970_p12 }
 0x225   :  { %6978 = shalt.err (!%p6975_p0)
}
 0x226   :  { %s6979_s29 = scalar_lea.vmem %s355_s17, 32  ;;  %p6984_p2 = scmp.lt.s32.totalorder %s355_s17, %s355_s17 }
 0x227   :  { %p6980_p1 = scmp.ne.s32.totalorder %s355_s17, %s6979_s29  ;;  %p6985_p3 = scmp.lt.s32.totalorder %s6979_s29, %s6979_s29 }
 0x229   :  { %p6986_p4 = por %p6985_p3, %p6984_p2 }
 0x22b   :  { %p6987_p5 = pnand %p6986_p4, %p6980_p1 }
 0x22d   :  { %6990 = shalt.err (!%p6987_p5)
}
 0x22e   :  { %s7830_s20 = sld [smem:[#allocation81_spill]]  ;;  %s7200_s3 = smov [#allocation43]  }
 0x22f   :  { %357 = dma.hbm_to_vmem [thread:$0]  %s7829_s6, 32, %s355_s17, [#allocation39]  }
 0x230   :  { %s376_s11 = sshll.u32 %s7200_s3, 4  ;;  %s7201_s16 = smov [#allocation46]   ;;  %s377_s11 = int_to_ptr.vmem [resolvable:$true] %s376_s11 }
 0x231   :  { %s398_s21 = sshll.u32 %s7201_s16, 4  ;;  %s399_s21 = int_to_ptr.vmem [resolvable:$true] %s398_s21 }
 0x234   :  { %s6991_s0 = scalar_lea.hbm %s7830_s20, 16 }
 0x235   :  { %p6992_p6 = scmp.ne.s32.totalorder %s7830_s20, %s6991_s0  ;;  %p6995_p7 = scmp.lt.u32.totalorder %s6991_s0, %s7830_s20 }
 0x237   :  { %p6997_p8 = pnand %p6995_p7, %p6992_p6 }
 0x239   :  { %7000 = shalt.err (!%p6997_p8)
}
 0x23a   :  { %s7001_s18 = scalar_lea.vmem %s377_s11, 16  ;;  %s7005_s4 = scalar_lea.vmem %s377_s11, 32 }
 0x23b   :  { %p7002_p9 = scmp.ne.s32.totalorder %s377_s11, %s7001_s18  ;;  %p7006_p10 = scmp.lt.s32.totalorder %s377_s11, %s377_s11 }
 0x23c   :  { %p7007_p11 = scmp.lt.s32.totalorder %s7005_s4, %s7001_s18 }
 0x23e   :  { %p7008_p12 = por %p7007_p11, %p7006_p10 }
 0x240   :  { %p7009_p13 = pnand %p7008_p12, %p7002_p9 }
 0x242   :  { %7012 = shalt.err (!%p7009_p13)
}
 0x243   :  { %379 = dma.hbm_to_vmem [thread:$0]  %s7830_s20, 16, %s377_s11, [#allocation42]  }
 0x244   :  { %s7013_s22 = scalar_lea.hbm %s7367_s27, 512 }
 0x245   :  { %p7014_p0 = scmp.ne.s32.totalorder %s7367_s27, %s7013_s22  ;;  %p7017_p1 = scmp.lt.u32.totalorder %s7013_s22, %s7367_s27 }
 0x247   :  { %p7019_p2 = pnand %p7017_p1, %p7014_p0 }
 0x249   :  { %7022 = shalt.err (!%p7019_p2)
}
 0x24a   :  { %s7023_s30 = scalar_lea.vmem %s399_s21, 512  ;;  %p7028_p4 = scmp.lt.s32.totalorder %s399_s21, %s399_s21 }
 0x24b   :  { %p7024_p3 = scmp.ne.s32.totalorder %s399_s21, %s7023_s30  ;;  %p7029_p5 = scmp.lt.s32.totalorder %s7023_s30, %s7023_s30 }
 0x24d   :  { %p7030_p6 = por %p7029_p5, %p7028_p4 }
 0x24f   :  { %p7031_p7 = pnand %p7030_p6, %p7024_p3 }
 0x251   :  { %7034 = shalt.err (!%p7031_p7)
}
 0x252   :  { %401 = dma.hbm_to_vmem [thread:$0]  %s7367_s27, 512, %s399_s21, [#allocation45]  }
 0x253   :  { %7101 = dma.done.wait [#allocation3], 64  }
 0x254   :  { %7102 = vsyncadd [#allocation3], 4294967232 }
 0x255   :  { %7103 = dma.done.wait [#allocation6], 48  }
 0x256   :  { %7104 = vsyncadd [#allocation6], 4294967248 }
 0x257   :  { %7105 = dma.done.wait [#allocation9], 528  }
 0x258   :  { %7106 = vsyncadd [#allocation9], 4294966768 }
 0x259   :  { %7107 = dma.done.wait [#allocation12], 2080  }
 0x25a   :  { %7108 = vsyncadd [#allocation12], 4294965216 }
 0x25b   :  { %7109 = dma.done.wait [#allocation15], 4128  }
 0x25c   :  { %7110 = vsyncadd [#allocation15], 4294963168 }
 0x25d   :  { %7111 = dma.done.wait [#allocation18], 2064  }
 0x25e   :  { %7112 = vsyncadd [#allocation18], 4294965232 }
 0x25f   :  { %7113 = dma.done.wait [#allocation21], 1040  }
 0x260   :  { %7114 = vsyncadd [#allocation21], 4294966256 }
 0x261   :  { %7115 = dma.done.wait [#allocation24], 48  }
 0x262   :  { %7116 = vsyncadd [#allocation24], 4294967248 }
 0x263   :  { %7117 = dma.done.wait [#allocation27], 528  }
 0x264   :  { %7118 = vsyncadd [#allocation27], 4294966768 }
 0x265   :  { %7119 = dma.done.wait [#allocation30], 528  }
 0x266   :  { %7120 = vsyncadd [#allocation30], 4294966768 }
 0x267   :  { %7121 = dma.done.wait [#allocation33], 528  }
 0x268   :  { %7122 = vsyncadd [#allocation33], 4294966768 }
 0x269   :  { %7123 = dma.done.wait [#allocation36], 2080  }
 0x26a   :  { %7124 = vsyncadd [#allocation36], 4294965216 }
 0x26b   :  { %7125 = dma.done.wait [#allocation39], 4128  }
 0x26c   :  { %7126 = vsyncadd [#allocation39], 4294963168 }
 0x26d   :  { %7127 = dma.done.wait [#allocation42], 2064  }
 0x26e   :  { %7128 = vsyncadd [#allocation42], 4294965232 }
 0x26f   :  { %7129 = dma.done.wait [#allocation45], 33280  }
 0x270   :  { %7130 = vsyncadd [#allocation45], 4294934016  ;;  %v496_v0 = vlaneseq  ;;  %v490_v4 = vld [vmem:[#allocation2] sm:$0x3]  ;;  %v491_v5 = vld [vmem:[#allocation2 + $0x2] sm:$0x3] }
 0x271   :  { %v7551_v6 = vunpack.c.l.bf16 %v490_v4  ;;  %v6197_v9 = vld [vmem:[#allocation8] sm:$0xff]   ;;  %v7557_v10 = vunpack.c.l.bf16 %v491_v5  ;;  %v6198_v11 = vld [vmem:[#allocation8 + $0x8] sm:$0xff]   ;;  %v6199_v13 = vld [vmem:[#allocation8 + $0x10] sm:$0xff]   ;;  %vm650_vm0 = vcmask 523264   ;;  %vm965_vm1 = vcmask 1041409   ;;  %s7215_s27 = smov [#allocation48]  }
 0x272   :  { %v7543_v1 = vshrl.u32 %v496_v0, 7  ;;  %6035 = vmatprep.subr.bf16.mxu0 %v6197_v9  ;;  %v6200_v16 = vld [vmem:[#allocation8 + $0x18] sm:$0xff]   ;;  %v6201_v19 = vld [vmem:[#allocation11 + $0x4] ss:$8 sps:$4 sm:$0xff]   ;;  %v6203_v20 = vld [vmem:[#allocation11] ss:$8 sps:$4 sm:$0xff]  }
 0x273   :  { %6036 = vmatpush3.bf16.msra.mxu0 %v6197_v9  ;;  %v6204_v21 = vld [vmem:[#allocation11 + $0x14] ss:$8 sps:$4 sm:$0xff]   ;;  %820 = vmatprep.subr.bf16.mxu1 %v6201_v19  ;;  %v6206_v22 = vld [vmem:[#allocation11 + $0x10] ss:$8 sps:$4 sm:$0xff]   ;;  %v6207_v23 = vld [vmem:[#allocation11 + $0x24] ss:$8 sps:$4 sm:$0xff]  }
 0x274   :  { %v7546_v2 = vsub.s32 1, %v7543_v1  ;;  %v7549_v3 = vsub.s32 0, %v7543_v1  ;;  %6037 = vmatprep.subr.bf16.mxu0 %v6198_v11  ;;  %v7564_v15 = vsub.s32 2, %v7543_v1  ;;  %821 = vmatpush1.bf16.msra.mxu1 %v6203_v20  ;;  %v6209_v24 = vld [vmem:[#allocation11 + $0x20] ss:$8 sps:$4 sm:$0xff]   ;;  %vm7204_vm2 = vmmov 0  }
 0x275   :  { %822 = vmatprep.subr.bf16.mxu1 %v6204_v21  ;;  %v6210_v25 = vld [vmem:[#allocation11 + $0x34] ss:$8 sps:$4 sm:$0xff]   ;;  %v6212_v26 = vld [vmem:[#allocation11 + $0x30] ss:$8 sps:$4 sm:$0xff]   ;;  %v6213_v27 = vld [vmem:[#allocation11 + $0x44] ss:$8 sps:$4 sm:$0xff]  }
 0x276   :  { %v529_v7 = vrot.slane %v7551_v6, %v7546_v2  ;;  %v499_v8 = vrot.slane %v7551_v6, %v7549_v3  ;;  %v510_v12 = vrot.slane %v7557_v10, %v7549_v3  ;;  %v540_v14 = vrot.slane %v7557_v10, %v7546_v2  ;;  %v6215_v28 = vld [vmem:[#allocation11 + $0x40] ss:$8 sps:$4 sm:$0xff]   ;;  %v6216_v29 = vld [vmem:[#allocation11 + $0x54] ss:$8 sps:$4 sm:$0xff]   ;;  %v6218_v30 = vld [vmem:[#allocation11 + $0x50] ss:$8 sps:$4 sm:$0xff]  }
 0x277   :  { %6038 = vmatpush3.bf16.msra.mxu0 %v6198_v11  ;;  %v563_v17 = vrot.slane %v7551_v6, %v7564_v15  ;;  %v574_v18 = vrot.slane %v7557_v10, %v7564_v15  ;;  %v494_v33 = vld [vmem:[#allocation5] sm:$0x3]  ;;  %v5513_v58 = vld [vmem:[#allocation7] ss:$0 sm:$0xff]  ;;  %v6219_v21 = vld [vmem:[#allocation11 + $0x64] ss:$8 sps:$4 sm:$0xff]  }
 0x278   :  { %531 = vbcast.lane.b32.xlu1 %v529_v7, 256  ;;  %501 = vbcast.lane.b32.xlu0 %v499_v8, 256  ;;  %v495_v36 = vunpack.c.l.bf16 %v494_v33  ;;  %v6234_v33 = vld [vmem:[#allocation14 + $0x30] ss:$8 sps:$4 sm:$0xff]   ;;  %vm1532_vm3 = vcmask 122880   ;;  %vm1902_vm4 = vcmask 519168  }
 0x279   :  { %6039 = vmatprep.subr.bf16.mxu0 %v6199_v13  ;;  %823 = vmatpush1.bf16.msra.mxu1 %v6206_v22  ;;  %v6221_v22 = vld [vmem:[#allocation11 + $0x60] ss:$8 sps:$4 sm:$0xff]   ;;  %s5437_s14 = sshll.u32 %s7215_s27, 4  ;;  %s7216_s23 = smov [#allocation47]   ;;  %s5438_s14 = int_to_ptr.vmem [resolvable:$true] %s5437_s14 }
 0x27a   :  { %824 = vmatprep.subr.bf16.mxu1 %v6207_v23  ;;  %v551_v39 = vrot.slane %v495_v36, %v7546_v2  ;;  %v521_v40 = vrot.slane %v495_v36, %v7549_v3  ;;  %v585_v43 = vrot.slane %v495_v36, %v7564_v15  ;;  %v6222_v23 = vld [vmem:[#allocation11 + $0x74] ss:$8 sps:$4 sm:$0xff]   ;;  %s5425_s26 = sshll.u32 %s7216_s23, 4  ;;  %s7035_s24 = scalar_lea.vmem %s5438_s14, 256  ;;  %s5426_s26 = int_to_ptr.vmem [resolvable:$true] %s5425_s26 }
 0x27b   :  { %6040 = vmatpush3.bf16.msra.mxu0 %v6199_v13  ;;  %v6242_v36 = vld [vmem:[#allocation14 + $0x54] ss:$8 sps:$4 sm:$0xff]   ;;  %p7036_p8 = scmp.ne.s32.totalorder %s5438_s14, %s7035_s24  ;;  %p7040_p9 = scmp.lt.s32.totalorder %s5438_s14, %s5438_s14 }
 0x27c   :  { %535 = vbcast.lane.b32.xlu1 %v529_v7, 264  ;;  %505 = vbcast.lane.b32.xlu0 %v499_v8, 264  ;;  %p7041_p10 = scmp.lt.s32.totalorder %s7035_s24, %s7035_s24 }
 0x27d   :  { %6041 = vmatprep.subr.bf16.mxu0 %v6200_v16  ;;  %825 = vmatpush1.bf16.msra.mxu1 %v6209_v24  ;;  %v6224_v24 = vld [vmem:[#allocation11 + $0x70] ss:$8 sps:$4 sm:$0xff]  }
 0x27e   :  { %826 = vmatprep.subr.bf16.mxu1 %v6210_v25  ;;  %v7202_v25 = vmov 0   ;;  %p7042_p11 = por %p7041_p10, %p7040_p9 }
 0x27f   :  { %6042 = vmatpush3.bf16.msra.mxu0 %v6200_v16  ;;  %852 = vmatprep.mubr.bf16.mxu1 %v7202_v25 }
 0x280   :  { %516 = vbcast.lane.b32.xlu1 %v510_v12, 264  ;;  %512 = vbcast.lane.b32.xlu0 %v510_v12, 256  ;;  %p7043_p12 = pnand %p7042_p11, %p7036_p8 }
 0x281   :  { %827 = vmatpush1.bf16.msra.mxu1 %v6212_v26  ;;  %v6225_v26 = vld [vmem:[#allocation14] ss:$8 sps:$4 sm:$0xff]  }
 0x282   :  { %828 = vmatprep.subr.bf16.mxu1 %v6213_v27  ;;  %v6227_v27 = vld [vmem:[#allocation14 + $0x4] ss:$8 sps:$4 sm:$0xff]  }
 0x283   :  { %1132 = vmatprep.subr.bf16.mxu0 %v6227_v27  ;;  %v6284_v27 = vld [vmem:[#allocation17 + $0x28] sm:$0xff]  }
 0x284   :  { %546 = vbcast.lane.b32.xlu1 %v540_v14, 264  ;;  %542 = vbcast.lane.b32.xlu0 %v540_v14, 256 }
 0x285   :  { %829 = vmatpush1.bf16.msra.mxu1 %v6215_v28  ;;  %v6230_v28 = vld [vmem:[#allocation14 + $0x14] ss:$8 sps:$4 sm:$0xff]  }
 0x286   :  { %830 = vmatprep.subr.bf16.mxu1 %v6216_v29  ;;  %v6228_v29 = vld [vmem:[#allocation14 + $0x10] ss:$8 sps:$4 sm:$0xff]  }
 0x288   :  { %569 = vbcast.lane.b32.xlu1 %v563_v17, 264  ;;  %565 = vbcast.lane.b32.xlu0 %v563_v17, 256 }
 0x289   :  { %831 = vmatpush1.bf16.msra.mxu1 %v6218_v30  ;;  %v6233_v30 = vld [vmem:[#allocation14 + $0x24] ss:$8 sps:$4 sm:$0xff]  }
 0x28a   :  { %832 = vmatprep.subr.bf16.mxu1 %v6219_v21  ;;  %v6279_v21 = vld [vmem:[#allocation17 + $0x58] sm:$0xff]  }
 0x28c   :  { %580 = vbcast.lane.b32.xlu1 %v574_v18, 264  ;;  %576 = vbcast.lane.b32.xlu0 %v574_v18, 256 }
 0x28d   :  { %833 = vmatpush1.bf16.msra.mxu1 %v6221_v22  ;;  %v6280_v22 = vld [vmem:[#allocation17 + $0x18] sm:$0xff]  }
 0x28e   :  { %834 = vmatprep.subr.bf16.mxu1 %v6222_v23  ;;  %v6281_v23 = vld [vmem:[#allocation17 + $0x60] sm:$0xff]  }
 0x291   :  { %835 = vmatpush1.bf16.msra.mxu1 %v6224_v24  ;;  %v6282_v24 = vld [vmem:[#allocation17 + $0x20] sm:$0xff]  }
 0x2ea   :  { %v532_v31 = vpop.permute.xlu1 %531  ;;  %v502_v32 = vpop.permute.xlu0 %501 }
 0x2eb   :  { %v552_v44 = vmul.f32 %v551_v39, %v532_v31  ;;  %v522_v45 = vmul.f32 %v521_v40, %v502_v32  ;;  %v6231_v31 = vld [vmem:[#allocation14 + $0x20] ss:$8 sps:$4 sm:$0xff]   ;;  %v6236_v32 = vld [vmem:[#allocation14 + $0x34] ss:$8 sps:$4 sm:$0xff]  }
 0x2ed   :  { %v556_v52 = vadd.f32 %v552_v44, %v522_v45 }
 0x2ee   :  { %v536_v34 = vpop.permute.xlu1 %535  ;;  %v506_v35 = vpop.permute.xlu0 %505 }
 0x2ef   :  { %v553_v46 = vmul.f32 %v551_v39, %v536_v34  ;;  %v523_v47 = vmul.f32 %v521_v40, %v506_v35  ;;  %v6239_v34 = vld [vmem:[#allocation14 + $0x44] ss:$8 sps:$4 sm:$0xff]   ;;  %v6237_v35 = vld [vmem:[#allocation14 + $0x40] ss:$8 sps:$4 sm:$0xff]  }
 0x2f1   :  { %v557_v53 = vadd.f32 %v553_v46, %v523_v47 }
 0x2f2   :  { %v517_v37 = vpop.permute.xlu1 %516  ;;  %v513_v38 = vpop.permute.xlu0 %512 }
 0x2f3   :  { %v525_v56 = vmul.f32 %v521_v40, %v517_v37  ;;  %v524_v57 = vmul.f32 %v521_v40, %v513_v38  ;;  %v6240_v37 = vld [vmem:[#allocation14 + $0x50] ss:$8 sps:$4 sm:$0xff]   ;;  %v6245_v38 = vld [vmem:[#allocation14 + $0x64] ss:$8 sps:$4 sm:$0xff]   ;;  %v5514_v40 = vld [vmem:[#allocation10] ss:$0 sm:$0xff] }
 0x2f6   :  { %v547_v41 = vpop.permute.xlu1 %546  ;;  %v543_v42 = vpop.permute.xlu0 %542 }
 0x2f7   :  { %v555_v48 = vmul.f32 %v551_v39, %v547_v41  ;;  %v554_v49 = vmul.f32 %v551_v39, %v543_v42  ;;  %v6243_v39 = vld [vmem:[#allocation14 + $0x60] ss:$8 sps:$4 sm:$0xff]  }
 0x2f9   :  { %v559_v61 = vadd.f32 %v555_v48, %v525_v56  ;;  %v558_v62 = vadd.f32 %v554_v49, %v524_v57  ;;  %v6246_v56 = vld [vmem:[#allocation14 + $0x70] ss:$8 sps:$4 sm:$0xff]   ;;  %v6251_v57 = vld [vmem:[#allocation14 + $0x84] ss:$8 sps:$4 sm:$0xff]  }
 0x2fa   :  { %v570_v50 = vpop.permute.xlu1 %569  ;;  %v566_v51 = vpop.permute.xlu0 %565 }
 0x2fb   :  { %v587_v54 = vmul.f32 %v585_v43, %v570_v50  ;;  %v586_v55 = vmul.f32 %v585_v43, %v566_v51 }
 0x2fd   :  { %v591_v59 = vadd.f32 %v587_v54, %v557_v53  ;;  %v590_v60 = vadd.f32 %v586_v55, %v556_v52  ;;  %v6248_v55 = vld [vmem:[#allocation14 + $0x74] ss:$8 sps:$4 sm:$0xff]  }
 0x2fe   :  { %v581_v63 = vpop.permute.xlu1 %580  ;;  %v577_v0 = vpop.permute.xlu0 %576 }
 0x2ff   :  { %v589_v4 = vmul.f32 %v585_v43, %v581_v63  ;;  %v588_v5 = vmul.f32 %v585_v43, %v577_v0  ;;  %v601_v7 = vadd.f32 %v5513_v58, %v590_v60  ;;  %v602_v8 = vadd.f32 %v5513_v58, %v591_v59  ;;  %v6254_v59 = vld [vmem:[#allocation14 + $0x94] ss:$8 sps:$4 sm:$0xff]   ;;  %v6252_v60 = vld [vmem:[#allocation14 + $0x90] ss:$8 sps:$4 sm:$0xff]  }
 0x300   :  { %v6260_v63 = vld [vmem:[#allocation14 + $0xb4] ss:$8 sps:$4 sm:$0xff]   ;;  %v6258_v0 = vld [vmem:[#allocation14 + $0xb0] ss:$8 sps:$4 sm:$0xff]  }
 0x301   :  { %v593_v9 = vadd.f32 %v589_v4, %v559_v61  ;;  %v592_v11 = vadd.f32 %v588_v5, %v558_v62  ;;  %v605_v12 = vmax.f32 %v601_v7, 0.0  ;;  %v606_v13 = vmax.f32 %v602_v8, 0.0  ;;  %v6257_v61 = vld [vmem:[#allocation14 + $0xa4] ss:$8 sps:$4 sm:$0xff]   ;;  %v6255_v62 = vld [vmem:[#allocation14 + $0xa0] ss:$8 sps:$4 sm:$0xff]  }
 0x302   :  { %v6263_v4 = vld [vmem:[#allocation14 + $0xc4] ss:$8 sps:$4 sm:$0xff]   ;;  %v6261_v5 = vld [vmem:[#allocation14 + $0xc0] ss:$8 sps:$4 sm:$0xff]   ;;  %v6266_v7 = vld [vmem:[#allocation14 + $0xd4] ss:$8 sps:$4 sm:$0xff]  }
 0x303   :  { %v604_v14 = vadd.f32 %v5513_v58, %v593_v9  ;;  %v603_v16 = vadd.f32 %v5513_v58, %v592_v11  ;;  %v609_v17 = vpack.c.bf16 %v606_v13, %v605_v12  ;;  %v6249_v58 = vld [vmem:[#allocation14 + $0x80] ss:$8 sps:$4 sm:$0xff]   ;;  %v6264_v8 = vld [vmem:[#allocation14 + $0xd0] ss:$8 sps:$4 sm:$0xff]   ;;  %v6269_v9 = vld [vmem:[#allocation14 + $0xe4] ss:$8 sps:$4 sm:$0xff]  }
 0x304   :  { %v6267_v11 = vld [vmem:[#allocation14 + $0xe0] ss:$8 sps:$4 sm:$0xff]   ;;  %v6270_v12 = vld [vmem:[#allocation14 + $0xf0] ss:$8 sps:$4 sm:$0xff]   ;;  %v6272_v13 = vld [vmem:[#allocation14 + $0xf4] ss:$8 sps:$4 sm:$0xff]  }
 0x305   :  { %v608_v18 = vmax.f32 %v604_v14, 0.0  ;;  %v607_v19 = vmax.f32 %v603_v16, 0.0  ;;  %6043 = vmatprep.mubr.msk.bf16.mxu0 %vm650_vm0, %v609_v17  ;;  %v6273_v14 = vld [vmem:[#allocation17 + $0x40] sm:$0xff]   ;;  %v6275_v17 = vld [vmem:[#allocation17 + $0x48] sm:$0xff]  }
 0x306   :  { %v6274_v16 = vld [vmem:[#allocation17] sm:$0xff]   ;;  %5964 = vmatprep.subr.bf16.mxu1 %v6273_v14 }
 0x307   :  { %v610_v20 = vpack.c.bf16 %v608_v18, %v607_v19  ;;  %v6276_v18 = vld [vmem:[#allocation17 + $0x8] sm:$0xff]   ;;  %v6277_v19 = vld [vmem:[#allocation17 + $0x50] sm:$0xff]  }
 0x309   :  { %6044 = vmatmul.mubr.msk.bf16.vlgmr.msra.gmra.mrb[0].mxu0 %vm650_vm0, %v610_v20  ;;  %v6278_v20 = vld [vmem:[#allocation17 + $0x10] sm:$0xff]  }
 0x30a   :  { %1133 = vmatpush1.bf16.msra.mxu0 %v6225_v26  ;;  %v6283_v26 = vld [vmem:[#allocation17 + $0x68] sm:$0xff]  }
 0x30b   :  { %1134 = vmatprep.subr.bf16.mxu0 %v6230_v28  ;;  %v728_v28 = vld [vmem:[#allocation13] sm:$0x3] }
 0x30e   :  { %1135 = vmatpush1.bf16.msra.mxu0 %v6228_v29  ;;  %v733_v29 = vrot.slane %v728_v28, %v7549_v3 }
 0x30f   :  { %1136 = vmatprep.subr.bf16.mxu0 %v6233_v30  ;;  %v737_v30 = vrot.slane %v728_v28, %v7546_v2 }
 0x312   :  { %1137 = vmatpush1.bf16.msra.mxu0 %v6231_v31 }
 0x313   :  { %1138 = vmatprep.subr.bf16.mxu0 %v6236_v32 }
 0x316   :  { %1139 = vmatpush1.bf16.msra.mxu0 %v6234_v33 }
 0x317   :  { %1140 = vmatprep.subr.bf16.mxu0 %v6239_v34 }
 0x31a   :  { %1141 = vmatpush1.bf16.msra.mxu0 %v6237_v35 }
 0x31b   :  { %1142 = vmatprep.subr.bf16.mxu0 %v6242_v36 }
 0x31e   :  { %1143 = vmatpush1.bf16.msra.mxu0 %v6240_v37 }
 0x31f   :  { %1144 = vmatprep.subr.bf16.mxu0 %v6245_v38 }
 0x322   :  { %1145 = vmatpush1.bf16.msra.mxu0 %v6243_v39 }
 0x323   :  { %1146 = vmatprep.subr.bf16.mxu0 %v6248_v55 }
 0x326   :  { %1147 = vmatpush1.bf16.msra.mxu0 %v6246_v56 }
 0x327   :  { %1148 = vmatprep.subr.bf16.mxu0 %v6251_v57 }
 0x32a   :  { %1149 = vmatpush1.bf16.msra.mxu0 %v6249_v58 }
 0x32b   :  { %1150 = vmatprep.subr.bf16.mxu0 %v6254_v59 }
 0x32e   :  { %1151 = vmatpush1.bf16.msra.mxu0 %v6252_v60 }
 0x32f   :  { %1152 = vmatprep.subr.bf16.mxu0 %v6257_v61 }
 0x332   :  { %1153 = vmatpush1.bf16.msra.mxu0 %v6255_v62 }
 0x333   :  { %1154 = vmatprep.subr.bf16.mxu0 %v6260_v63 }
 0x336   :  { %1155 = vmatpush1.bf16.msra.mxu0 %v6258_v0 }
 0x337   :  { %1156 = vmatprep.subr.bf16.mxu0 %v6263_v4 }
 0x33a   :  { %1157 = vmatpush1.bf16.msra.mxu0 %v6261_v5 }
 0x33b   :  { %1158 = vmatprep.subr.bf16.mxu0 %v6266_v7 }
 0x33e   :  { %1159 = vmatpush1.bf16.msra.mxu0 %v6264_v8 }
 0x33f   :  { %1160 = vmatprep.subr.bf16.mxu0 %v6269_v9 }
 0x342   :  { %1161 = vmatpush1.bf16.msra.mxu0 %v6267_v11 }
 0x343   :  { %1162 = vmatprep.subr.bf16.mxu0 %v6272_v13 }
 0x346   :  { %1163 = vmatpush1.bf16.msra.mxu0 %v6270_v12 }
 0x3dc   :  { %v6045_v41 = vpop.f32.mrb[0].mxu0 }
 0x3dd   :  { %v700_v42 = vadd.f32 %v6045_v41, %v5514_v40  ;;  %v691_v43 = vpop.f32.mrb[1].mxu0 }
 0x3de   :  { %v692_v44 = vadd.f32 %v5514_v40, %v691_v43  ;;  %v6046_v45 = vpop.f32.mrb[2].mxu0 }
 0x3df   :  { %v703_v46 = vadd.f32 %v6046_v45, %v5514_v40  ;;  %v694_v47 = vpop.f32.mrb[3].mxu0  ;;  %v708_v49 = vmax.f32 %v700_v42, 0.0 }
 0x3e0   :  { %v695_v48 = vadd.f32 %v5514_v40, %v694_v47  ;;  %v706_v51 = vmax.f32 %v692_v44, 0.0 }
 0x3e1   :  { %v709_v50 = vmax.f32 %v703_v46, 0.0 }
 0x3e2   :  { %v707_v52 = vmax.f32 %v695_v48, 0.0 }
 0x3e3   :  { %v711_v53 = vpack.c.bf16 %v709_v50, %v708_v49 }
 0x3e4   :  { %v710_v54 = vpack.c.bf16 %v707_v52, %v706_v51 }
 0x3e6   :  { %853 = vmatmul.mubr.bf16.vlgmr.msra.gmra.mrb[0].mxu1 %v710_v54 }
 0x3e7   :  { %862 = vmatprep.mubr.bf16.mxu1 %v7202_v25  ;;  %5965 = vmatpush3.bf16.msra.mxu1 %v6274_v16 }
 0x3e8   :  { %5966 = vmatprep.subr.bf16.mxu1 %v6275_v17 }
 0x3eb   :  { %5967 = vmatpush3.bf16.msra.mxu1 %v6276_v18 }
 0x3ec   :  { %5968 = vmatprep.subr.bf16.mxu1 %v6277_v19 }
 0x3ee   :  { %863 = vmatmul.mubr.bf16.gmra.mrb[4].mxu1 %v711_v53 }
 0x3ef   :  { %5969 = vmatpush3.bf16.msra.mxu1 %v6278_v20 }
 0x3f0   :  { %5970 = vmatprep.subr.bf16.mxu1 %v6279_v21 }
 0x3f3   :  { %5971 = vmatpush3.bf16.msra.mxu1 %v6280_v22 }
 0x3f4   :  { %5972 = vmatprep.subr.bf16.mxu1 %v6281_v23 }
 0x3f7   :  { %5973 = vmatpush3.bf16.msra.mxu1 %v6282_v24 }
 0x3f8   :  { %5974 = vmatprep.subr.bf16.mxu1 %v6283_v26 }
 0x3fb   :  { %5975 = vmatpush3.bf16.msra.mxu1 %v6284_v27 }
 0x4b9   :  { %v854_v31 = vpop.f32.mrb[0].mxu1 }
 0x4ba   :  { %v855_v32 = vadd.f32 %v854_v31, %v733_v29  ;;  %v856_v33 = vpop.f32.mrb[1].mxu1 }
 0x4bb   :  { %v857_v34 = vadd.f32 %v856_v33, %v737_v30  ;;  %v858_v35 = vpop.f32.mrb[2].mxu1 }
 0x4bc   :  { %v859_v36 = vadd.f32 %v858_v35, %v733_v29  ;;  %v860_v37 = vpop.f32.mrb[3].mxu1  ;;  %v873_v39 = vmax.f32 %v855_v32, 0.0 }
 0x4bd   :  { %v861_v38 = vadd.f32 %v860_v37, %v737_v30  ;;  %v874_v41 = vmax.f32 %v857_v34, 0.0 }
 0x4be   :  { %v875_v40 = vmax.f32 %v859_v36, 0.0 }
 0x4bf   :  { %v876_v42 = vmax.f32 %v861_v38, 0.0  ;;  %v6285_v38 = vld [vmem:[#allocation17 + $0x70] sm:$0xff]  }
 0x4c0   :  { %v881_v43 = vmax.f32 %v873_v39, %v875_v40  ;;  %v6286_v39 = vld [vmem:[#allocation17 + $0x30] sm:$0xff]   ;;  %5976 = vmatprep.subr.bf16.mxu1 %v6285_v38  ;;  %v6287_v40 = vld [vmem:[#allocation17 + $0x78] sm:$0xff]  }
 0x4c1   :  { %v888_v44 = vmax.f32 %v874_v41, %v876_v42  ;;  %v864_v45 = vpop.f32.mrb[4].mxu1  ;;  %5977 = vmatpush3.bf16.msra.mxu1 %v6286_v39  ;;  %v6288_v41 = vld [vmem:[#allocation17 + $0x38] sm:$0xff]   ;;  %v7203_v42 = vmov 0.0  }
 0x4c2   :  { %v882_v46 = vrot.slane %v881_v43, 4  ;;  %v865_v47 = vadd.f32 %v864_v45, %v733_v29  ;;  %v866_v48 = vpop.f32.mrb[5].mxu1  ;;  %5978 = vmatprep.subr.bf16.mxu1 %v6287_v40 }
 0x4c3   :  { %v889_v49 = vrot.slane %v888_v44, 4  ;;  %v867_v50 = vadd.f32 %v866_v48, %v737_v30  ;;  %v868_v51 = vpop.f32.mrb[6].mxu1 }
 0x4c4   :  { %v883_v52 = vmax.f32 %v881_v43, %v882_v46  ;;  %v869_v53 = vadd.f32 %v868_v51, %v733_v29  ;;  %v870_v54 = vpop.f32.mrb[7].mxu1  ;;  %v877_v58 = vmax.f32 %v865_v47, 0.0  ;;  %v945_v43 = vld [vmem:[#allocation16] sm:$0x3] }
 0x4c5   :  { %v890_v55 = vmax.f32 %v888_v44, %v889_v49  ;;  %v871_v56 = vadd.f32 %v870_v54, %v737_v30  ;;  %v878_v61 = vmax.f32 %v867_v50, 0.0  ;;  %5979 = vmatpush3.bf16.msra.mxu1 %v6288_v41  ;;  %v950_v44 = vrot.slane %v945_v43, %v7549_v3 }
 0x4c6   :  { %v884_v57 = vrot.slane %v883_v52, 2  ;;  %v879_v59 = vmax.f32 %v869_v53, 0.0  ;;  %6047 = vmatprep.subr.bf16.mxu1 %v7203_v42  ;;  %v954_v45 = vrot.slane %v945_v43, %v7546_v2 }
 0x4c7   :  { %v891_v60 = vrot.slane %v890_v55, 2  ;;  %v880_v62 = vmax.f32 %v871_v56, 0.0 }
 0x4c8   :  { %v885_v63 = vmax.f32 %v883_v52, %v884_v57  ;;  %v895_v0 = vmax.f32 %v877_v58, %v879_v59  ;;  %v6290_v57 = vld [vmem:[#allocation20 + $0x8] sm:$0xff]   ;;  %v6291_v58 = vld [vmem:[#allocation20 + $0x10] sm:$0xff]   ;;  %v6292_v59 = vld [vmem:[#allocation20 + $0x18] sm:$0xff]  }
 0x4c9   :  { %v892_v4 = vmax.f32 %v890_v55, %v891_v60  ;;  %v902_v5 = vmax.f32 %v878_v61, %v880_v62  ;;  %v6289_v55 = vld [vmem:[#allocation20] sm:$0xff]   ;;  %v6294_v61 = vld [vmem:[#allocation20 + $0x28] sm:$0xff]   ;;  %v6295_v62 = vld [vmem:[#allocation20 + $0x30] sm:$0xff]  }
 0x4ca   :  { %v896_v7 = vrot.slane %v895_v0, 4  ;;  %v886_v9 = vrot.slane %v885_v63, 1  ;;  %v6293_v60 = vld [vmem:[#allocation20 + $0x20] sm:$0xff]  }
 0x4cb   :  { %v903_v8 = vrot.slane %v902_v5, 4  ;;  %v893_v12 = vrot.slane %v892_v4, 1 }
 0x4cc   :  { %v897_v11 = vmax.f32 %v895_v0, %v896_v7  ;;  %v887_v17 = vmax.f32 %v885_v63, %v886_v9  ;;  %v6296_v63 = vld [vmem:[#allocation20 + $0x38] sm:$0xff]  }
 0x4cd   :  { %v904_v13 = vmax.f32 %v902_v5, %v903_v8  ;;  %v894_v19 = vmax.f32 %v892_v4, %v893_v12  ;;  %v5569_v4 = vld [vmem:[#allocation19] ss:$0 sm:$0xff] }
 0x4ce   :  { %v898_v14 = vrot.slane %v897_v11, 2  ;;  %v909_v23 = vpack.c.bf16 %v887_v17, %v887_v17  ;;  %v5586_v17 = vld [vmem:[#allocation22] ss:$0 sm:$0xff] }
 0x4cf   :  { %v905_v16 = vrot.slane %v904_v13, 2  ;;  %v910_v27 = vpack.c.bf16 %v894_v19, %v894_v19 }
 0x4d0   :  { %v899_v18 = vmax.f32 %v897_v11, %v898_v14  ;;  %v961_v30 = vunpack.c.l.b16 %v909_v23  ;;  %v7205_v14 = vmov 4   ;;  %v7207_v23 = vmov 6  }
 0x4d1   :  { %v906_v20 = vmax.f32 %v904_v13, %v905_v16  ;;  %v962_v32 = vunpack.c.l.b16 %v910_v27  ;;  %6188 = vset.pattern.permute.xlu1 %v7205_v14  ;;  %v7206_v16 = vmov 3   ;;  %v7210_v27 = vmov 1  }
 0x4d2   :  { %v900_v21 = vrot.slane %v899_v18, 1  ;;  %6187 = vset.pattern.permute.xlu0 %v7206_v16 }
 0x4d3   :  { %v907_v22 = vrot.slane %v906_v20, 1 }
 0x4d4   :  { %v901_v24 = vmax.f32 %v899_v18, %v900_v21 }
 0x4d5   :  { %v908_v26 = vmax.f32 %v906_v20, %v907_v22 }
 0x4d6   :  { %v911_v28 = vpack.c.bf16 %v901_v24, %v901_v24  ;;  %v7208_v24 = vmov 7  }
 0x4d7   :  { %v912_v29 = vpack.c.bf16 %v908_v26, %v908_v26  ;;  %v7209_v26 = vmov 5  }
 0x4d8   :  { %v963_v31 = vunpack.c.l.b16 %v911_v28  ;;  %v7211_v28 = vmov 8  }
 0x4d9   :  { %v964_v33 = vunpack.c.l.b16 %v912_v29  ;;  %v7212_v29 = vmov 2  }
 0x4da   :  { %v966_v34 = vsel %vm965_vm1, %v963_v31, %v961_v30  ;;  %v7213_v30 = vmov 839922192  }
 0x4db   :  { %v967_v35 = vsel %vm965_vm1, %v964_v33, %v962_v32  ;;  %v968_v37 = vpack.c.b16 %v966_v34, %v966_v34  ;;  %v1470_v31 = vunpack.c.l.s4 %v7213_v30 }
 0x4dc   :  { %v969_v36 = vpack.c.b16 %v967_v35, %v967_v35 }
 0x4dd   :  { %v1471_v32 = vunpack.c.0.s8 %v1470_v31 }
 0x4de   :  { %1164 = vmatprep.mubr.bf16.mxu0 %v969_v36 }
 0x4df   :  { %1165 = vmatmul.mubr.bf16.vlgmr.msra.gmra.mrb[4].mxu0 %v968_v37  ;;  %v7585_v33 = vsub.s32 %v1471_v32, %v7543_v1 }
 0x5b2   :  { %v1166_v46 = vpop.f32.mrb[4].mxu0 }
 0x5b3   :  { %v1167_v47 = vadd.f32 %v1166_v46, %v950_v44  ;;  %v1168_v48 = vpop.f32.mrb[5].mxu0 }
 0x5b4   :  { %v1169_v49 = vadd.f32 %v1168_v48, %v954_v45  ;;  %v1170_v50 = vpop.f32.mrb[6].mxu0 }
 0x5b5   :  { %v1173_v51 = vmax.f32 %v1167_v47, 0.0  ;;  %v1171_v52 = vpop.f32.mrb[7].mxu0 }
 0x5b6   :  { %v1174_v53 = vmax.f32 %v1169_v49, 0.0 }
 0x5b7   :  { %v1175_v56 = vpack.c.bf16 %v1173_v51, %v1173_v51 }
 0x5b8   :  { %v1176_v54 = vpack.c.bf16 %v1174_v53, %v1174_v53 }
 0x5ba   :  { %1344 = vmatprep.mubr.bf16.mxu1 %v1176_v54 }
 0x5bb   :  { %1345 = vmatmul.mubr.bf16.vlgmr.msra.gmra.mrb[8].mxu1 %v1175_v56 }
 0x5bc   :  { %6048 = vmatpush3.bf16.msra.mxu1 %v6289_v55  ;;  %6063 = vmatprep.mubr.msk.bf16.mxu1 %vm7204_vm2, %v7203_v42 }
 0x5bd   :  { %6049 = vmatprep.subr.bf16.mxu1 %v7203_v42 }
 0x5c0   :  { %6050 = vmatpush3.bf16.msra.mxu1 %v6290_v57 }
 0x5c1   :  { %6051 = vmatprep.subr.bf16.mxu1 %v7203_v42 }
 0x5c4   :  { %6052 = vmatpush3.bf16.msra.mxu1 %v6291_v58 }
 0x5c5   :  { %6053 = vmatprep.subr.bf16.mxu1 %v7203_v42 }
 0x5c8   :  { %6054 = vmatpush3.bf16.msra.mxu1 %v6292_v59 }
 0x5c9   :  { %6055 = vmatprep.subr.bf16.mxu1 %v7203_v42 }
 0x5cc   :  { %6056 = vmatpush3.bf16.msra.mxu1 %v6293_v60 }
 0x5cd   :  { %6057 = vmatprep.subr.bf16.mxu1 %v7203_v42 }
 0x5d0   :  { %6058 = vmatpush3.bf16.msra.mxu1 %v6294_v61 }
 0x5d1   :  { %6059 = vmatprep.subr.bf16.mxu1 %v7203_v42 }
 0x5d4   :  { %6060 = vmatpush3.bf16.msra.mxu1 %v6295_v62 }
 0x5d5   :  { %6061 = vmatprep.subr.bf16.mxu1 %v7203_v42 }
 0x5d8   :  { %6062 = vmatpush3.bf16.msra.mxu1 %v6296_v63 }
 0x68e   :  { %v5980_v0 = vpop.f32.mrb[8].mxu1 }
 0x68f   :  { %v5981_v5 = vpop.f32.mrb[9].mxu1 }
 0x690   :  { %v5982_v7 = vadd.f32 %v5981_v5, %v5980_v0  ;;  %v5983_v8 = vpop.f32.mrb[10].mxu1 }
 0x691   :  { %v5984_v9 = vpop.f32.mrb[11].mxu1 }
 0x692   :  { %v1347_v11 = vadd.f32 %v5982_v7, %v5569_v4 }
 0x694   :  { %v1352_v12 = vmax.f32 %v1347_v11, 0.0 }
 0x696   :  { %v1353_v13 = vpack.c.bf16 %v1352_v12, %v1352_v12 }
 0x698   :  { %6064 = vmatmul.mubr.bf16.vlgmr.msra.gmra.mrb[12].mxu1 %v1353_v13 }
 0x76b   :  { %v1459_v18 = vpop.f32.mrb[12].mxu1 }
 0x76c   :  { %v1460_v19 = vadd.f32 %v5586_v17, %v1459_v18  ;;  %v6065_v20 = vpop.f32.mrb[13].mxu1 }
 0x76d   :  { %v1462_v21 = vpop.f32.mrb[14].mxu1 }
 0x76e   :  { %1551 = vperm.xlu1 %6188, %v1460_v19   ;;  %1482 = vperm.xlu0 %6187, %v1460_v19   ;;  %v6066_v22 = vpop.f32.mrb[15].mxu1 }
 0x772   :  { %6189 = vset.pattern.permute.xlu1 %v7207_v23  ;;  %6190 = vset.pattern.permute.xlu0 %v7208_v24 }
 0x773   :  { %1507 = vperm.xlu1 %6189, %v1460_v19   ;;  %1576 = vperm.xlu0 %6190, %v1460_v19  }
 0x777   :  { %6191 = vset.pattern.permute.xlu1 %v7209_v26  ;;  %6193 = vset.pattern.permute.xlu0 %v7210_v27 }
 0x778   :  { %1619 = vperm.xlu1 %6191, %v1460_v19   ;;  %1536 = vperm.xlu0 %6193, %v1460_v19  }
 0x77c   :  { %6192 = vset.pattern.permute.xlu1 %v7202_v25  ;;  %6196 = vset.pattern.permute.xlu0 %v7211_v28 }
 0x77d   :  { %1467 = vperm.xlu1 %6192, %v1460_v19  }
 0x781   :  { %6194 = vset.pattern.permute.xlu1 %v7211_v28 }
 0x782   :  { %1644 = vperm.xlu1 %6194, %v1460_v19  }
 0x786   :  { %6195 = vset.pattern.permute.xlu1 %v7212_v29 }
 0x787   :  { %1604 = vperm.xlu1 %6195, %v1460_v19  }
 0x7ed   :  { %v1552_v34 = vpop.permute.xlu1 %1551  ;;  %v1483_v35 = vpop.permute.xlu0 %1482 }
 0x7ee   :  { %v1559_v36 = vrot.slane %v1552_v34, %v7585_v33  ;;  %v1490_v40 = vrot.slane %v1483_v35, %v7585_v33 }
 0x7f0   :  { %v1560_v37 = vrot.slane %v1559_v36, 7  ;;  %v1491_v46 = vrot.slane %v1490_v40, 7  ;;  %v1564_v49 = vmul.f32 %v1559_v36, %v7557_v10  ;;  %v1495_v58 = vmul.f32 %v1490_v40, %v7557_v10 }
 0x7f2   :  { %v1508_v38 = vpop.permute.xlu1 %1507  ;;  %v1577_v39 = vpop.permute.xlu0 %1576  ;;  %v1563_v44 = vmul.f32 %v1560_v37, %v7551_v6  ;;  %v1494_v57 = vmul.f32 %v1491_v46, %v7551_v6  ;;  %v5600_v60 = vrot.slane %v1564_v49, 9  ;;  %v5596_v17 = vrot.slane %v1495_v58, 9 }
 0x7f3   :  { %v1584_v41 = vrot.slane %v1577_v39, %v7585_v33  ;;  %v1515_v42 = vrot.slane %v1508_v38, %v7585_v33  ;;  %v6297_v39 = vld [vmem:[#allocation26] sm:$0xff]  }
 0x7f4   :  { %v5599_v53 = vrot.slane %v1563_v44, 9  ;;  %v5595_v12 = vrot.slane %v1494_v57, 9  ;;  %6067 = vmatprep.subr.bf16.mxu0 %v6297_v39 }
 0x7f5   :  { %v1585_v43 = vrot.slane %v1584_v41, 6  ;;  %v1586_v45 = vrot.slane %v1584_v41, 7  ;;  %v1516_v52 = vrot.slane %v1515_v42, 6  ;;  %v1517_v59 = vrot.slane %v1515_v42, 7  ;;  %6068 = vmatpush3.bf16.msra.mxu0 %v6297_v39 }
 0x7f7   :  { %v1620_v47 = vpop.permute.xlu1 %1619  ;;  %v1537_v48 = vpop.permute.xlu0 %1536  ;;  %v1589_v50 = vmul.f32 %v1585_v43, %v7551_v6  ;;  %v1590_v54 = vmul.f32 %v1586_v45, %v7557_v10  ;;  %v1520_v4 = vmul.f32 %v1516_v52, %v7551_v6  ;;  %v1521_v13 = vmul.f32 %v1517_v59, %v7557_v10 }
 0x7f8   :  { %v1544_v51 = vrot.slane %v1537_v48, %v7585_v33  ;;  %v1627_v5 = vrot.slane %v1620_v47, %v7585_v33  ;;  %v6298_v48 = vld [vmem:[#allocation26 + $0x8] sm:$0xff]  }
 0x7f9   :  { %v5601_v61 = vrot.slane %v1589_v50, 10  ;;  %v5602_v8 = vrot.slane %v1590_v54, 10  ;;  %v5597_v19 = vrot.slane %v1520_v4, 10  ;;  %v5598_v26 = vrot.slane %v1521_v13, 10  ;;  %6069 = vmatprep.subr.bf16.mxu0 %v6298_v48  ;;  %v6300_v54 = vld [vmem:[#allocation26 + $0x18] sm:$0xff]  }
 0x7fa   :  { %v1545_v55 = vrot.slane %v1544_v51, 1  ;;  %v1548_v56 = vmul.f32 %v1544_v51, %v7551_v6  ;;  %v1628_v20 = vrot.slane %v1627_v5, 7  ;;  %v1632_v34 = vmul.f32 %v1627_v5, %v7557_v10  ;;  %6070 = vmatpush3.bf16.msra.mxu0 %v6298_v48 }
 0x7fc   :  { %v1549_v62 = vmul.f32 %v1545_v55, %v7557_v10  ;;  %v1573_v63 = vadd.f32 %v5599_v53, %v1548_v56  ;;  %v1468_v0 = vpop.permute.xlu1 %1467  ;;  %v1631_v30 = vmul.f32 %v1628_v20, %v7551_v6  ;;  %v5604_v44 = vrot.slane %v1632_v34, 9  ;;  %v6299_v53 = vld [vmem:[#allocation26 + $0x10] sm:$0xff]   ;;  %v6301_v56 = vld [vmem:[#allocation29] sm:$0xff]  }
 0x7fd   :  { %v1475_v7 = vrot.slane %v1468_v0, %v7585_v33  ;;  %6071 = vmatprep.subr.bf16.mxu0 %v6299_v53 }
 0x7fe   :  { %v1574_v9 = vadd.f32 %v5600_v60, %v1549_v62  ;;  %v1599_v11 = vadd.f32 %v5601_v61, %v1573_v63  ;;  %v5603_v40 = vrot.slane %v1631_v30, 9  ;;  %6072 = vmatpush3.bf16.msra.mxu0 %v6299_v53  ;;  %v1671_v62 = vld [vmem:[#allocation23] sm:$0x3]  ;;  %v5608_v53 = vld [vmem:[#allocation28] ss:$0 sm:$0xff] }
 0x7ff   :  { %v1476_v14 = vrot.slane %v1475_v7, 1  ;;  %v1479_v16 = vmul.f32 %v1475_v7, %v7551_v6  ;;  %6073 = vmatprep.subr.bf16.mxu0 %v6300_v54  ;;  %v1672_v4 = vunpack.c.l.bf16 %v1671_v62 }
 0x800   :  { %v1600_v18 = vadd.f32 %v5602_v8, %v1574_v9  ;;  %1601 = vst.msk [vmem:[#allocation47 + $0x1] sm:$0x1] %vm1532_vm3, %v1599_v11 }
 0x801   :  { %v1480_v21 = vmul.f32 %v1476_v14, %v7557_v10  ;;  %v1504_v22 = vadd.f32 %v5595_v12, %v1479_v16  ;;  %v1645_v23 = vpop.permute.xlu1 %1644  ;;  %v1728_v5 = vrot.slane %v1672_v4, %v7546_v2  ;;  %v1698_v9 = vrot.slane %v1672_v4, %v7549_v3 }
 0x802   :  { %v1652_v24 = vrot.slane %v1645_v23, %v7585_v33  ;;  %1602 = vst.msk [vmem:[#allocation47 + $0x5] sm:$0x1] %vm1532_vm3, %v1600_v18  ;;  %6074 = vmatpush3.bf16.msra.mxu0 %v6300_v54  ;;  %v1762_v13 = vrot.slane %v1672_v4, %v7564_v15 }
 0x803   :  { %v1505_v27 = vadd.f32 %v5596_v17, %v1480_v21  ;;  %v1530_v28 = vadd.f32 %v5597_v19, %v1504_v22  ;;  %6079 = vmatprep.subr.bf16.mxu0 %v6301_v56 }
 0x804   :  { %v1653_v29 = vrot.slane %v1652_v24, 6  ;;  %v1654_v31 = vrot.slane %v1652_v24, 7 }
 0x805   :  { %v1531_v32 = vadd.f32 %v5598_v26, %v1505_v27  ;;  %1533 = vst.msk [vmem:[#allocation47] sm:$0x1] %vm1532_vm3, %v1530_v28 }
 0x806   :  { %v1605_v35 = vpop.permute.xlu1 %1604  ;;  %v1657_v36 = vmul.f32 %v1653_v29, %v7551_v6  ;;  %v1658_v41 = vmul.f32 %v1654_v31, %v7557_v10 }
 0x807   :  { %v1612_v37 = vrot.slane %v1605_v35, %v7585_v33  ;;  %v1687_v38 = vrot.slane %v1531_v32, %v7549_v3  ;;  %1534 = vst.msk [vmem:[#allocation47 + $0x4] sm:$0x1] %vm1532_vm3, %v1531_v32  ;;  %v1717_v33 = vrot.slane %v1600_v18, %v7549_v3 }
 0x808   :  { %v5605_v45 = vrot.slane %v1657_v36, 10  ;;  %v5606_v49 = vrot.slane %v1658_v41, 10 }
 0x809   :  { %v1613_v42 = vrot.slane %v1612_v37, 1  ;;  %v1616_v43 = vmul.f32 %v1612_v37, %v7551_v6  ;;  %1693 = vbcast.lane.b32.xlu1 %v1687_v38, 264  ;;  %1689 = vbcast.lane.b32.xlu0 %v1687_v38, 256  ;;  %v1676_v6 = vrot.slane %v1530_v28, %v7549_v3  ;;  %v5607_v28 = vld [vmem:[#allocation25] ss:$0 sm:$0xff] }
 0x80b   :  { %v1617_v46 = vmul.f32 %v1613_v42, %v7557_v10  ;;  %v1641_v47 = vadd.f32 %v5603_v40, %v1616_v43  ;;  %v1706_v10 = vrot.slane %v1599_v11, %v7549_v3 }
 0x80d   :  { %1723 = vbcast.lane.b32.xlu1 %v1717_v33, 264  ;;  %1719 = vbcast.lane.b32.xlu0 %v1717_v33, 256  ;;  %v1667_v50 = vadd.f32 %v5605_v45, %v1641_v47  ;;  %v1642_v51 = vadd.f32 %v5604_v44, %v1617_v46 }
 0x80f   :  { %1669 = vst.msk [vmem:[#allocation47 + $0x2] sm:$0x1] %vm1532_vm3, %v1667_v50  ;;  %v1668_v52 = vadd.f32 %v5606_v49, %v1642_v51  ;;  %v1740_v55 = vrot.slane %v1667_v50, %v7549_v3  ;;  %v6302_v49 = vld [vmem:[#allocation29 + $0x8] sm:$0xff]   ;;  %v6303_v50 = vld [vmem:[#allocation29 + $0x10] sm:$0xff]   ;;  %v6304_v51 = vld [vmem:[#allocation29 + $0x18] sm:$0xff]  }
 0x811   :  { %1682 = vbcast.lane.b32.xlu1 %v1676_v6, 264  ;;  %1678 = vbcast.lane.b32.xlu0 %v1676_v6, 256  ;;  %1670 = vst.msk [vmem:[#allocation47 + $0x6] sm:$0x1] %vm1532_vm3, %v1668_v52  ;;  %v1751_v57 = vrot.slane %v1668_v52, %v7549_v3  ;;  %v6305_v6 = vld [vmem:[#allocation32] sm:$0xff]   ;;  %v6306_v52 = vld [vmem:[#allocation32 + $0x8] sm:$0xff]  }
 0x812   :  { %6091 = vmatprep.subr.bf16.mxu1 %v6305_v6 }
 0x813   :  { %6092 = vmatpush3.bf16.msra.mxu1 %v6305_v6  ;;  %v6339_v6 = vld [vmem:[#allocation38 + $0x20] ss:$8 sps:$4 sm:$0xff]  }
 0x814   :  { %6093 = vmatprep.subr.bf16.mxu1 %v6306_v52 }
 0x815   :  { %1712 = vbcast.lane.b32.xlu1 %v1706_v10, 264  ;;  %1708 = vbcast.lane.b32.xlu0 %v1706_v10, 256 }
 0x817   :  { %6094 = vmatpush3.bf16.msra.mxu1 %v6306_v52  ;;  %v6344_v52 = vld [vmem:[#allocation38 + $0x34] ss:$8 sps:$4 sm:$0xff]  }
 0x819   :  { %1746 = vbcast.lane.b32.xlu1 %v1740_v55, 264  ;;  %1742 = vbcast.lane.b32.xlu0 %v1740_v55, 256 }
 0x81d   :  { %1757 = vbcast.lane.b32.xlu1 %v1751_v57, 264  ;;  %1753 = vbcast.lane.b32.xlu0 %v1751_v57, 256 }
 0x87b   :  { %v1694_v58 = vpop.permute.xlu1 %1693  ;;  %v1690_v59 = vpop.permute.xlu0 %1689 }
 0x87c   :  { %v1702_v26 = vmul.f32 %v1698_v9, %v1694_v58  ;;  %v1701_v27 = vmul.f32 %v1698_v9, %v1690_v59 }
 0x87f   :  { %v1724_v60 = vpop.permute.xlu1 %1723  ;;  %v1720_v61 = vpop.permute.xlu0 %1719 }
 0x880   :  { %v1732_v17 = vmul.f32 %v1728_v5, %v1724_v60  ;;  %v1731_v18 = vmul.f32 %v1728_v5, %v1720_v61 }
 0x882   :  { %v1736_v31 = vadd.f32 %v1732_v17, %v1702_v26  ;;  %v1735_v32 = vadd.f32 %v1731_v18, %v1701_v27  ;;  %v6314_v17 = vld [vmem:[#allocation35 + $0x14] ss:$8 sps:$4 sm:$0xff]   ;;  %v6312_v18 = vld [vmem:[#allocation35 + $0x10] ss:$8 sps:$4 sm:$0xff]  }
 0x883   :  { %v1683_v63 = vpop.permute.xlu1 %1682  ;;  %v1679_v0 = vpop.permute.xlu0 %1678  ;;  %v6326_v26 = vld [vmem:[#allocation35 + $0x54] ss:$8 sps:$4 sm:$0xff]   ;;  %v6324_v27 = vld [vmem:[#allocation35 + $0x50] ss:$8 sps:$4 sm:$0xff]  }
 0x884   :  { %v1700_v14 = vmul.f32 %v1698_v9, %v1683_v63  ;;  %v1699_v16 = vmul.f32 %v1698_v9, %v1679_v0 }
 0x887   :  { %v1713_v7 = vpop.permute.xlu1 %1712  ;;  %v1709_v8 = vpop.permute.xlu0 %1708 }
 0x888   :  { %v1730_v11 = vmul.f32 %v1728_v5, %v1713_v7  ;;  %v1729_v12 = vmul.f32 %v1728_v5, %v1709_v8 }
 0x88a   :  { %v1734_v21 = vadd.f32 %v1730_v11, %v1700_v14  ;;  %v1733_v22 = vadd.f32 %v1729_v12, %v1699_v16  ;;  %v6307_v12 = vld [vmem:[#allocation32 + $0x10] sm:$0xff]   ;;  %v6309_v14 = vld [vmem:[#allocation35] ss:$8 sps:$4 sm:$0xff]  }
 0x88b   :  { %v1747_v19 = vpop.permute.xlu1 %1746  ;;  %v1743_v20 = vpop.permute.xlu0 %1742  ;;  %6095 = vmatprep.subr.bf16.mxu1 %v6307_v12  ;;  %v6311_v16 = vld [vmem:[#allocation35 + $0x4] ss:$8 sps:$4 sm:$0xff]  }
 0x88c   :  { %v1764_v23 = vmul.f32 %v1762_v13, %v1747_v19  ;;  %v1763_v24 = vmul.f32 %v1762_v13, %v1743_v20  ;;  %6096 = vmatpush3.bf16.msra.mxu1 %v6307_v12  ;;  %v6317_v19 = vld [vmem:[#allocation35 + $0x24] ss:$8 sps:$4 sm:$0xff]   ;;  %v6315_v20 = vld [vmem:[#allocation35 + $0x20] ss:$8 sps:$4 sm:$0xff]  }
 0x88e   :  { %v1768_v29 = vadd.f32 %v1764_v23, %v1734_v21  ;;  %v1767_v30 = vadd.f32 %v1763_v24, %v1733_v22  ;;  %v6320_v21 = vld [vmem:[#allocation35 + $0x34] ss:$8 sps:$4 sm:$0xff]   ;;  %v6318_v22 = vld [vmem:[#allocation35 + $0x30] ss:$8 sps:$4 sm:$0xff]   ;;  %v6323_v23 = vld [vmem:[#allocation35 + $0x44] ss:$8 sps:$4 sm:$0xff]  }
 0x88f   :  { %v1758_v34 = vpop.permute.xlu1 %1757  ;;  %v1754_v35 = vpop.permute.xlu0 %1753  ;;  %v6321_v24 = vld [vmem:[#allocation35 + $0x40] ss:$8 sps:$4 sm:$0xff]  }
 0x890   :  { %v1779_v36 = vadd.f32 %v5607_v28, %v1768_v29  ;;  %v1778_v37 = vadd.f32 %v5607_v28, %v1767_v30  ;;  %v1766_v38 = vmul.f32 %v1762_v13, %v1758_v34  ;;  %v1765_v39 = vmul.f32 %v1762_v13, %v1754_v35  ;;  %v6308_v13 = vld [vmem:[#allocation32 + $0x18] sm:$0xff]  }
 0x891   :  { %6097 = vmatprep.subr.bf16.mxu1 %v6308_v13 }
 0x892   :  { %v1783_v40 = vmax.f32 %v1779_v36, 0.0  ;;  %v1782_v41 = vmax.f32 %v1778_v37, 0.0  ;;  %v1770_v42 = vadd.f32 %v1766_v38, %v1736_v31  ;;  %v1769_v43 = vadd.f32 %v1765_v39, %v1735_v32  ;;  %6098 = vmatpush3.bf16.msra.mxu1 %v6308_v13 }
 0x894   :  { %v1786_v44 = vpack.c.bf16 %v1783_v40, %v1782_v41  ;;  %v1781_v45 = vadd.f32 %v5607_v28, %v1770_v42  ;;  %v1780_v46 = vadd.f32 %v5607_v28, %v1769_v43  ;;  %v5619_v28 = vld [vmem:[#allocation31] ss:$0 sm:$0xff] }
 0x896   :  { %v1785_v47 = vmax.f32 %v1781_v45, 0.0  ;;  %v1784_v33 = vmax.f32 %v1780_v46, 0.0  ;;  %6075 = vmatprep.mubr.msk.bf16.mxu0 %vm650_vm0, %v1786_v44  ;;  %v6329_v44 = vld [vmem:[#allocation35 + $0x64] ss:$8 sps:$4 sm:$0xff]   ;;  %v6327_v45 = vld [vmem:[#allocation35 + $0x60] ss:$8 sps:$4 sm:$0xff]  }
 0x897   :  { %v6332_v46 = vld [vmem:[#allocation35 + $0x74] ss:$8 sps:$4 sm:$0xff]  }
 0x898   :  { %v1787_v48 = vpack.c.bf16 %v1785_v47, %v1784_v33  ;;  %v6330_v47 = vld [vmem:[#allocation35 + $0x70] ss:$8 sps:$4 sm:$0xff]   ;;  %v6333_v33 = vld [vmem:[#allocation38] ss:$8 sps:$4 sm:$0xff]  }
 0x89a   :  { %6076 = vmatmul.mubr.msk.bf16.vlgmr.msra.gmra.mrb[8].mxu0 %vm650_vm0, %v1787_v48  ;;  %v6335_v48 = vld [vmem:[#allocation38 + $0x4] ss:$8 sps:$4 sm:$0xff]  }
 0x89b   :  { %6080 = vmatpush3.bf16.msra.mxu0 %v6301_v56  ;;  %2526 = vmatprep.subr.bf16.mxu1 %v6335_v48 }
 0x89c   :  { %6081 = vmatprep.subr.bf16.mxu0 %v6302_v49 }
 0x89f   :  { %6082 = vmatpush3.bf16.msra.mxu0 %v6302_v49  ;;  %v6338_v49 = vld [vmem:[#allocation38 + $0x14] ss:$8 sps:$4 sm:$0xff]  }
 0x8a0   :  { %6083 = vmatprep.subr.bf16.mxu0 %v6303_v50 }
 0x8a3   :  { %6084 = vmatpush3.bf16.msra.mxu0 %v6303_v50  ;;  %v6336_v50 = vld [vmem:[#allocation38 + $0x10] ss:$8 sps:$4 sm:$0xff]  }
 0x8a4   :  { %6085 = vmatprep.subr.bf16.mxu0 %v6304_v51 }
 0x8a7   :  { %6086 = vmatpush3.bf16.msra.mxu0 %v6304_v51  ;;  %v6341_v51 = vld [vmem:[#allocation38 + $0x24] ss:$8 sps:$4 sm:$0xff]  }
 0x8a8   :  { %2215 = vmatprep.subr.bf16.mxu0 %v6311_v16  ;;  %v6356_v16 = vld [vmem:[#allocation38 + $0x74] ss:$8 sps:$4 sm:$0xff]  }
 0x96d   :  { %v6077_v10 = vpop.f32.mrb[8].mxu0 }
 0x96e   :  { %v1876_v54 = vadd.f32 %v6077_v10, %v5608_v53  ;;  %v1867_v55 = vpop.f32.mrb[9].mxu0  ;;  %v6347_v10 = vld [vmem:[#allocation38 + $0x44] ss:$8 sps:$4 sm:$0xff]  }
 0x96f   :  { %v1868_v57 = vadd.f32 %v5608_v53, %v1867_v55  ;;  %v6078_v56 = vpop.f32.mrb[10].mxu0  ;;  %v6350_v55 = vld [vmem:[#allocation38 + $0x54] ss:$8 sps:$4 sm:$0xff]  }
 0x970   :  { %v1884_v58 = vmax.f32 %v1876_v54, 0.0  ;;  %v1879_v59 = vadd.f32 %v6078_v56, %v5608_v53  ;;  %v1870_v60 = vpop.f32.mrb[11].mxu0  ;;  %v6345_v54 = vld [vmem:[#allocation38 + $0x40] ss:$8 sps:$4 sm:$0xff]   ;;  %v6353_v56 = vld [vmem:[#allocation38 + $0x64] ss:$8 sps:$4 sm:$0xff]  }
 0x971   :  { %v1882_v61 = vmax.f32 %v1868_v57, 0.0  ;;  %v1871_v62 = vadd.f32 %v5608_v53, %v1870_v60  ;;  %v6342_v53 = vld [vmem:[#allocation38 + $0x30] ss:$8 sps:$4 sm:$0xff]  }
 0x972   :  { %v5956_v63 = vpack.c.bf16 %v1884_v58, %v1884_v58  ;;  %v1885_v0 = vmax.f32 %v1879_v59, 0.0  ;;  %v6348_v57 = vld [vmem:[#allocation38 + $0x50] ss:$8 sps:$4 sm:$0xff]   ;;  %v5626_v59 = vld [vmem:[#allocation34] ss:$0 sm:$0xff] }
 0x973   :  { %v5954_v4 = vpack.c.bf16 %v1882_v61, %v1882_v61  ;;  %v1883_v5 = vmax.f32 %v1871_v62, 0.0 }
 0x974   :  { %1905 = vst.msk [vmem:[#allocation48 + $0x8] sm:$0xf] %vm1902_vm4, %v5956_v63  ;;  %v1887_v7 = vpack.c.bf16 %v1885_v0, %v1884_v58  ;;  %v5957_v8 = vpack.c.bf16 %v1885_v0, %v1885_v0  ;;  %v6351_v58 = vld [vmem:[#allocation38 + $0x60] ss:$8 sps:$4 sm:$0xff]  }
 0x975   :  { %1903 = vst.msk [vmem:[#allocation48] sm:$0xf] %vm1902_vm4, %v5954_v4  ;;  %v1886_v9 = vpack.c.bf16 %v1883_v5, %v1882_v61  ;;  %v5955_v11 = vpack.c.bf16 %v1883_v5, %v1883_v5 }
 0x976   :  { %1906 = vst.msk [vmem:[#allocation48 + $0xc] sm:$0xf] %vm1902_vm4, %v5957_v8 }
 0x977   :  { %1904 = vst.msk [vmem:[#allocation48 + $0x4] sm:$0xf] %vm1902_vm4, %v5955_v11  ;;  %6087 = vmatprep.mubr.msk.bf16.mxu0 %vm650_vm0, %v1886_v9 }
 0x978   :  { %6088 = vmatmul.mubr.msk.bf16.vlgmr.msra.gmra.mrb[12].mxu0 %vm650_vm0, %v1887_v7 }
 0x979   :  { %2247 = vmatprep.mubr.bf16.mxu0 %v7202_v25  ;;  %2216 = vmatpush1.bf16.msra.mxu0 %v6309_v14 }
 0x97a   :  { %2217 = vmatprep.subr.bf16.mxu0 %v6314_v17  ;;  %v6354_v17 = vld [vmem:[#allocation38 + $0x70] ss:$8 sps:$4 sm:$0xff]  }
 0x97d   :  { %2218 = vmatpush1.bf16.msra.mxu0 %v6312_v18  ;;  %v6359_v18 = vld [vmem:[#allocation38 + $0x84] ss:$8 sps:$4 sm:$0xff]  }
 0x97e   :  { %2219 = vmatprep.subr.bf16.mxu0 %v6317_v19  ;;  %v6357_v19 = vld [vmem:[#allocation38 + $0x80] ss:$8 sps:$4 sm:$0xff]  }
 0x981   :  { %2220 = vmatpush1.bf16.msra.mxu0 %v6315_v20  ;;  %v6362_v20 = vld [vmem:[#allocation38 + $0x94] ss:$8 sps:$4 sm:$0xff]  }
 0x982   :  { %2221 = vmatprep.subr.bf16.mxu0 %v6320_v21  ;;  %v6360_v21 = vld [vmem:[#allocation38 + $0x90] ss:$8 sps:$4 sm:$0xff]  }
 0x985   :  { %2222 = vmatpush1.bf16.msra.mxu0 %v6318_v22  ;;  %v6365_v22 = vld [vmem:[#allocation38 + $0xa4] ss:$8 sps:$4 sm:$0xff]  }
 0x986   :  { %2223 = vmatprep.subr.bf16.mxu0 %v6323_v23  ;;  %v6363_v23 = vld [vmem:[#allocation38 + $0xa0] ss:$8 sps:$4 sm:$0xff]  }
 0x989   :  { %2224 = vmatpush1.bf16.msra.mxu0 %v6321_v24  ;;  %v6368_v24 = vld [vmem:[#allocation38 + $0xb4] ss:$8 sps:$4 sm:$0xff]  }
 0x98a   :  { %2225 = vmatprep.subr.bf16.mxu0 %v6326_v26  ;;  %v6366_v26 = vld [vmem:[#allocation38 + $0xb0] ss:$8 sps:$4 sm:$0xff]  }
 0x98d   :  { %2226 = vmatpush1.bf16.msra.mxu0 %v6324_v27  ;;  %v6371_v27 = vld [vmem:[#allocation38 + $0xc4] ss:$8 sps:$4 sm:$0xff]  }
 0x98e   :  { %2227 = vmatprep.subr.bf16.mxu0 %v6329_v44  ;;  %v6389_v44 = vld [vmem:[#allocation41 + $0x60] sm:$0xff]  }
 0x991   :  { %2228 = vmatpush1.bf16.msra.mxu0 %v6327_v45  ;;  %v6390_v45 = vld [vmem:[#allocation41 + $0x20] sm:$0xff]  }
 0x992   :  { %2229 = vmatprep.subr.bf16.mxu0 %v6332_v46  ;;  %v6391_v46 = vld [vmem:[#allocation41 + $0x68] sm:$0xff]  }
 0x995   :  { %2230 = vmatpush1.bf16.msra.mxu0 %v6330_v47  ;;  %v6392_v47 = vld [vmem:[#allocation41 + $0x28] sm:$0xff]  }
 0xa4b   :  { %v6089_v29 = vpop.f32.mrb[12].mxu0 }
 0xa4c   :  { %v1995_v30 = vadd.f32 %v6089_v29, %v5619_v28  ;;  %v1986_v31 = vpop.f32.mrb[13].mxu0  ;;  %v6374_v29 = vld [vmem:[#allocation38 + $0xd4] ss:$8 sps:$4 sm:$0xff]  }
 0xa4d   :  { %v1987_v32 = vadd.f32 %v5619_v28, %v1986_v31  ;;  %v6090_v34 = vpop.f32.mrb[14].mxu0  ;;  %v6377_v31 = vld [vmem:[#allocation38 + $0xe4] ss:$8 sps:$4 sm:$0xff]  }
 0xa4e   :  { %v1998_v35 = vadd.f32 %v6090_v34, %v5619_v28  ;;  %v1989_v36 = vpop.f32.mrb[15].mxu0  ;;  %v2003_v38 = vmax.f32 %v1995_v30, 0.0  ;;  %v6372_v30 = vld [vmem:[#allocation38 + $0xd0] ss:$8 sps:$4 sm:$0xff]  }
 0xa4f   :  { %v1990_v37 = vadd.f32 %v5619_v28, %v1989_v36  ;;  %v2001_v40 = vmax.f32 %v1987_v32, 0.0  ;;  %v6369_v28 = vld [vmem:[#allocation38 + $0xc0] ss:$8 sps:$4 sm:$0xff]   ;;  %v6378_v34 = vld [vmem:[#allocation38 + $0xf0] ss:$8 sps:$4 sm:$0xff]  }
 0xa50   :  { %v2004_v39 = vmax.f32 %v1998_v35, 0.0  ;;  %v6375_v32 = vld [vmem:[#allocation38 + $0xe0] ss:$8 sps:$4 sm:$0xff]   ;;  %v6380_v35 = vld [vmem:[#allocation38 + $0xf4] ss:$8 sps:$4 sm:$0xff]  }
 0xa51   :  { %v2002_v41 = vmax.f32 %v1990_v37, 0.0  ;;  %v6381_v36 = vld [vmem:[#allocation41 + $0x40] sm:$0xff]  }
 0xa52   :  { %v2006_v42 = vpack.c.bf16 %v2004_v39, %v2003_v38  ;;  %v6382_v37 = vld [vmem:[#allocation41] sm:$0xff]   ;;  %v6383_v38 = vld [vmem:[#allocation41 + $0x48] sm:$0xff]   ;;  %6013 = vmatprep.subr.bf16.mxu0 %v6381_v36 }
 0xa53   :  { %v2005_v43 = vpack.c.bf16 %v2002_v41, %v2001_v40  ;;  %v6384_v39 = vld [vmem:[#allocation41 + $0x8] sm:$0xff]   ;;  %v6385_v40 = vld [vmem:[#allocation41 + $0x50] sm:$0xff]  }
 0xa54   :  { %v6386_v41 = vld [vmem:[#allocation41 + $0x10] sm:$0xff]  }
 0xa55   :  { %6099 = vmatprep.mubr.msk.bf16.mxu1 %vm650_vm0, %v2005_v43  ;;  %v6388_v43 = vld [vmem:[#allocation41 + $0x18] sm:$0xff]  }
 0xa56   :  { %6100 = vmatmul.mubr.msk.bf16.vlgmr.msra.gmra.mrb[16].mxu1 %vm650_vm0, %v2006_v42  ;;  %v6387_v42 = vld [vmem:[#allocation41 + $0x58] sm:$0xff]  }
 0xa57   :  { %2527 = vmatpush1.bf16.msra.mxu1 %v6333_v33  ;;  %v2123_v33 = vld [vmem:[#allocation37] sm:$0x3] }
 0xa58   :  { %2528 = vmatprep.subr.bf16.mxu1 %v6338_v49  ;;  %v2128_v48 = vrot.slane %v2123_v33, %v7549_v3  ;;  %v2132_v49 = vrot.slane %v2123_v33, %v7546_v2 }
 0xa5b   :  { %2529 = vmatpush1.bf16.msra.mxu1 %v6336_v50 }
 0xa5c   :  { %2530 = vmatprep.subr.bf16.mxu1 %v6341_v51 }
 0xa5f   :  { %2531 = vmatpush1.bf16.msra.mxu1 %v6339_v6 }
 0xa60   :  { %2532 = vmatprep.subr.bf16.mxu1 %v6344_v52 }
 0xa63   :  { %2533 = vmatpush1.bf16.msra.mxu1 %v6342_v53 }
 0xa64   :  { %2534 = vmatprep.subr.bf16.mxu1 %v6347_v10 }
 0xa67   :  { %2535 = vmatpush1.bf16.msra.mxu1 %v6345_v54 }
 0xa68   :  { %2536 = vmatprep.subr.bf16.mxu1 %v6350_v55 }
 0xa6b   :  { %2537 = vmatpush1.bf16.msra.mxu1 %v6348_v57 }
 0xa6c   :  { %2538 = vmatprep.subr.bf16.mxu1 %v6353_v56 }
 0xa6f   :  { %2539 = vmatpush1.bf16.msra.mxu1 %v6351_v58 }
 0xa70   :  { %2540 = vmatprep.subr.bf16.mxu1 %v6356_v16 }
 0xa73   :  { %2541 = vmatpush1.bf16.msra.mxu1 %v6354_v17 }
 0xa74   :  { %2542 = vmatprep.subr.bf16.mxu1 %v6359_v18 }
 0xa77   :  { %2543 = vmatpush1.bf16.msra.mxu1 %v6357_v19 }
 0xa78   :  { %2544 = vmatprep.subr.bf16.mxu1 %v6362_v20 }
 0xa7b   :  { %2545 = vmatpush1.bf16.msra.mxu1 %v6360_v21 }
 0xa7c   :  { %2546 = vmatprep.subr.bf16.mxu1 %v6365_v22 }
 0xa7f   :  { %2547 = vmatpush1.bf16.msra.mxu1 %v6363_v23 }
 0xa80   :  { %2548 = vmatprep.subr.bf16.mxu1 %v6368_v24 }
 0xa83   :  { %2549 = vmatpush1.bf16.msra.mxu1 %v6366_v26 }
 0xa84   :  { %2550 = vmatprep.subr.bf16.mxu1 %v6371_v27 }
 0xa87   :  { %2551 = vmatpush1.bf16.msra.mxu1 %v6369_v28 }
 0xa88   :  { %2552 = vmatprep.subr.bf16.mxu1 %v6374_v29 }
 0xa8b   :  { %2553 = vmatpush1.bf16.msra.mxu1 %v6372_v30 }
 0xa8c   :  { %2554 = vmatprep.subr.bf16.mxu1 %v6377_v31 }
 0xa8f   :  { %2555 = vmatpush1.bf16.msra.mxu1 %v6375_v32 }
 0xa90   :  { %2556 = vmatprep.subr.bf16.mxu1 %v6380_v35 }
 0xa93   :  { %2557 = vmatpush1.bf16.msra.mxu1 %v6378_v34 }
 0xb29   :  { %v6101_v60 = vpop.f32.mrb[16].mxu1 }
 0xb2a   :  { %v2095_v61 = vadd.f32 %v6101_v60, %v5626_v59  ;;  %v2086_v62 = vpop.f32.mrb[17].mxu1 }
 0xb2b   :  { %v2087_v63 = vadd.f32 %v5626_v59, %v2086_v62  ;;  %v6102_v0 = vpop.f32.mrb[18].mxu1 }
 0xb2c   :  { %v2098_v4 = vadd.f32 %v6102_v0, %v5626_v59  ;;  %v2089_v5 = vpop.f32.mrb[19].mxu1  ;;  %v2103_v8 = vmax.f32 %v2095_v61, 0.0 }
 0xb2d   :  { %v2090_v7 = vadd.f32 %v5626_v59, %v2089_v5  ;;  %v2101_v11 = vmax.f32 %v2087_v63, 0.0 }
 0xb2e   :  { %v2104_v9 = vmax.f32 %v2098_v4, 0.0 }
 0xb2f   :  { %v2102_v12 = vmax.f32 %v2090_v7, 0.0 }
 0xb30   :  { %v2106_v13 = vpack.c.bf16 %v2104_v9, %v2103_v8 }
 0xb31   :  { %v2105_v14 = vpack.c.bf16 %v2102_v12, %v2101_v11 }
 0xb33   :  { %2248 = vmatmul.mubr.bf16.vlgmr.msra.gmra.mrb[16].mxu0 %v2105_v14 }
 0xb34   :  { %2257 = vmatprep.mubr.bf16.mxu0 %v7202_v25  ;;  %6014 = vmatpush3.bf16.msra.mxu0 %v6382_v37 }
 0xb35   :  { %6015 = vmatprep.subr.bf16.mxu0 %v6383_v38 }
 0xb38   :  { %6016 = vmatpush3.bf16.msra.mxu0 %v6384_v39 }
 0xb39   :  { %6017 = vmatprep.subr.bf16.mxu0 %v6385_v40 }
 0xb3b   :  { %2258 = vmatmul.mubr.bf16.gmra.mrb[20].mxu0 %v2106_v13 }
 0xb3c   :  { %6018 = vmatpush3.bf16.msra.mxu0 %v6386_v41 }
 0xb3d   :  { %6019 = vmatprep.subr.bf16.mxu0 %v6387_v42 }
 0xb40   :  { %6020 = vmatpush3.bf16.msra.mxu0 %v6388_v43 }
 0xb41   :  { %6021 = vmatprep.subr.bf16.mxu0 %v6389_v44 }
 0xb44   :  { %6022 = vmatpush3.bf16.msra.mxu0 %v6390_v45 }
 0xb45   :  { %6023 = vmatprep.subr.bf16.mxu0 %v6391_v46 }
 0xb48   :  { %6024 = vmatpush3.bf16.msra.mxu0 %v6392_v47 }
 0xc06   :  { %v2249_v50 = vpop.f32.mrb[16].mxu0 }
 0xc07   :  { %v2250_v51 = vadd.f32 %v2249_v50, %v2128_v48  ;;  %v2251_v6 = vpop.f32.mrb[17].mxu0 }
 0xc08   :  { %v2252_v52 = vadd.f32 %v2251_v6, %v2132_v49  ;;  %v2253_v53 = vpop.f32.mrb[18].mxu0 }
 0xc09   :  { %v2254_v10 = vadd.f32 %v2253_v53, %v2128_v48  ;;  %v2255_v54 = vpop.f32.mrb[19].mxu0  ;;  %v2268_v57 = vmax.f32 %v2250_v51, 0.0 }
 0xc0a   :  { %v2256_v55 = vadd.f32 %v2255_v54, %v2132_v49  ;;  %v2269_v58 = vmax.f32 %v2252_v52, 0.0  ;;  %v6394_v54 = vld [vmem:[#allocation41 + $0x30] sm:$0xff]  }
 0xc0b   :  { %v2270_v56 = vmax.f32 %v2254_v10, 0.0  ;;  %v6393_v10 = vld [vmem:[#allocation41 + $0x70] sm:$0xff]  }
 0xc0c   :  { %v2271_v59 = vmax.f32 %v2256_v55, 0.0  ;;  %6025 = vmatprep.subr.bf16.mxu0 %v6393_v10  ;;  %v6395_v55 = vld [vmem:[#allocation41 + $0x78] sm:$0xff]  }
 0xc0d   :  { %v2276_v60 = vmax.f32 %v2268_v57, %v2270_v56  ;;  %6026 = vmatpush3.bf16.msra.mxu0 %v6394_v54  ;;  %v6396_v57 = vld [vmem:[#allocation41 + $0x38] sm:$0xff]   ;;  %v2748_v56 = vld [vmem:[#allocation44] sm:$0xff] }
 0xc0e   :  { %v2283_v61 = vmax.f32 %v2269_v58, %v2271_v59  ;;  %v2259_v62 = vpop.f32.mrb[20].mxu0  ;;  %6027 = vmatprep.subr.bf16.mxu0 %v6395_v55  ;;  %v2764_v58 = vld [vmem:[#allocation44 + $0x80] sm:$0xff]  ;;  %v2749_v59 = vld [vmem:[#allocation44 + $0x8] sm:$0xff] }
 0xc0f   :  { %v2277_v63 = vrot.slane %v2276_v60, 4  ;;  %v2260_v0 = vadd.f32 %v2259_v62, %v2128_v48  ;;  %v2261_v4 = vpop.f32.mrb[21].mxu0  ;;  %v2765_v62 = vld [vmem:[#allocation44 + $0x88] sm:$0xff]  ;;  %v2908_v54 = vld [vmem:[#allocation44 + $0x500] sm:$0xff] }
 0xc10   :  { %v2284_v5 = vrot.slane %v2283_v61, 4  ;;  %v2262_v7 = vadd.f32 %v2261_v4, %v2132_v49  ;;  %v2263_v8 = vpop.f32.mrb[22].mxu0  ;;  %v2781_v4 = vld [vmem:[#allocation44 + $0x108] sm:$0xff]  ;;  %v2924_v55 = vld [vmem:[#allocation44 + $0x580] sm:$0xff] }
 0xc11   :  { %v2278_v9 = vmax.f32 %v2276_v60, %v2277_v63  ;;  %v2264_v11 = vadd.f32 %v2263_v8, %v2128_v48  ;;  %v2265_v12 = vpop.f32.mrb[23].mxu0  ;;  %v2272_v17 = vmax.f32 %v2260_v0, 0.0  ;;  %6028 = vmatpush3.bf16.msra.mxu0 %v6396_v57  ;;  %v5698_v60 = vcombine.low %v2748_v56, %v2764_v58 }
 0xc12   :  { %v2285_v13 = vmax.f32 %v2283_v61, %v2284_v5  ;;  %v2266_v14 = vadd.f32 %v2265_v12, %v2132_v49  ;;  %v2273_v20 = vmax.f32 %v2262_v7, 0.0  ;;  %v5699_v61 = vcombine.high %v2748_v56, %v2764_v58  ;;  %v2797_v5 = vld [vmem:[#allocation44 + $0x188] sm:$0xff] }
 0xc13   :  { %v2279_v16 = vrot.slane %v2278_v9, 2  ;;  %v2274_v18 = vmax.f32 %v2264_v11, 0.0  ;;  %v5700_v63 = vcombine.low %v2749_v59, %v2765_v62  ;;  %v5701_v0 = vcombine.high %v2749_v59, %v2765_v62  ;;  %v2829_v11 = vld [vmem:[#allocation44 + $0x288] sm:$0xff]  ;;  %v2940_v59 = vld [vmem:[#allocation44 + $0x600] sm:$0xff] }
 0xc14   :  { %v2286_v19 = vrot.slane %v2285_v13, 2  ;;  %v2275_v21 = vmax.f32 %v2266_v14, 0.0  ;;  %4452 = vmatprep.subr.bf16.mxu0 %v5699_v61  ;;  %v5733_v7 = vcombine.high %v2781_v4, %v2797_v5  ;;  %v5732_v8 = vcombine.low %v2781_v4, %v2797_v5  ;;  %v2845_v14 = vld [vmem:[#allocation44 + $0x308] sm:$0xff] }
 0xc15   :  { %v2280_v22 = vmax.f32 %v2278_v9, %v2279_v16  ;;  %v2290_v23 = vmax.f32 %v2272_v17, %v2274_v18  ;;  %4493 = vmatprep.subr.bf16.mxu1 %v5701_v0  ;;  %v2813_v9 = vld [vmem:[#allocation44 + $0x208] sm:$0xff]  ;;  %v5859_v56 = vcombine.high %v2908_v54, %v2924_v55  ;;  %v5858_v58 = vcombine.low %v2908_v54, %v2924_v55  ;;  %v2878_v55 = vld [vmem:[#allocation44 + $0x410] sm:$0xff] }
 0xc16   :  { %v2287_v24 = vmax.f32 %v2285_v13, %v2286_v19  ;;  %v2297_v26 = vmax.f32 %v2273_v20, %v2275_v21  ;;  %v5765_v12 = vcombine.high %v2813_v9, %v2829_v11  ;;  %v5764_v13 = vcombine.low %v2813_v9, %v2829_v11  ;;  %v2861_v16 = vld [vmem:[#allocation44 + $0x388] sm:$0xff] }
 0xc17   :  { %v2291_v27 = vrot.slane %v2290_v23, 4  ;;  %v2281_v29 = vrot.slane %v2280_v22, 1  ;;  %v5797_v17 = vcombine.high %v2845_v14, %v2861_v16  ;;  %v5796_v18 = vcombine.low %v2845_v14, %v2861_v16  ;;  %v2877_v19 = vld [vmem:[#allocation44 + $0x408] sm:$0xff] }
 0xc18   :  { %v2298_v28 = vrot.slane %v2297_v26, 4  ;;  %v2288_v31 = vrot.slane %v2287_v24, 1  ;;  %v2893_v20 = vld [vmem:[#allocation44 + $0x488] sm:$0xff] }
 0xc19   :  { %v2292_v30 = vmax.f32 %v2290_v23, %v2291_v27  ;;  %v2282_v36 = vmax.f32 %v2280_v22, %v2281_v29  ;;  %v5829_v21 = vcombine.high %v2877_v19, %v2893_v20  ;;  %v5828_v22 = vcombine.low %v2877_v19, %v2893_v20  ;;  %v2909_v23 = vld [vmem:[#allocation44 + $0x508] sm:$0xff]  ;;  %v2751_v19 = vld [vmem:[#allocation44 + $0x18] sm:$0xff] }
 0xc1a   :  { %v2299_v32 = vmax.f32 %v2297_v26, %v2298_v28  ;;  %v2289_v38 = vmax.f32 %v2287_v24, %v2288_v31  ;;  %v2925_v24 = vld [vmem:[#allocation44 + $0x588] sm:$0xff]  ;;  %v2340_v28 = vld [vmem:[#allocation40] sm:$0x3] }
 0xc1b   :  { %v2293_v34 = vrot.slane %v2292_v30, 2  ;;  %v2304_v42 = vpack.c.bf16 %v2282_v36, %v2282_v36  ;;  %v5861_v26 = vcombine.high %v2909_v23, %v2925_v24  ;;  %v5860_v27 = vcombine.low %v2909_v23, %v2925_v24  ;;  %v2941_v61 = vld [vmem:[#allocation44 + $0x608] sm:$0xff] }
 0xc1c   :  { %v2300_v35 = vrot.slane %v2299_v32, 2  ;;  %v2305_v45 = vpack.c.bf16 %v2289_v38, %v2289_v38  ;;  %v2345_v29 = vrot.slane %v2340_v28, %v7549_v3  ;;  %v2973_v9 = vld [vmem:[#allocation44 + $0x708] sm:$0xff] }
 0xc1d   :  { %v2294_v37 = vmax.f32 %v2292_v30, %v2293_v34  ;;  %v2356_v33 = vunpack.c.l.b16 %v2304_v42  ;;  %v2349_v30 = vrot.slane %v2340_v28, %v7546_v2 }
 0xc1e   :  { %v2301_v39 = vmax.f32 %v2299_v32, %v2300_v35  ;;  %v2357_v49 = vunpack.c.l.b16 %v2305_v45  ;;  %v2812_v45 = vld [vmem:[#allocation44 + $0x200] sm:$0xff] }
 0xc1f   :  { %v2295_v40 = vrot.slane %v2294_v37, 1 }
 0xc20   :  { %v2302_v41 = vrot.slane %v2301_v39, 1 }
 0xc21   :  { %v2296_v43 = vmax.f32 %v2294_v37, %v2295_v40  ;;  %v2780_v40 = vld [vmem:[#allocation44 + $0x100] sm:$0xff] }
 0xc22   :  { %v2303_v44 = vmax.f32 %v2301_v39, %v2302_v41  ;;  %v2796_v41 = vld [vmem:[#allocation44 + $0x180] sm:$0xff] }
 0xc23   :  { %v2306_v46 = vpack.c.bf16 %v2296_v43, %v2296_v43 }
 0xc24   :  { %v2307_v47 = vpack.c.bf16 %v2303_v44, %v2303_v44  ;;  %v5731_v44 = vcombine.high %v2780_v40, %v2796_v41 }
 0xc25   :  { %v2358_v48 = vunpack.c.l.b16 %v2306_v46  ;;  %v2828_v46 = vld [vmem:[#allocation44 + $0x280] sm:$0xff] }
 0xc26   :  { %v2359_v50 = vunpack.c.l.b16 %v2307_v47  ;;  %v5730_v47 = vcombine.low %v2780_v40, %v2796_v41 }
 0xc27   :  { %v2360_v51 = vsel %vm965_vm1, %v2358_v48, %v2356_v33  ;;  %v5763_v33 = vcombine.high %v2812_v45, %v2828_v46  ;;  %v2844_v48 = vld [vmem:[#allocation44 + $0x300] sm:$0xff] }
 0xc28   :  { %v2361_v6 = vsel %vm965_vm1, %v2359_v50, %v2357_v49  ;;  %v2362_v53 = vpack.c.b16 %v2360_v51, %v2360_v51  ;;  %v2860_v49 = vld [vmem:[#allocation44 + $0x380] sm:$0xff]  ;;  %v5762_v50 = vcombine.low %v2812_v45, %v2828_v46  ;;  %v2831_v45 = vld [vmem:[#allocation44 + $0x298] sm:$0xff] }
 0xc29   :  { %v2363_v52 = vpack.c.b16 %v2361_v6, %v2361_v6  ;;  %v5795_v51 = vcombine.high %v2844_v48, %v2860_v49  ;;  %v2876_v6 = vld [vmem:[#allocation44 + $0x400] sm:$0xff] }
 0xc2b   :  { %2558 = vmatprep.mubr.bf16.mxu1 %v2363_v52  ;;  %v2892_v52 = vld [vmem:[#allocation44 + $0x480] sm:$0xff] }
 0xc2c   :  { %2559 = vmatmul.mubr.bf16.vlgmr.msra.gmra.mrb[20].mxu1 %v2362_v53  ;;  %v5794_v53 = vcombine.low %v2844_v48, %v2860_v49  ;;  %v5827_v10 = vcombine.high %v2876_v6, %v2892_v52  ;;  %v5826_v57 = vcombine.low %v2876_v6, %v2892_v52  ;;  %v2846_v49 = vld [vmem:[#allocation44 + $0x310] sm:$0xff]  ;;  %v2863_v6 = vld [vmem:[#allocation44 + $0x398] sm:$0xff] }
 0xc2d   :  { %4525 = vmatprep.mubr.bf16.mxu1 %v7202_v25  ;;  %4494 = vmatpush1.bf16.msra.mxu1 %v5700_v63  ;;  %v2957_v63 = vld [vmem:[#allocation44 + $0x688] sm:$0xff] }
 0xc2e   :  { %4495 = vmatprep.subr.bf16.mxu1 %v5733_v7  ;;  %v5892_v4 = vcombine.low %v2941_v61, %v2957_v63  ;;  %v5893_v5 = vcombine.high %v2941_v61, %v2957_v63  ;;  %v2972_v7 = vld [vmem:[#allocation44 + $0x700] sm:$0xff]  ;;  %v2910_v63 = vld [vmem:[#allocation44 + $0x510] sm:$0xff] }
 0xc31   :  { %4496 = vmatpush1.bf16.msra.mxu1 %v5732_v8  ;;  %v2988_v8 = vld [vmem:[#allocation44 + $0x780] sm:$0xff] }
 0xc32   :  { %4497 = vmatprep.subr.bf16.mxu1 %v5765_v12  ;;  %v5923_v11 = vcombine.high %v2972_v7, %v2988_v8  ;;  %v2989_v12 = vld [vmem:[#allocation44 + $0x788] sm:$0xff] }
 0xc33   :  { %v5924_v14 = vcombine.low %v2973_v9, %v2989_v12  ;;  %v5925_v16 = vcombine.high %v2973_v9, %v2989_v12  ;;  %v2942_v12 = vld [vmem:[#allocation44 + $0x610] sm:$0xff] }
 0xc35   :  { %4498 = vmatpush1.bf16.msra.mxu1 %v5764_v13  ;;  %v5922_v13 = vcombine.low %v2972_v7, %v2988_v8 }
 0xc36   :  { %4499 = vmatprep.subr.bf16.mxu1 %v5797_v17  ;;  %v2750_v17 = vld [vmem:[#allocation44 + $0x10] sm:$0xff] }
 0xc39   :  { %4500 = vmatpush1.bf16.msra.mxu1 %v5796_v18  ;;  %v2766_v18 = vld [vmem:[#allocation44 + $0x90] sm:$0xff] }
 0xc3a   :  { %4501 = vmatprep.subr.bf16.mxu1 %v5829_v21  ;;  %v5703_v20 = vcombine.high %v2750_v17, %v2766_v18  ;;  %v2767_v21 = vld [vmem:[#allocation44 + $0x98] sm:$0xff] }
 0xc3b   :  { %v5704_v23 = vcombine.low %v2751_v19, %v2767_v21  ;;  %v5705_v24 = vcombine.high %v2751_v19, %v2767_v21  ;;  %v2974_v21 = vld [vmem:[#allocation44 + $0x710] sm:$0xff] }
 0xc3d   :  { %4502 = vmatpush1.bf16.msra.mxu1 %v5828_v22  ;;  %v5702_v22 = vcombine.low %v2750_v17, %v2766_v18 }
 0xc3e   :  { %4503 = vmatprep.subr.bf16.mxu1 %v5861_v26 }
 0xc41   :  { %4504 = vmatpush1.bf16.msra.mxu1 %v5860_v27  ;;  %v5681_v27 = vld [vmem:[#allocation43] ss:$0 sm:$0xff] }
 0xc42   :  { %4505 = vmatprep.subr.bf16.mxu1 %v5893_v5  ;;  %v2927_v5 = vld [vmem:[#allocation44 + $0x598] sm:$0xff] }
 0xc45   :  { %4506 = vmatpush1.bf16.msra.mxu1 %v5892_v4  ;;  %v2911_v4 = vld [vmem:[#allocation44 + $0x518] sm:$0xff] }
 0xc46   :  { %4507 = vmatprep.subr.bf16.mxu1 %v5925_v16  ;;  %v2959_v16 = vld [vmem:[#allocation44 + $0x698] sm:$0xff]  ;;  %v5864_v18 = vcombine.low %v2911_v4, %v2927_v5 }
 0xc49   :  { %4508 = vmatpush1.bf16.msra.mxu1 %v5924_v14  ;;  %v2943_v14 = vld [vmem:[#allocation44 + $0x618] sm:$0xff] }
 0xc4a   :  { %4575 = vmatprep.subr.bf16.mxu1 %v5705_v24  ;;  %v2991_v24 = vld [vmem:[#allocation44 + $0x798] sm:$0xff] }
 0xcff   :  { %v2560_v31 = vpop.f32.mrb[20].mxu1 }
 0xd00   :  { %v2561_v32 = vadd.f32 %v2560_v31, %v2345_v29  ;;  %v2562_v34 = vpop.f32.mrb[21].mxu1 }
 0xd01   :  { %v2563_v35 = vadd.f32 %v2562_v34, %v2349_v30  ;;  %v2564_v36 = vpop.f32.mrb[22].mxu1  ;;  %v2782_v34 = vld [vmem:[#allocation44 + $0x110] sm:$0xff] }
 0xd02   :  { %v2567_v37 = vmax.f32 %v2561_v32, 0.0  ;;  %v2565_v38 = vpop.f32.mrb[23].mxu1  ;;  %v2783_v36 = vld [vmem:[#allocation44 + $0x118] sm:$0xff] }
 0xd03   :  { %v2568_v39 = vmax.f32 %v2563_v35, 0.0  ;;  %v2798_v35 = vld [vmem:[#allocation44 + $0x190] sm:$0xff] }
 0xd04   :  { %v2569_v43 = vpack.c.bf16 %v2567_v37, %v2567_v37  ;;  %v2799_v37 = vld [vmem:[#allocation44 + $0x198] sm:$0xff]  ;;  %v5735_v40 = vcombine.high %v2782_v34, %v2798_v35  ;;  %v5734_v46 = vcombine.low %v2782_v34, %v2798_v35  ;;  %v2769_v34 = vld [vmem:[#allocation44 + $0xa8] sm:$0xff] }
 0xd05   :  { %v2570_v42 = vpack.c.bf16 %v2568_v39, %v2568_v39  ;;  %v5737_v41 = vcombine.high %v2783_v36, %v2799_v37 }
 0xd07   :  { %2738 = vmatprep.mubr.bf16.mxu0 %v2570_v42  ;;  %v2814_v42 = vld [vmem:[#allocation44 + $0x210] sm:$0xff] }
 0xd08   :  { %2739 = vmatmul.mubr.bf16.vlgmr.msra.gmra.mrb[24].mxu0 %v2569_v43  ;;  %v2830_v43 = vld [vmem:[#allocation44 + $0x290] sm:$0xff] }
 0xd09   :  { %4453 = vmatpush1.bf16.msra.mxu0 %v5698_v60  ;;  %4484 = vmatprep.mubr.bf16.mxu0 %v7202_v25  ;;  %v2956_v60 = vld [vmem:[#allocation44 + $0x680] sm:$0xff]  ;;  %v5766_v52 = vcombine.low %v2814_v42, %v2830_v43 }
 0xd0a   :  { %4454 = vmatprep.subr.bf16.mxu0 %v5731_v44  ;;  %v5891_v62 = vcombine.high %v2940_v59, %v2956_v60  ;;  %v5890_v0 = vcombine.low %v2940_v59, %v2956_v60  ;;  %v2815_v44 = vld [vmem:[#allocation44 + $0x218] sm:$0xff] }
 0xd0b   :  { %v5769_v48 = vcombine.high %v2815_v44, %v2831_v45 }
 0xd0d   :  { %4455 = vmatpush1.bf16.msra.mxu0 %v5730_v47  ;;  %v5736_v47 = vcombine.low %v2783_v36, %v2799_v37 }
 0xd0e   :  { %4456 = vmatprep.subr.bf16.mxu0 %v5763_v33  ;;  %v5767_v33 = vcombine.high %v2814_v42, %v2830_v43  ;;  %v2785_v42 = vld [vmem:[#allocation44 + $0x128] sm:$0xff] }
 0xd0f   :  { %v2801_v43 = vld [vmem:[#allocation44 + $0x1a8] sm:$0xff] }
 0xd11   :  { %4457 = vmatpush1.bf16.msra.mxu0 %v5762_v50  ;;  %v2862_v50 = vld [vmem:[#allocation44 + $0x390] sm:$0xff] }
 0xd12   :  { %4458 = vmatprep.subr.bf16.mxu0 %v5795_v51  ;;  %v2847_v51 = vld [vmem:[#allocation44 + $0x318] sm:$0xff]  ;;  %v5798_v59 = vcombine.low %v2846_v49, %v2862_v50 }
 0xd13   :  { %v5801_v54 = vcombine.high %v2847_v51, %v2863_v6  ;;  %v5800_v60 = vcombine.low %v2847_v51, %v2863_v6  ;;  %v5740_v6 = vcombine.low %v2785_v42, %v2801_v43 }
 0xd15   :  { %4459 = vmatpush1.bf16.msra.mxu0 %v5794_v53  ;;  %v5768_v53 = vcombine.low %v2815_v44, %v2831_v45 }
 0xd16   :  { %4460 = vmatprep.subr.bf16.mxu0 %v5827_v10  ;;  %v5799_v10 = vcombine.high %v2846_v49, %v2862_v50  ;;  %v2817_v49 = vld [vmem:[#allocation44 + $0x228] sm:$0xff] }
 0xd17   :  { %v2833_v50 = vld [vmem:[#allocation44 + $0x2a8] sm:$0xff] }
 0xd19   :  { %4461 = vmatpush1.bf16.msra.mxu0 %v5826_v57  ;;  %v2894_v57 = vld [vmem:[#allocation44 + $0x490] sm:$0xff] }
 0xd1a   :  { %4462 = vmatprep.subr.bf16.mxu0 %v5859_v56  ;;  %v2879_v56 = vld [vmem:[#allocation44 + $0x418] sm:$0xff]  ;;  %v5831_v61 = vcombine.high %v2878_v55, %v2894_v57  ;;  %v5830_v7 = vcombine.low %v2878_v55, %v2894_v57  ;;  %v2849_v55 = vld [vmem:[#allocation44 + $0x328] sm:$0xff] }
 0xd1b   :  { %v2865_v57 = vld [vmem:[#allocation44 + $0x3a8] sm:$0xff] }
 0xd1d   :  { %4463 = vmatpush1.bf16.msra.mxu0 %v5858_v58  ;;  %v2895_v58 = vld [vmem:[#allocation44 + $0x498] sm:$0xff] }
 0xd1e   :  { %4464 = vmatprep.subr.bf16.mxu0 %v5891_v62  ;;  %v5833_v62 = vcombine.high %v2879_v56, %v2895_v58  ;;  %v5832_v8 = vcombine.low %v2879_v56, %v2895_v58  ;;  %v5772_v58 = vcombine.low %v2817_v49, %v2833_v50 }
 0xd21   :  { %4465 = vmatpush1.bf16.msra.mxu0 %v5890_v0  ;;  %v2926_v0 = vld [vmem:[#allocation44 + $0x590] sm:$0xff] }
 0xd22   :  { %4466 = vmatprep.subr.bf16.mxu0 %v5923_v11  ;;  %v5863_v9 = vcombine.high %v2910_v63, %v2926_v0  ;;  %v5865_v11 = vcombine.high %v2911_v4, %v2927_v5  ;;  %v5862_v17 = vcombine.low %v2910_v63, %v2926_v0  ;;  %v2881_v63 = vld [vmem:[#allocation44 + $0x428] sm:$0xff]  ;;  %v5804_v5 = vcombine.low %v2849_v55, %v2865_v57 }
 0xd23   :  { %v2897_v0 = vld [vmem:[#allocation44 + $0x4a8] sm:$0xff] }
 0xd25   :  { %4467 = vmatpush1.bf16.msra.mxu0 %v5922_v13  ;;  %v2958_v13 = vld [vmem:[#allocation44 + $0x690] sm:$0xff] }
 0xd26   :  { %4534 = vmatprep.subr.bf16.mxu0 %v5703_v20  ;;  %v5895_v19 = vcombine.high %v2942_v12, %v2958_v13  ;;  %v5897_v20 = vcombine.high %v2943_v14, %v2959_v16 }
 0xddb   :  { %v6029_v26 = vpop.f32.mrb[24].mxu0 }
 0xddc   :  { %v6030_v28 = vpop.f32.mrb[25].mxu0 }
 0xddd   :  { %v6031_v29 = vadd.f32 %v6030_v28, %v6029_v26  ;;  %v6032_v30 = vpop.f32.mrb[26].mxu0  ;;  %v5894_v26 = vcombine.low %v2942_v12, %v2958_v13  ;;  %v2913_v12 = vld [vmem:[#allocation44 + $0x528] sm:$0xff] }
 0xdde   :  { %v6033_v31 = vpop.f32.mrb[27].mxu0  ;;  %v2752_v30 = vld [vmem:[#allocation44 + $0x20] sm:$0xff]  ;;  %v2929_v13 = vld [vmem:[#allocation44 + $0x5a8] sm:$0xff] }
 0xddf   :  { %v2741_v32 = vadd.f32 %v6031_v29, %v5681_v27  ;;  %v5896_v27 = vcombine.low %v2943_v14, %v2959_v16  ;;  %v2768_v31 = vld [vmem:[#allocation44 + $0xa0] sm:$0xff]  ;;  %v5836_v16 = vcombine.low %v2881_v63, %v2897_v0 }
 0xde0   :  { %v5707_v37 = vcombine.high %v2752_v30, %v2768_v31  ;;  %v5706_v44 = vcombine.low %v2752_v30, %v2768_v31  ;;  %v2977_v30 = vld [vmem:[#allocation44 + $0x728] sm:$0xff] }
 0xde1   :  { %v2746_v38 = vmax.f32 %v2741_v32, 0.0  ;;  %v2753_v32 = vld [vmem:[#allocation44 + $0x28] sm:$0xff] }
 0xde2   :  { %v5708_v45 = vcombine.low %v2753_v32, %v2769_v34  ;;  %v2993_v31 = vld [vmem:[#allocation44 + $0x7a8] sm:$0xff] }
 0xde3   :  { %v7645_v39 = vpack.c.bf16 %v2746_v38, %v2746_v38  ;;  %v5709_v38 = vcombine.high %v2753_v32, %v2769_v34 }
 0xde5   :  { %4485 = vmatmul.mubr.bf16.vlgmr.msra.gmra.mrb[28].mxu0 %v7645_v39  ;;  %4526 = vmatmul.mubr.bf16.vlgmr.msra.gmra.mrb[24].mxu1 %v7645_v39 }
 0xde6   :  { %4535 = vmatpush1.bf16.msra.mxu0 %v5702_v22  ;;  %4576 = vmatpush1.bf16.msra.mxu1 %v5704_v23  ;;  %v2990_v22 = vld [vmem:[#allocation44 + $0x790] sm:$0xff]  ;;  %v2975_v23 = vld [vmem:[#allocation44 + $0x718] sm:$0xff] }
 0xde7   :  { %4536 = vmatprep.subr.bf16.mxu0 %v5735_v40  ;;  %4577 = vmatprep.subr.bf16.mxu1 %v5737_v41  ;;  %v5927_v28 = vcombine.high %v2974_v21, %v2990_v22  ;;  %v5929_v29 = vcombine.high %v2975_v23, %v2991_v24  ;;  %v5926_v35 = vcombine.low %v2974_v21, %v2990_v22  ;;  %v2784_v40 = vld [vmem:[#allocation44 + $0x120] sm:$0xff]  ;;  %v2945_v21 = vld [vmem:[#allocation44 + $0x628] sm:$0xff] }
 0xde8   :  { %4566 = vmatprep.mubr.bf16.mxu0 %v7202_v25  ;;  %4607 = vmatprep.mubr.bf16.mxu1 %v7202_v25  ;;  %v5928_v36 = vcombine.low %v2975_v23, %v2991_v24  ;;  %v2800_v41 = vld [vmem:[#allocation44 + $0x1a0] sm:$0xff]  ;;  %v2961_v22 = vld [vmem:[#allocation44 + $0x6a8] sm:$0xff]  ;;  %v5868_v24 = vcombine.low %v2913_v12, %v2929_v13 }
 0xde9   :  { %v5738_v51 = vcombine.low %v2784_v40, %v2800_v41  ;;  %v5900_v34 = vcombine.low %v2945_v21, %v2961_v22 }
 0xdea   :  { %4537 = vmatpush1.bf16.msra.mxu0 %v5734_v46  ;;  %4578 = vmatpush1.bf16.msra.mxu1 %v5736_v47  ;;  %v5739_v46 = vcombine.high %v2784_v40, %v2800_v41  ;;  %v5741_v47 = vcombine.high %v2785_v42, %v2801_v43  ;;  %v2755_v40 = vld [vmem:[#allocation44 + $0x38] sm:$0xff]  ;;  %v5932_v43 = vcombine.low %v2977_v30, %v2993_v31 }
 0xdeb   :  { %4538 = vmatprep.subr.bf16.mxu0 %v5767_v33  ;;  %4579 = vmatprep.subr.bf16.mxu1 %v5769_v48  ;;  %v2816_v33 = vld [vmem:[#allocation44 + $0x220] sm:$0xff]  ;;  %v2771_v41 = vld [vmem:[#allocation44 + $0xb8] sm:$0xff] }
 0xdec   :  { %v2832_v48 = vld [vmem:[#allocation44 + $0x2a0] sm:$0xff] }
 0xded   :  { %v5770_v56 = vcombine.low %v2816_v33, %v2832_v48 }
 0xdee   :  { %4539 = vmatpush1.bf16.msra.mxu0 %v5766_v52  ;;  %4580 = vmatpush1.bf16.msra.mxu1 %v5768_v53  ;;  %v5771_v52 = vcombine.high %v2816_v33, %v2832_v48  ;;  %v5773_v53 = vcombine.high %v2817_v49, %v2833_v50  ;;  %v2787_v33 = vld [vmem:[#allocation44 + $0x138] sm:$0xff]  ;;  %v5712_v50 = vcombine.low %v2755_v40, %v2771_v41 }
 0xdef   :  { %4540 = vmatprep.subr.bf16.mxu0 %v5799_v10  ;;  %4581 = vmatprep.subr.bf16.mxu1 %v5801_v54  ;;  %v2848_v10 = vld [vmem:[#allocation44 + $0x320] sm:$0xff]  ;;  %v2803_v48 = vld [vmem:[#allocation44 + $0x1b8] sm:$0xff] }
 0xdf0   :  { %v2864_v54 = vld [vmem:[#allocation44 + $0x3a0] sm:$0xff] }
 0xdf1   :  { %v5802_v4 = vcombine.low %v2848_v10, %v2864_v54 }
 0xdf2   :  { %4541 = vmatpush1.bf16.msra.mxu0 %v5798_v59  ;;  %4582 = vmatpush1.bf16.msra.mxu1 %v5800_v60  ;;  %v5803_v59 = vcombine.high %v2848_v10, %v2864_v54  ;;  %v5805_v60 = vcombine.high %v2849_v55, %v2865_v57  ;;  %v2819_v10 = vld [vmem:[#allocation44 + $0x238] sm:$0xff]  ;;  %v5744_v57 = vcombine.low %v2787_v33, %v2803_v48 }
 0xdf3   :  { %4542 = vmatprep.subr.bf16.mxu0 %v5831_v61  ;;  %4583 = vmatprep.subr.bf16.mxu1 %v5833_v62  ;;  %v2880_v61 = vld [vmem:[#allocation44 + $0x420] sm:$0xff]  ;;  %v2835_v54 = vld [vmem:[#allocation44 + $0x2b8] sm:$0xff] }
 0xdf4   :  { %v2896_v62 = vld [vmem:[#allocation44 + $0x4a0] sm:$0xff] }
 0xdf5   :  { %v5834_v14 = vcombine.low %v2880_v61, %v2896_v62 }
 0xdf6   :  { %4543 = vmatpush1.bf16.msra.mxu0 %v5830_v7  ;;  %4584 = vmatpush1.bf16.msra.mxu1 %v5832_v8  ;;  %v5835_v7 = vcombine.high %v2880_v61, %v2896_v62  ;;  %v5837_v8 = vcombine.high %v2881_v63, %v2897_v0  ;;  %v2851_v61 = vld [vmem:[#allocation44 + $0x338] sm:$0xff]  ;;  %v5776_v0 = vcombine.low %v2819_v10, %v2835_v54 }
 0xdf7   :  { %4544 = vmatprep.subr.bf16.mxu0 %v5863_v9  ;;  %4585 = vmatprep.subr.bf16.mxu1 %v5865_v11  ;;  %v2912_v9 = vld [vmem:[#allocation44 + $0x520] sm:$0xff]  ;;  %v2867_v62 = vld [vmem:[#allocation44 + $0x3b8] sm:$0xff] }
 0xdf8   :  { %v2928_v11 = vld [vmem:[#allocation44 + $0x5a0] sm:$0xff] }
 0xdf9   :  { %v5866_v23 = vcombine.low %v2912_v9, %v2928_v11 }
 0xdfa   :  { %4545 = vmatpush1.bf16.msra.mxu0 %v5862_v17  ;;  %4586 = vmatpush1.bf16.msra.mxu1 %v5864_v18  ;;  %v5867_v17 = vcombine.high %v2912_v9, %v2928_v11  ;;  %v5869_v18 = vcombine.high %v2913_v12, %v2929_v13  ;;  %v2883_v9 = vld [vmem:[#allocation44 + $0x438] sm:$0xff]  ;;  %v5808_v13 = vcombine.low %v2851_v61, %v2867_v62 }
 0xdfb   :  { %4546 = vmatprep.subr.bf16.mxu0 %v5895_v19  ;;  %4587 = vmatprep.subr.bf16.mxu1 %v5897_v20  ;;  %v2944_v19 = vld [vmem:[#allocation44 + $0x620] sm:$0xff]  ;;  %v2899_v11 = vld [vmem:[#allocation44 + $0x4b8] sm:$0xff] }
 0xdfc   :  { %v2960_v20 = vld [vmem:[#allocation44 + $0x6a0] sm:$0xff] }
 0xdfd   :  { %v5898_v32 = vcombine.low %v2944_v19, %v2960_v20 }
 0xdfe   :  { %4547 = vmatpush1.bf16.msra.mxu0 %v5894_v26  ;;  %4588 = vmatpush1.bf16.msra.mxu1 %v5896_v27  ;;  %v5899_v26 = vcombine.high %v2944_v19, %v2960_v20  ;;  %v5901_v27 = vcombine.high %v2945_v21, %v2961_v22  ;;  %v2915_v19 = vld [vmem:[#allocation44 + $0x538] sm:$0xff]  ;;  %v5840_v22 = vcombine.low %v2883_v9, %v2899_v11 }
 0xdff   :  { %4548 = vmatprep.subr.bf16.mxu0 %v5927_v28  ;;  %4589 = vmatprep.subr.bf16.mxu1 %v5929_v29  ;;  %v2976_v28 = vld [vmem:[#allocation44 + $0x720] sm:$0xff]  ;;  %v2931_v20 = vld [vmem:[#allocation44 + $0x5b8] sm:$0xff] }
 0xe00   :  { %v2992_v29 = vld [vmem:[#allocation44 + $0x7a0] sm:$0xff] }
 0xe01   :  { %v5930_v42 = vcombine.low %v2976_v28, %v2992_v29 }
 0xe02   :  { %4549 = vmatpush1.bf16.msra.mxu0 %v5926_v35  ;;  %4590 = vmatpush1.bf16.msra.mxu1 %v5928_v36  ;;  %v5931_v35 = vcombine.high %v2976_v28, %v2992_v29  ;;  %v5933_v36 = vcombine.high %v2977_v30, %v2993_v31  ;;  %v2947_v28 = vld [vmem:[#allocation44 + $0x638] sm:$0xff]  ;;  %v5872_v31 = vcombine.low %v2915_v19, %v2931_v20 }
 0xe03   :  { %4616 = vmatprep.subr.bf16.mxu0 %v5707_v37  ;;  %4657 = vmatprep.subr.bf16.mxu1 %v5709_v38  ;;  %v2754_v37 = vld [vmem:[#allocation44 + $0x30] sm:$0xff]  ;;  %v2963_v29 = vld [vmem:[#allocation44 + $0x6b8] sm:$0xff] }
 0xe04   :  { %v2770_v38 = vld [vmem:[#allocation44 + $0xb0] sm:$0xff] }
 0xe05   :  { %4567 = vmatmul.mubr.bf16.vlgmr.msra.gmra.mrb[32].mxu0 %v7645_v39  ;;  %4608 = vmatmul.mubr.bf16.vlgmr.msra.gmra.mrb[28].mxu1 %v7645_v39  ;;  %v5710_v49 = vcombine.low %v2754_v37, %v2770_v38 }
 0xe06   :  { %4617 = vmatpush1.bf16.msra.mxu0 %v5706_v44  ;;  %4658 = vmatpush1.bf16.msra.mxu1 %v5708_v45  ;;  %v5711_v44 = vcombine.high %v2754_v37, %v2770_v38  ;;  %v5713_v45 = vcombine.high %v2755_v40, %v2771_v41  ;;  %v2979_v37 = vld [vmem:[#allocation44 + $0x738] sm:$0xff]  ;;  %v5904_v41 = vcombine.low %v2947_v28, %v2963_v29 }
 0xe07   :  { %4618 = vmatprep.subr.bf16.mxu0 %v5739_v46  ;;  %4659 = vmatprep.subr.bf16.mxu1 %v5741_v47  ;;  %v2786_v46 = vld [vmem:[#allocation44 + $0x130] sm:$0xff]  ;;  %v2995_v38 = vld [vmem:[#allocation44 + $0x7b8] sm:$0xff] }
 0xe08   :  { %4648 = vmatprep.mubr.bf16.mxu0 %v7202_v25  ;;  %4689 = vmatprep.mubr.bf16.mxu1 %v7202_v25  ;;  %v2802_v47 = vld [vmem:[#allocation44 + $0x1b0] sm:$0xff] }
 0xe09   :  { %v5742_v55 = vcombine.low %v2786_v46, %v2802_v47 }
 0xe0a   :  { %4619 = vmatpush1.bf16.msra.mxu0 %v5738_v51  ;;  %4660 = vmatpush1.bf16.msra.mxu1 %v5740_v6  ;;  %v5743_v51 = vcombine.high %v2786_v46, %v2802_v47  ;;  %v5745_v6 = vcombine.high %v2787_v33, %v2803_v48  ;;  %v2757_v46 = vld [vmem:[#allocation44 + $0x48] sm:$0xff]  ;;  %v5936_v48 = vcombine.low %v2979_v37, %v2995_v38 }
 0xe0b   :  { %4620 = vmatprep.subr.bf16.mxu0 %v5771_v52  ;;  %4661 = vmatprep.subr.bf16.mxu1 %v5773_v53  ;;  %v2818_v52 = vld [vmem:[#allocation44 + $0x230] sm:$0xff]  ;;  %v2773_v47 = vld [vmem:[#allocation44 + $0xc8] sm:$0xff] }
 0xe0c   :  { %v2834_v53 = vld [vmem:[#allocation44 + $0x2b0] sm:$0xff] }
 0xe0d   :  { %v5774_v63 = vcombine.low %v2818_v52, %v2834_v53 }
 0xe0e   :  { %4621 = vmatpush1.bf16.msra.mxu0 %v5770_v56  ;;  %4662 = vmatpush1.bf16.msra.mxu1 %v5772_v58  ;;  %v5775_v56 = vcombine.high %v2818_v52, %v2834_v53  ;;  %v5777_v58 = vcombine.high %v2819_v10, %v2835_v54  ;;  %v2789_v52 = vld [vmem:[#allocation44 + $0x148] sm:$0xff]  ;;  %v5716_v54 = vcombine.low %v2757_v46, %v2773_v47 }
 0xe0f   :  { %4622 = vmatprep.subr.bf16.mxu0 %v5803_v59  ;;  %4663 = vmatprep.subr.bf16.mxu1 %v5805_v60  ;;  %v2850_v59 = vld [vmem:[#allocation44 + $0x330] sm:$0xff]  ;;  %v2805_v53 = vld [vmem:[#allocation44 + $0x1c8] sm:$0xff] }
 0xe10   :  { %v2866_v60 = vld [vmem:[#allocation44 + $0x3b0] sm:$0xff] }
 0xe11   :  { %v5806_v12 = vcombine.low %v2850_v59, %v2866_v60 }
 0xe12   :  { %4623 = vmatpush1.bf16.msra.mxu0 %v5802_v4  ;;  %4664 = vmatpush1.bf16.msra.mxu1 %v5804_v5  ;;  %v5807_v4 = vcombine.high %v2850_v59, %v2866_v60  ;;  %v5809_v5 = vcombine.high %v2851_v61, %v2867_v62  ;;  %v2821_v59 = vld [vmem:[#allocation44 + $0x248] sm:$0xff]  ;;  %v5748_v62 = vcombine.low %v2789_v52, %v2805_v53 }
 0xe13   :  { %4624 = vmatprep.subr.bf16.mxu0 %v5835_v7  ;;  %4665 = vmatprep.subr.bf16.mxu1 %v5837_v8  ;;  %v2882_v7 = vld [vmem:[#allocation44 + $0x430] sm:$0xff]  ;;  %v2837_v60 = vld [vmem:[#allocation44 + $0x2c8] sm:$0xff] }
 0xe14   :  { %v2898_v8 = vld [vmem:[#allocation44 + $0x4b0] sm:$0xff] }
 0xe15   :  { %v5838_v21 = vcombine.low %v2882_v7, %v2898_v8 }
 0xe16   :  { %4625 = vmatpush1.bf16.msra.mxu0 %v5834_v14  ;;  %4666 = vmatpush1.bf16.msra.mxu1 %v5836_v16  ;;  %v5839_v14 = vcombine.high %v2882_v7, %v2898_v8  ;;  %v5841_v16 = vcombine.high %v2883_v9, %v2899_v11  ;;  %v2853_v7 = vld [vmem:[#allocation44 + $0x348] sm:$0xff]  ;;  %v5780_v11 = vcombine.low %v2821_v59, %v2837_v60 }
 0xe17   :  { %4626 = vmatprep.subr.bf16.mxu0 %v5867_v17  ;;  %4667 = vmatprep.subr.bf16.mxu1 %v5869_v18  ;;  %v2914_v17 = vld [vmem:[#allocation44 + $0x530] sm:$0xff]  ;;  %v2869_v8 = vld [vmem:[#allocation44 + $0x3c8] sm:$0xff] }
 0xe18   :  { %v2930_v18 = vld [vmem:[#allocation44 + $0x5b0] sm:$0xff] }
 0xe19   :  { %v5870_v30 = vcombine.low %v2914_v17, %v2930_v18 }
 0xe1a   :  { %4627 = vmatpush1.bf16.msra.mxu0 %v5866_v23  ;;  %4668 = vmatpush1.bf16.msra.mxu1 %v5868_v24  ;;  %v5871_v23 = vcombine.high %v2914_v17, %v2930_v18  ;;  %v5873_v24 = vcombine.high %v2915_v19, %v2931_v20  ;;  %v2885_v17 = vld [vmem:[#allocation44 + $0x448] sm:$0xff]  ;;  %v5812_v20 = vcombine.low %v2853_v7, %v2869_v8 }
 0xe1b   :  { %4628 = vmatprep.subr.bf16.mxu0 %v5899_v26  ;;  %4669 = vmatprep.subr.bf16.mxu1 %v5901_v27  ;;  %v2946_v26 = vld [vmem:[#allocation44 + $0x630] sm:$0xff]  ;;  %v2901_v18 = vld [vmem:[#allocation44 + $0x4c8] sm:$0xff] }
 0xe1c   :  { %v2962_v27 = vld [vmem:[#allocation44 + $0x6b0] sm:$0xff] }
 0xe1d   :  { %v5902_v40 = vcombine.low %v2946_v26, %v2962_v27 }
 0xe1e   :  { %4629 = vmatpush1.bf16.msra.mxu0 %v5898_v32  ;;  %4670 = vmatpush1.bf16.msra.mxu1 %v5900_v34  ;;  %v5903_v32 = vcombine.high %v2946_v26, %v2962_v27  ;;  %v5905_v34 = vcombine.high %v2947_v28, %v2963_v29  ;;  %v2917_v26 = vld [vmem:[#allocation44 + $0x548] sm:$0xff]  ;;  %v5844_v29 = vcombine.low %v2885_v17, %v2901_v18 }
 0xe1f   :  { %4630 = vmatprep.subr.bf16.mxu0 %v5931_v35  ;;  %4671 = vmatprep.subr.bf16.mxu1 %v5933_v36  ;;  %v2978_v35 = vld [vmem:[#allocation44 + $0x730] sm:$0xff]  ;;  %v2933_v27 = vld [vmem:[#allocation44 + $0x5c8] sm:$0xff] }
 0xe20   :  { %v2994_v36 = vld [vmem:[#allocation44 + $0x7b0] sm:$0xff] }
 0xe21   :  { %v5934_v33 = vcombine.low %v2978_v35, %v2994_v36 }
 0xe22   :  { %4631 = vmatpush1.bf16.msra.mxu0 %v5930_v42  ;;  %4672 = vmatpush1.bf16.msra.mxu1 %v5932_v43  ;;  %v5935_v42 = vcombine.high %v2978_v35, %v2994_v36  ;;  %v5937_v43 = vcombine.high %v2979_v37, %v2995_v38  ;;  %v2949_v35 = vld [vmem:[#allocation44 + $0x648] sm:$0xff]  ;;  %v5876_v38 = vcombine.low %v2917_v26, %v2933_v27 }
 0xe23   :  { %4698 = vmatprep.subr.bf16.mxu0 %v5711_v44  ;;  %4739 = vmatprep.subr.bf16.mxu1 %v5713_v45  ;;  %v2756_v44 = vld [vmem:[#allocation44 + $0x40] sm:$0xff]  ;;  %v2965_v36 = vld [vmem:[#allocation44 + $0x6c8] sm:$0xff] }
 0xe24   :  { %v2772_v45 = vld [vmem:[#allocation44 + $0xc0] sm:$0xff] }
 0xe25   :  { %4649 = vmatmul.mubr.bf16.vlgmr.msra.gmra.mrb[36].mxu0 %v7645_v39  ;;  %4690 = vmatmul.mubr.bf16.vlgmr.msra.gmra.mrb[32].mxu1 %v7645_v39  ;;  %v5714_v10 = vcombine.low %v2756_v44, %v2772_v45 }
 0xe26   :  { %4699 = vmatpush1.bf16.msra.mxu0 %v5710_v49  ;;  %4740 = vmatpush1.bf16.msra.mxu1 %v5712_v50  ;;  %v5715_v49 = vcombine.high %v2756_v44, %v2772_v45  ;;  %v5717_v50 = vcombine.high %v2757_v46, %v2773_v47  ;;  %v2981_v44 = vld [vmem:[#allocation44 + $0x748] sm:$0xff]  ;;  %v5908_v47 = vcombine.low %v2949_v35, %v2965_v36 }
 0xe27   :  { %4700 = vmatprep.subr.bf16.mxu0 %v5743_v51  ;;  %4741 = vmatprep.subr.bf16.mxu1 %v5745_v6  ;;  %v2788_v51 = vld [vmem:[#allocation44 + $0x140] sm:$0xff]  ;;  %v2997_v45 = vld [vmem:[#allocation44 + $0x7c8] sm:$0xff] }
 0xe28   :  { %4730 = vmatprep.mubr.bf16.mxu0 %v7202_v25  ;;  %4771 = vmatprep.mubr.bf16.mxu1 %v7202_v25  ;;  %v2804_v6 = vld [vmem:[#allocation44 + $0x1c0] sm:$0xff] }
 0xe29   :  { %v5746_v61 = vcombine.low %v2788_v51, %v2804_v6 }
 0xe2a   :  { %4701 = vmatpush1.bf16.msra.mxu0 %v5742_v55  ;;  %4742 = vmatpush1.bf16.msra.mxu1 %v5744_v57  ;;  %v5747_v55 = vcombine.high %v2788_v51, %v2804_v6  ;;  %v5749_v57 = vcombine.high %v2789_v52, %v2805_v53  ;;  %v2759_v51 = vld [vmem:[#allocation44 + $0x58] sm:$0xff]  ;;  %v5940_v53 = vcombine.low %v2981_v44, %v2997_v45 }
 0xe2b   :  { %4702 = vmatprep.subr.bf16.mxu0 %v5775_v56  ;;  %4743 = vmatprep.subr.bf16.mxu1 %v5777_v58  ;;  %v2820_v56 = vld [vmem:[#allocation44 + $0x240] sm:$0xff]  ;;  %v2775_v6 = vld [vmem:[#allocation44 + $0xd8] sm:$0xff] }
 0xe2c   :  { %v2836_v58 = vld [vmem:[#allocation44 + $0x2c0] sm:$0xff] }
 0xe2d   :  { %v5778_v9 = vcombine.low %v2820_v56, %v2836_v58 }
 0xe2e   :  { %4703 = vmatpush1.bf16.msra.mxu0 %v5774_v63  ;;  %4744 = vmatpush1.bf16.msra.mxu1 %v5776_v0  ;;  %v5779_v63 = vcombine.high %v2820_v56, %v2836_v58  ;;  %v5781_v0 = vcombine.high %v2821_v59, %v2837_v60  ;;  %v2791_v56 = vld [vmem:[#allocation44 + $0x158] sm:$0xff]  ;;  %v5720_v60 = vcombine.low %v2759_v51, %v2775_v6 }
 0xe2f   :  { %4704 = vmatprep.subr.bf16.mxu0 %v5807_v4  ;;  %4745 = vmatprep.subr.bf16.mxu1 %v5809_v5  ;;  %v2852_v4 = vld [vmem:[#allocation44 + $0x340] sm:$0xff]  ;;  %v2807_v58 = vld [vmem:[#allocation44 + $0x1d8] sm:$0xff] }
 0xe30   :  { %v2868_v5 = vld [vmem:[#allocation44 + $0x3c0] sm:$0xff] }
 0xe31   :  { %v5810_v19 = vcombine.low %v2852_v4, %v2868_v5 }
 0xe32   :  { %4705 = vmatpush1.bf16.msra.mxu0 %v5806_v12  ;;  %4746 = vmatpush1.bf16.msra.mxu1 %v5808_v13  ;;  %v5811_v12 = vcombine.high %v2852_v4, %v2868_v5  ;;  %v5813_v13 = vcombine.high %v2853_v7, %v2869_v8  ;;  %v2823_v4 = vld [vmem:[#allocation44 + $0x258] sm:$0xff]  ;;  %v5752_v8 = vcombine.low %v2791_v56, %v2807_v58 }
 0xe33   :  { %4706 = vmatprep.subr.bf16.mxu0 %v5839_v14  ;;  %4747 = vmatprep.subr.bf16.mxu1 %v5841_v16  ;;  %v2884_v14 = vld [vmem:[#allocation44 + $0x440] sm:$0xff]  ;;  %v2839_v5 = vld [vmem:[#allocation44 + $0x2d8] sm:$0xff] }
 0xe34   :  { %v2900_v16 = vld [vmem:[#allocation44 + $0x4c0] sm:$0xff] }
 0xe35   :  { %v5842_v28 = vcombine.low %v2884_v14, %v2900_v16 }
 0xe36   :  { %4707 = vmatpush1.bf16.msra.mxu0 %v5838_v21  ;;  %4748 = vmatpush1.bf16.msra.mxu1 %v5840_v22  ;;  %v5843_v21 = vcombine.high %v2884_v14, %v2900_v16  ;;  %v5845_v22 = vcombine.high %v2885_v17, %v2901_v18  ;;  %v2855_v14 = vld [vmem:[#allocation44 + $0x358] sm:$0xff]  ;;  %v5784_v18 = vcombine.low %v2823_v4, %v2839_v5 }
 0xe37   :  { %4708 = vmatprep.subr.bf16.mxu0 %v5871_v23  ;;  %4749 = vmatprep.subr.bf16.mxu1 %v5873_v24  ;;  %v2916_v23 = vld [vmem:[#allocation44 + $0x540] sm:$0xff]  ;;  %v2871_v16 = vld [vmem:[#allocation44 + $0x3d8] sm:$0xff] }
 0xe38   :  { %v2932_v24 = vld [vmem:[#allocation44 + $0x5c0] sm:$0xff] }
 0xe39   :  { %v5874_v37 = vcombine.low %v2916_v23, %v2932_v24 }
 0xe3a   :  { %4709 = vmatpush1.bf16.msra.mxu0 %v5870_v30  ;;  %4750 = vmatpush1.bf16.msra.mxu1 %v5872_v31  ;;  %v5875_v30 = vcombine.high %v2916_v23, %v2932_v24  ;;  %v5877_v31 = vcombine.high %v2917_v26, %v2933_v27  ;;  %v2887_v23 = vld [vmem:[#allocation44 + $0x458] sm:$0xff]  ;;  %v5816_v27 = vcombine.low %v2855_v14, %v2871_v16 }
 0xe3b   :  { %4710 = vmatprep.subr.bf16.mxu0 %v5903_v32  ;;  %4751 = vmatprep.subr.bf16.mxu1 %v5905_v34  ;;  %v2948_v32 = vld [vmem:[#allocation44 + $0x640] sm:$0xff]  ;;  %v2903_v24 = vld [vmem:[#allocation44 + $0x4d8] sm:$0xff] }
 0xe3c   :  { %v2964_v34 = vld [vmem:[#allocation44 + $0x6c0] sm:$0xff] }
 0xe3d   :  { %v5906_v46 = vcombine.low %v2948_v32, %v2964_v34 }
 0xe3e   :  { %4711 = vmatpush1.bf16.msra.mxu0 %v5902_v40  ;;  %4752 = vmatpush1.bf16.msra.mxu1 %v5904_v41  ;;  %v5907_v40 = vcombine.high %v2948_v32, %v2964_v34  ;;  %v5909_v41 = vcombine.high %v2949_v35, %v2965_v36  ;;  %v2919_v32 = vld [vmem:[#allocation44 + $0x558] sm:$0xff]  ;;  %v5848_v36 = vcombine.low %v2887_v23, %v2903_v24 }
 0xe3f   :  { %4712 = vmatprep.subr.bf16.mxu0 %v5935_v42  ;;  %4753 = vmatprep.subr.bf16.mxu1 %v5937_v43  ;;  %v2980_v42 = vld [vmem:[#allocation44 + $0x740] sm:$0xff]  ;;  %v2935_v34 = vld [vmem:[#allocation44 + $0x5d8] sm:$0xff] }
 0xe40   :  { %v2996_v43 = vld [vmem:[#allocation44 + $0x7c0] sm:$0xff] }
 0xe41   :  { %v5938_v52 = vcombine.low %v2980_v42, %v2996_v43 }
 0xe42   :  { %4713 = vmatpush1.bf16.msra.mxu0 %v5934_v33  ;;  %4754 = vmatpush1.bf16.msra.mxu1 %v5936_v48  ;;  %v5939_v33 = vcombine.high %v2980_v42, %v2996_v43  ;;  %v5941_v48 = vcombine.high %v2981_v44, %v2997_v45  ;;  %v2951_v42 = vld [vmem:[#allocation44 + $0x658] sm:$0xff]  ;;  %v5880_v45 = vcombine.low %v2919_v32, %v2935_v34 }
 0xe43   :  { %4780 = vmatprep.subr.bf16.mxu0 %v5715_v49  ;;  %4821 = vmatprep.subr.bf16.mxu1 %v5717_v50  ;;  %v2758_v49 = vld [vmem:[#allocation44 + $0x50] sm:$0xff]  ;;  %v2967_v43 = vld [vmem:[#allocation44 + $0x6d8] sm:$0xff] }
 0xe44   :  { %v2774_v50 = vld [vmem:[#allocation44 + $0xd0] sm:$0xff] }
 0xe45   :  { %4731 = vmatmul.mubr.bf16.vlgmr.msra.gmra.mrb[40].mxu0 %v7645_v39  ;;  %4772 = vmatmul.mubr.bf16.vlgmr.msra.gmra.mrb[36].mxu1 %v7645_v39  ;;  %v5718_v59 = vcombine.low %v2758_v49, %v2774_v50 }
 0xe46   :  { %4781 = vmatpush1.bf16.msra.mxu0 %v5714_v10  ;;  %4822 = vmatpush1.bf16.msra.mxu1 %v5716_v54  ;;  %v5719_v10 = vcombine.high %v2758_v49, %v2774_v50  ;;  %v5721_v54 = vcombine.high %v2759_v51, %v2775_v6  ;;  %v2983_v49 = vld [vmem:[#allocation44 + $0x758] sm:$0xff]  ;;  %v5912_v6 = vcombine.low %v2951_v42, %v2967_v43 }
 0xe47   :  { %4782 = vmatprep.subr.bf16.mxu0 %v5747_v55  ;;  %4823 = vmatprep.subr.bf16.mxu1 %v5749_v57  ;;  %v2790_v55 = vld [vmem:[#allocation44 + $0x150] sm:$0xff]  ;;  %v2999_v50 = vld [vmem:[#allocation44 + $0x7d8] sm:$0xff] }
 0xe48   :  { %4812 = vmatprep.mubr.bf16.mxu0 %v7202_v25  ;;  %4853 = vmatprep.mubr.bf16.mxu1 %v7202_v25  ;;  %v2806_v57 = vld [vmem:[#allocation44 + $0x1d0] sm:$0xff] }
 0xe49   :  { %v5750_v7 = vcombine.low %v2790_v55, %v2806_v57 }
 0xe4a   :  { %4783 = vmatpush1.bf16.msra.mxu0 %v5746_v61  ;;  %4824 = vmatpush1.bf16.msra.mxu1 %v5748_v62  ;;  %v5751_v61 = vcombine.high %v2790_v55, %v2806_v57  ;;  %v5753_v62 = vcombine.high %v2791_v56, %v2807_v58  ;;  %v2761_v55 = vld [vmem:[#allocation44 + $0x68] sm:$0xff]  ;;  %v5944_v58 = vcombine.low %v2983_v49, %v2999_v50 }
 0xe4b   :  { %4784 = vmatprep.subr.bf16.mxu0 %v5779_v63  ;;  %4825 = vmatprep.subr.bf16.mxu1 %v5781_v0  ;;  %v2822_v63 = vld [vmem:[#allocation44 + $0x250] sm:$0xff]  ;;  %v2777_v57 = vld [vmem:[#allocation44 + $0xe8] sm:$0xff] }
 0xe4c   :  { %v2838_v0 = vld [vmem:[#allocation44 + $0x2d0] sm:$0xff] }
 0xe4d   :  { %v5782_v17 = vcombine.low %v2822_v63, %v2838_v0 }
 0xe4e   :  { %4785 = vmatpush1.bf16.msra.mxu0 %v5778_v9  ;;  %4826 = vmatpush1.bf16.msra.mxu1 %v5780_v11  ;;  %v5783_v9 = vcombine.high %v2822_v63, %v2838_v0  ;;  %v5785_v11 = vcombine.high %v2823_v4, %v2839_v5  ;;  %v2793_v63 = vld [vmem:[#allocation44 + $0x168] sm:$0xff]  ;;  %v5724_v5 = vcombine.low %v2761_v55, %v2777_v57 }
 0xe4f   :  { %4786 = vmatprep.subr.bf16.mxu0 %v5811_v12  ;;  %4827 = vmatprep.subr.bf16.mxu1 %v5813_v13  ;;  %v2854_v12 = vld [vmem:[#allocation44 + $0x350] sm:$0xff]  ;;  %v2809_v0 = vld [vmem:[#allocation44 + $0x1e8] sm:$0xff] }
 0xe50   :  { %v2870_v13 = vld [vmem:[#allocation44 + $0x3d0] sm:$0xff] }
 0xe51   :  { %v5814_v26 = vcombine.low %v2854_v12, %v2870_v13 }
 0xe52   :  { %4787 = vmatpush1.bf16.msra.mxu0 %v5810_v19  ;;  %4828 = vmatpush1.bf16.msra.mxu1 %v5812_v20  ;;  %v5815_v19 = vcombine.high %v2854_v12, %v2870_v13  ;;  %v5817_v20 = vcombine.high %v2855_v14, %v2871_v16  ;;  %v2825_v12 = vld [vmem:[#allocation44 + $0x268] sm:$0xff]  ;;  %v5756_v16 = vcombine.low %v2793_v63, %v2809_v0 }
 0xe53   :  { %4788 = vmatprep.subr.bf16.mxu0 %v5843_v21  ;;  %4829 = vmatprep.subr.bf16.mxu1 %v5845_v22  ;;  %v2886_v21 = vld [vmem:[#allocation44 + $0x450] sm:$0xff]  ;;  %v2841_v13 = vld [vmem:[#allocation44 + $0x2e8] sm:$0xff] }
 0xe54   :  { %v2902_v22 = vld [vmem:[#allocation44 + $0x4d0] sm:$0xff] }
 0xe55   :  { %v5846_v35 = vcombine.low %v2886_v21, %v2902_v22 }
 0xe56   :  { %4789 = vmatpush1.bf16.msra.mxu0 %v5842_v28  ;;  %4830 = vmatpush1.bf16.msra.mxu1 %v5844_v29  ;;  %v5847_v28 = vcombine.high %v2886_v21, %v2902_v22  ;;  %v5849_v29 = vcombine.high %v2887_v23, %v2903_v24  ;;  %v2857_v21 = vld [vmem:[#allocation44 + $0x368] sm:$0xff]  ;;  %v5788_v24 = vcombine.low %v2825_v12, %v2841_v13 }
 0xe57   :  { %4790 = vmatprep.subr.bf16.mxu0 %v5875_v30  ;;  %4831 = vmatprep.subr.bf16.mxu1 %v5877_v31  ;;  %v2918_v30 = vld [vmem:[#allocation44 + $0x550] sm:$0xff]  ;;  %v2873_v22 = vld [vmem:[#allocation44 + $0x3e8] sm:$0xff] }
 0xe58   :  { %v2934_v31 = vld [vmem:[#allocation44 + $0x5d0] sm:$0xff] }
 0xe59   :  { %v5878_v44 = vcombine.low %v2918_v30, %v2934_v31 }
 0xe5a   :  { %4791 = vmatpush1.bf16.msra.mxu0 %v5874_v37  ;;  %4832 = vmatpush1.bf16.msra.mxu1 %v5876_v38  ;;  %v5879_v37 = vcombine.high %v2918_v30, %v2934_v31  ;;  %v5881_v38 = vcombine.high %v2919_v32, %v2935_v34  ;;  %v2889_v30 = vld [vmem:[#allocation44 + $0x468] sm:$0xff]  ;;  %v5820_v34 = vcombine.low %v2857_v21, %v2873_v22 }
 0xe5b   :  { %4792 = vmatprep.subr.bf16.mxu0 %v5907_v40  ;;  %4833 = vmatprep.subr.bf16.mxu1 %v5909_v41  ;;  %v2950_v40 = vld [vmem:[#allocation44 + $0x650] sm:$0xff]  ;;  %v2905_v31 = vld [vmem:[#allocation44 + $0x4e8] sm:$0xff] }
 0xe5c   :  { %v2966_v41 = vld [vmem:[#allocation44 + $0x6d0] sm:$0xff] }
 0xe5d   :  { %v5910_v51 = vcombine.low %v2950_v40, %v2966_v41 }
 0xe5e   :  { %4793 = vmatpush1.bf16.msra.mxu0 %v5906_v46  ;;  %4834 = vmatpush1.bf16.msra.mxu1 %v5908_v47  ;;  %v5911_v46 = vcombine.high %v2950_v40, %v2966_v41  ;;  %v5913_v47 = vcombine.high %v2951_v42, %v2967_v43  ;;  %v2921_v40 = vld [vmem:[#allocation44 + $0x568] sm:$0xff]  ;;  %v5852_v43 = vcombine.low %v2889_v30, %v2905_v31 }
 0xe5f   :  { %4794 = vmatprep.subr.bf16.mxu0 %v5939_v33  ;;  %4835 = vmatprep.subr.bf16.mxu1 %v5941_v48  ;;  %v2982_v33 = vld [vmem:[#allocation44 + $0x750] sm:$0xff]  ;;  %v2937_v41 = vld [vmem:[#allocation44 + $0x5e8] sm:$0xff] }
 0xe60   :  { %v2998_v48 = vld [vmem:[#allocation44 + $0x7d0] sm:$0xff] }
 0xe61   :  { %v5942_v56 = vcombine.low %v2982_v33, %v2998_v48 }
 0xe62   :  { %4795 = vmatpush1.bf16.msra.mxu0 %v5938_v52  ;;  %4836 = vmatpush1.bf16.msra.mxu1 %v5940_v53  ;;  %v5943_v52 = vcombine.high %v2982_v33, %v2998_v48  ;;  %v5945_v53 = vcombine.high %v2983_v49, %v2999_v50  ;;  %v2953_v33 = vld [vmem:[#allocation44 + $0x668] sm:$0xff]  ;;  %v5884_v50 = vcombine.low %v2921_v40, %v2937_v41 }
 0xe63   :  { %4862 = vmatprep.subr.bf16.mxu0 %v5719_v10  ;;  %4903 = vmatprep.subr.bf16.mxu1 %v5721_v54  ;;  %v2760_v10 = vld [vmem:[#allocation44 + $0x60] sm:$0xff]  ;;  %v2969_v48 = vld [vmem:[#allocation44 + $0x6e8] sm:$0xff] }
 0xe64   :  { %v2776_v54 = vld [vmem:[#allocation44 + $0xe0] sm:$0xff] }
 0xe65   :  { %4813 = vmatmul.mubr.bf16.vlgmr.msra.gmra.mrb[44].mxu0 %v7645_v39  ;;  %4854 = vmatmul.mubr.bf16.vlgmr.msra.gmra.mrb[40].mxu1 %v7645_v39  ;;  %v5722_v4 = vcombine.low %v2760_v10, %v2776_v54 }
 0xe66   :  { %4863 = vmatpush1.bf16.msra.mxu0 %v5718_v59  ;;  %4904 = vmatpush1.bf16.msra.mxu1 %v5720_v60  ;;  %v5723_v59 = vcombine.high %v2760_v10, %v2776_v54  ;;  %v5725_v60 = vcombine.high %v2761_v55, %v2777_v57  ;;  %v2985_v10 = vld [vmem:[#allocation44 + $0x768] sm:$0xff]  ;;  %v5916_v57 = vcombine.low %v2953_v33, %v2969_v48 }
 0xe67   :  { %4864 = vmatprep.subr.bf16.mxu0 %v5751_v61  ;;  %4905 = vmatprep.subr.bf16.mxu1 %v5753_v62  ;;  %v2792_v61 = vld [vmem:[#allocation44 + $0x160] sm:$0xff]  ;;  %v3001_v54 = vld [vmem:[#allocation44 + $0x7e8] sm:$0xff] }
 0xe68   :  { %4894 = vmatprep.mubr.bf16.mxu0 %v7202_v25  ;;  %4935 = vmatprep.mubr.bf16.mxu1 %v7202_v25  ;;  %v2808_v62 = vld [vmem:[#allocation44 + $0x1e0] sm:$0xff] }
 0xe69   :  { %v5754_v14 = vcombine.low %v2792_v61, %v2808_v62 }
 0xe6a   :  { %4865 = vmatpush1.bf16.msra.mxu0 %v5750_v7  ;;  %4906 = vmatpush1.bf16.msra.mxu1 %v5752_v8  ;;  %v5755_v7 = vcombine.high %v2792_v61, %v2808_v62  ;;  %v5757_v8 = vcombine.high %v2793_v63, %v2809_v0  ;;  %v2763_v61 = vld [vmem:[#allocation44 + $0x78] sm:$0xff]  ;;  %v5948_v0 = vcombine.low %v2985_v10, %v3001_v54 }
 0xe6b   :  { %4866 = vmatprep.subr.bf16.mxu0 %v5783_v9  ;;  %4907 = vmatprep.subr.bf16.mxu1 %v5785_v11  ;;  %v2824_v9 = vld [vmem:[#allocation44 + $0x260] sm:$0xff]  ;;  %v2779_v62 = vld [vmem:[#allocation44 + $0xf8] sm:$0xff] }
 0xe6c   :  { %v2840_v11 = vld [vmem:[#allocation44 + $0x2e0] sm:$0xff] }
 0xe6d   :  { %v5786_v23 = vcombine.low %v2824_v9, %v2840_v11 }
 0xe6e   :  { %4867 = vmatpush1.bf16.msra.mxu0 %v5782_v17  ;;  %4908 = vmatpush1.bf16.msra.mxu1 %v5784_v18  ;;  %v5787_v17 = vcombine.high %v2824_v9, %v2840_v11  ;;  %v5789_v18 = vcombine.high %v2825_v12, %v2841_v13  ;;  %v2795_v9 = vld [vmem:[#allocation44 + $0x178] sm:$0xff]  ;;  %v5728_v13 = vcombine.low %v2763_v61, %v2779_v62 }
 0xe6f   :  { %4868 = vmatprep.subr.bf16.mxu0 %v5815_v19  ;;  %4909 = vmatprep.subr.bf16.mxu1 %v5817_v20  ;;  %v2856_v19 = vld [vmem:[#allocation44 + $0x360] sm:$0xff]  ;;  %v2811_v11 = vld [vmem:[#allocation44 + $0x1f8] sm:$0xff] }
 0xe70   :  { %v2872_v20 = vld [vmem:[#allocation44 + $0x3e0] sm:$0xff] }
 0xe71   :  { %v5818_v32 = vcombine.low %v2856_v19, %v2872_v20 }
 0xe72   :  { %4869 = vmatpush1.bf16.msra.mxu0 %v5814_v26  ;;  %4910 = vmatpush1.bf16.msra.mxu1 %v5816_v27  ;;  %v5819_v26 = vcombine.high %v2856_v19, %v2872_v20  ;;  %v5821_v27 = vcombine.high %v2857_v21, %v2873_v22  ;;  %v2827_v19 = vld [vmem:[#allocation44 + $0x278] sm:$0xff]  ;;  %v5760_v22 = vcombine.low %v2795_v9, %v2811_v11 }
 0xe73   :  { %4870 = vmatprep.subr.bf16.mxu0 %v5847_v28  ;;  %4911 = vmatprep.subr.bf16.mxu1 %v5849_v29  ;;  %v2888_v28 = vld [vmem:[#allocation44 + $0x460] sm:$0xff]  ;;  %v2843_v20 = vld [vmem:[#allocation44 + $0x2f8] sm:$0xff] }
 0xe74   :  { %v2904_v29 = vld [vmem:[#allocation44 + $0x4e0] sm:$0xff] }
 0xe75   :  { %v5850_v42 = vcombine.low %v2888_v28, %v2904_v29 }
 0xe76   :  { %4871 = vmatpush1.bf16.msra.mxu0 %v5846_v35  ;;  %4912 = vmatpush1.bf16.msra.mxu1 %v5848_v36  ;;  %v5851_v35 = vcombine.high %v2888_v28, %v2904_v29  ;;  %v5853_v36 = vcombine.high %v2889_v30, %v2905_v31  ;;  %v2859_v28 = vld [vmem:[#allocation44 + $0x378] sm:$0xff]  ;;  %v5792_v31 = vcombine.low %v2827_v19, %v2843_v20 }
 0xe77   :  { %4872 = vmatprep.subr.bf16.mxu0 %v5879_v37  ;;  %4913 = vmatprep.subr.bf16.mxu1 %v5881_v38  ;;  %v2920_v37 = vld [vmem:[#allocation44 + $0x560] sm:$0xff]  ;;  %v2875_v29 = vld [vmem:[#allocation44 + $0x3f8] sm:$0xff] }
 0xe78   :  { %v2936_v38 = vld [vmem:[#allocation44 + $0x5e0] sm:$0xff] }
 0xe79   :  { %v5882_v49 = vcombine.low %v2920_v37, %v2936_v38 }
 0xe7a   :  { %4873 = vmatpush1.bf16.msra.mxu0 %v5878_v44  ;;  %4914 = vmatpush1.bf16.msra.mxu1 %v5880_v45  ;;  %v5883_v44 = vcombine.high %v2920_v37, %v2936_v38  ;;  %v5885_v45 = vcombine.high %v2921_v40, %v2937_v41  ;;  %v2891_v37 = vld [vmem:[#allocation44 + $0x478] sm:$0xff]  ;;  %v5824_v41 = vcombine.low %v2859_v28, %v2875_v29 }
 0xe7b   :  { %4874 = vmatprep.subr.bf16.mxu0 %v5911_v46  ;;  %4915 = vmatprep.subr.bf16.mxu1 %v5913_v47  ;;  %v2952_v46 = vld [vmem:[#allocation44 + $0x660] sm:$0xff]  ;;  %v2907_v38 = vld [vmem:[#allocation44 + $0x4f8] sm:$0xff] }
 0xe7c   :  { %v2968_v47 = vld [vmem:[#allocation44 + $0x6e0] sm:$0xff] }
 0xe7d   :  { %v5914_v55 = vcombine.low %v2952_v46, %v2968_v47 }
 0xe7e   :  { %4875 = vmatpush1.bf16.msra.mxu0 %v5910_v51  ;;  %4916 = vmatpush1.bf16.msra.mxu1 %v5912_v6  ;;  %v5915_v51 = vcombine.high %v2952_v46, %v2968_v47  ;;  %v5917_v6 = vcombine.high %v2953_v33, %v2969_v48  ;;  %v2939_v46 = vld [vmem:[#allocation44 + $0x5f8] sm:$0xff]  ;;  %v5856_v33 = vcombine.low %v2891_v37, %v2907_v38  ;;  %v7675_v48 = vld [vmem:[#allocation46] sm:$0xff] }
 0xe7f   :  { %4876 = vmatprep.subr.bf16.mxu0 %v5943_v52  ;;  %4917 = vmatprep.subr.bf16.mxu1 %v5945_v53  ;;  %v2984_v52 = vld [vmem:[#allocation44 + $0x760] sm:$0xff] }
 0xe80   :  { %v3000_v53 = vld [vmem:[#allocation44 + $0x7e0] sm:$0xff] }
 0xe81   :  { %v5946_v63 = vcombine.low %v2984_v52, %v3000_v53 }
 0xe82   :  { %4877 = vmatpush1.bf16.msra.mxu0 %v5942_v56  ;;  %4918 = vmatpush1.bf16.msra.mxu1 %v5944_v58  ;;  %v5947_v56 = vcombine.high %v2984_v52, %v3000_v53  ;;  %v5949_v58 = vcombine.high %v2985_v10, %v3001_v54  ;;  %v2954_v53 = vld [vmem:[#allocation44 + $0x670] sm:$0xff]  ;;  %v2955_v54 = vld [vmem:[#allocation44 + $0x678] sm:$0xff] }
 0xe83   :  { %4944 = vmatprep.subr.bf16.mxu0 %v5723_v59  ;;  %4985 = vmatprep.subr.bf16.mxu1 %v5725_v60  ;;  %v2762_v59 = vld [vmem:[#allocation44 + $0x70] sm:$0xff] }
 0xe84   :  { %v2778_v60 = vld [vmem:[#allocation44 + $0xf0] sm:$0xff] }
 0xe85   :  { %4895 = vmatmul.mubr.bf16.vlgmr.msra.gmra.mrb[48].mxu0 %v7645_v39  ;;  %4936 = vmatmul.mubr.bf16.vlgmr.msra.gmra.mrb[44].mxu1 %v7645_v39  ;;  %v5726_v12 = vcombine.low %v2762_v59, %v2778_v60  ;;  %v2970_v10 = vld [vmem:[#allocation44 + $0x6f0] sm:$0xff] }
 0xe86   :  { %4945 = vmatpush1.bf16.msra.mxu0 %v5722_v4  ;;  %4986 = vmatpush1.bf16.msra.mxu1 %v5724_v5  ;;  %v5727_v4 = vcombine.high %v2762_v59, %v2778_v60  ;;  %v5729_v5 = vcombine.high %v2763_v61, %v2779_v62  ;;  %v3019_v60 = vrot.slane %v7675_v48, %v7546_v2 }
 0xe87   :  { %4946 = vmatprep.subr.bf16.mxu0 %v5755_v7  ;;  %4987 = vmatprep.subr.bf16.mxu1 %v5757_v8  ;;  %v2794_v7 = vld [vmem:[#allocation44 + $0x170] sm:$0xff] }
 0xe88   :  { %4976 = vmatprep.mubr.bf16.mxu0 %v7202_v25  ;;  %5017 = vmatprep.mubr.bf16.mxu1 %v7202_v25  ;;  %v2810_v8 = vld [vmem:[#allocation44 + $0x1f0] sm:$0xff] }
 0xe89   :  { %v5758_v21 = vcombine.low %v2794_v7, %v2810_v8 }
 0xe8a   :  { %4947 = vmatpush1.bf16.msra.mxu0 %v5754_v14  ;;  %4988 = vmatpush1.bf16.msra.mxu1 %v5756_v16  ;;  %v5759_v14 = vcombine.high %v2794_v7, %v2810_v8  ;;  %v5761_v16 = vcombine.high %v2795_v9, %v2811_v11  ;;  %v3002_v8 = vld [vmem:[#allocation44 + $0x7f0] sm:$0xff]  ;;  %v2987_v9 = vld [vmem:[#allocation44 + $0x778] sm:$0xff] }
 0xe8b   :  { %4948 = vmatprep.subr.bf16.mxu0 %v5787_v17  ;;  %4989 = vmatprep.subr.bf16.mxu1 %v5789_v18  ;;  %v2826_v17 = vld [vmem:[#allocation44 + $0x270] sm:$0xff]  ;;  %v3003_v11 = vld [vmem:[#allocation44 + $0x7f8] sm:$0xff] }
 0xe8c   :  { %v2842_v18 = vld [vmem:[#allocation44 + $0x2f0] sm:$0xff] }
 0xe8d   :  { %v5790_v30 = vcombine.low %v2826_v17, %v2842_v18 }
 0xe8e   :  { %4949 = vmatpush1.bf16.msra.mxu0 %v5786_v23  ;;  %4990 = vmatpush1.bf16.msra.mxu1 %v5788_v24  ;;  %v5791_v23 = vcombine.high %v2826_v17, %v2842_v18  ;;  %v5793_v24 = vcombine.high %v2827_v19, %v2843_v20  ;;  %v5918_v17 = vcombine.low %v2954_v53, %v2970_v10 }
 0xe8f   :  { %4950 = vmatprep.subr.bf16.mxu0 %v5819_v26  ;;  %4991 = vmatprep.subr.bf16.mxu1 %v5821_v27  ;;  %v2858_v26 = vld [vmem:[#allocation44 + $0x370] sm:$0xff] }
 0xe90   :  { %v2874_v27 = vld [vmem:[#allocation44 + $0x3f0] sm:$0xff] }
 0xe91   :  { %v5822_v40 = vcombine.low %v2858_v26, %v2874_v27 }
 0xe92   :  { %4951 = vmatpush1.bf16.msra.mxu0 %v5818_v32  ;;  %4992 = vmatpush1.bf16.msra.mxu1 %v5820_v34  ;;  %v5823_v32 = vcombine.high %v2858_v26, %v2874_v27  ;;  %v5825_v34 = vcombine.high %v2859_v28, %v2875_v29  ;;  %v5953_v28 = vcombine.high %v2987_v9, %v3003_v11 }
 0xe93   :  { %4952 = vmatprep.subr.bf16.mxu0 %v5851_v35  ;;  %4993 = vmatprep.subr.bf16.mxu1 %v5853_v36  ;;  %v2890_v35 = vld [vmem:[#allocation44 + $0x470] sm:$0xff] }
 0xe94   :  { %v2906_v36 = vld [vmem:[#allocation44 + $0x4f0] sm:$0xff] }
 0xe95   :  { %v5854_v47 = vcombine.low %v2890_v35, %v2906_v36 }
 0xe96   :  { %4953 = vmatpush1.bf16.msra.mxu0 %v5850_v42  ;;  %4994 = vmatpush1.bf16.msra.mxu1 %v5852_v43  ;;  %v5855_v42 = vcombine.high %v2890_v35, %v2906_v36  ;;  %v2922_v43 = vld [vmem:[#allocation44 + $0x570] sm:$0xff]  ;;  %v5952_v35 = vcombine.low %v2987_v9, %v3003_v11 }
 0xe97   :  { %4954 = vmatprep.subr.bf16.mxu0 %v5883_v44  ;;  %4995 = vmatprep.subr.bf16.mxu1 %v5885_v45  ;;  %v2938_v44 = vld [vmem:[#allocation44 + $0x5f0] sm:$0xff]  ;;  %v2923_v45 = vld [vmem:[#allocation44 + $0x578] sm:$0xff] }
 0xe98   :  { %v5889_v52 = vcombine.high %v2923_v45, %v2939_v46  ;;  %v5888_v59 = vcombine.low %v2923_v45, %v2939_v46 }
 0xe9a   :  { %4955 = vmatpush1.bf16.msra.mxu0 %v5882_v49  ;;  %4996 = vmatpush1.bf16.msra.mxu1 %v5884_v50  ;;  %v7214_v49 = vmov 1966171168  }
 0xe9b   :  { %4956 = vmatprep.subr.bf16.mxu0 %v5915_v51  ;;  %4997 = vmatprep.subr.bf16.mxu1 %v5917_v6  ;;  %v5145_v50 = vunpack.c.l.s4 %v7214_v49  ;;  %v7678_v51 = vsub.s32 3, %v7543_v1  ;;  %v5887_v6 = vcombine.high %v2922_v43, %v2938_v44 }
 0xe9d   :  { %v5146_v61 = vunpack.c.0.s8 %v5145_v50  ;;  %v3027_v62 = vrot.slane %v7675_v48, %v7678_v51 }
 0xe9e   :  { %4957 = vmatpush1.bf16.msra.mxu0 %v5914_v55  ;;  %4998 = vmatpush1.bf16.msra.mxu1 %v5916_v57  ;;  %v2971_v55 = vld [vmem:[#allocation44 + $0x6f8] sm:$0xff]  ;;  %v3015_v57 = vrot.slane %v7675_v48, %v7549_v3 }
 0xe9f   :  { %4958 = vmatprep.subr.bf16.mxu0 %v5947_v56  ;;  %4999 = vmatprep.subr.bf16.mxu1 %v5949_v58  ;;  %v3023_v56 = vrot.slane %v7675_v48, %v7564_v15  ;;  %v5886_v58 = vcombine.low %v2922_v43, %v2938_v44  ;;  %v5920_v18 = vcombine.low %v2955_v54, %v2971_v55 }
 0xea0   :  { %v7689_v20 = vsub.s32 %v5146_v61, %v7543_v1 }
 0xea2   :  { %4959 = vmatpush1.bf16.msra.mxu0 %v5946_v63  ;;  %5000 = vmatpush1.bf16.msra.mxu1 %v5948_v0  ;;  %v5919_v63 = vcombine.high %v2954_v53, %v2970_v10  ;;  %v5921_v0 = vcombine.high %v2955_v54, %v2971_v55 }
 0xea3   :  { %5026 = vmatprep.subr.bf16.mxu0 %v5727_v4  ;;  %5067 = vmatprep.subr.bf16.mxu1 %v5729_v5  ;;  %v2986_v4 = vld [vmem:[#allocation44 + $0x770] sm:$0xff] }
 0xea4   :  { %v5951_v27 = vcombine.high %v2986_v4, %v3002_v8 }
 0xea5   :  { %4977 = vmatmul.mubr.bf16.vlgmr.msra.gmra.mrb[52].mxu0 %v7645_v39  ;;  %5018 = vmatmul.mubr.bf16.vlgmr.msra.gmra.mrb[48].mxu1 %v7645_v39 }
 0xea6   :  { %5027 = vmatpush1.bf16.msra.mxu0 %v5726_v12  ;;  %5068 = vmatpush1.bf16.msra.mxu1 %v5728_v13 }
 0xea7   :  { %5028 = vmatprep.subr.bf16.mxu0 %v5759_v14  ;;  %5069 = vmatprep.subr.bf16.mxu1 %v5761_v16 }
 0xea8   :  { %5058 = vmatprep.mubr.bf16.mxu0 %v7202_v25  ;;  %5099 = vmatprep.mubr.bf16.mxu1 %v7202_v25  ;;  %v5857_v25 = vcombine.high %v2891_v37, %v2907_v38  ;;  %v7696_v38 = vsub.s32 4, %v7543_v1 }
 0xeaa   :  { %5029 = vmatpush1.bf16.msra.mxu0 %v5758_v21  ;;  %5070 = vmatpush1.bf16.msra.mxu1 %v5760_v22 }
 0xeab   :  { %5030 = vmatprep.subr.bf16.mxu0 %v5791_v23  ;;  %5071 = vmatprep.subr.bf16.mxu1 %v5793_v24 }
 0xeae   :  { %5031 = vmatpush1.bf16.msra.mxu0 %v5790_v30  ;;  %5072 = vmatpush1.bf16.msra.mxu1 %v5792_v31  ;;  %v5950_v31 = vcombine.low %v2986_v4, %v3002_v8 }
 0xeaf   :  { %5032 = vmatprep.subr.bf16.mxu0 %v5823_v32  ;;  %5073 = vmatprep.subr.bf16.mxu1 %v5825_v34 }
 0xeb2   :  { %5033 = vmatpush1.bf16.msra.mxu0 %v5822_v40  ;;  %5074 = vmatpush1.bf16.msra.mxu1 %v5824_v41  ;;  %v7699_v40 = vsub.s32 6, %v7543_v1  ;;  %v7702_v41 = vsub.s32 5, %v7543_v1 }
 0xeb3   :  { %5034 = vmatprep.subr.bf16.mxu0 %v5855_v42  ;;  %5075 = vmatprep.subr.bf16.mxu1 %v5857_v25  ;;  %v7705_v42 = vsub.s32 7, %v7543_v1  ;;  %v3031_v25 = vrot.slane %v7675_v48, %v7696_v38 }
 0xeb4   :  { %v3039_v43 = vrot.slane %v7675_v48, %v7699_v40 }
 0xeb5   :  { %v3043_v44 = vrot.slane %v7675_v48, %v7705_v42 }
 0xeb6   :  { %5035 = vmatpush1.bf16.msra.mxu0 %v5854_v47  ;;  %5076 = vmatpush1.bf16.msra.mxu1 %v5856_v33 }
 0xeb7   :  { %5036 = vmatprep.subr.bf16.mxu0 %v5887_v6  ;;  %5077 = vmatprep.subr.bf16.mxu1 %v5889_v52 }
 0xeb8   :  { %v4486_v5 = vpop.f32.mrb[28].mxu0  ;;  %v4527_v7 = vpop.f32.mrb[24].mxu1 }
 0xeb9   :  { %v4487_v12 = vadd.f32 %v4486_v5, %v3015_v57  ;;  %v4528_v13 = vadd.f32 %v4527_v7, %v3023_v56  ;;  %v4488_v14 = vpop.f32.mrb[29].mxu0  ;;  %v4529_v16 = vpop.f32.mrb[25].mxu1  ;;  %v3005_v5 = vld [vmem:[#allocation46 + $0x8] sm:$0xff] }
 0xeba   :  { %v4489_v19 = vadd.f32 %v4488_v14, %v3019_v60  ;;  %v4530_v21 = vadd.f32 %v4529_v16, %v3027_v62  ;;  %5037 = vmatpush1.bf16.msra.mxu0 %v5886_v58  ;;  %5078 = vmatpush1.bf16.msra.mxu1 %v5888_v59  ;;  %v4490_v22 = vpop.f32.mrb[30].mxu0  ;;  %v4531_v23 = vpop.f32.mrb[26].mxu1  ;;  %v3047_v7 = vrot.slane %v3005_v5, %v7549_v3 }
 0xebb   :  { %v4491_v24 = vpop.f32.mrb[31].mxu0  ;;  %v4532_v26 = vpop.f32.mrb[27].mxu1  ;;  %5038 = vmatprep.subr.bf16.mxu0 %v5919_v63  ;;  %5079 = vmatprep.subr.bf16.mxu1 %v5921_v0  ;;  %v3055_v8 = vrot.slane %v3005_v5, %v7564_v15  ;;  %v3051_v9 = vrot.slane %v3005_v5, %v7546_v2  ;;  %v3059_v11 = vrot.slane %v3005_v5, %v7678_v51 }
 0xebc   :  { %v5140_v29 = vcombine.low %v4487_v12, %v4489_v19  ;;  %v5141_v30 = vcombine.low %v4528_v13, %v4530_v21 }
 0xebe   :  { %v5150_v32 = vrot.slane %v5140_v29, %v7689_v20  ;;  %v5157_v34 = vrot.slane %v5141_v30, %v7689_v20  ;;  %5039 = vmatpush1.bf16.msra.mxu0 %v5918_v17  ;;  %5080 = vmatpush1.bf16.msra.mxu1 %v5920_v18 }
 0xebf   :  { %5040 = vmatprep.subr.bf16.mxu0 %v5951_v27  ;;  %5081 = vmatprep.subr.bf16.mxu1 %v5953_v28 }
 0xec0   :  { %v5172_v36 = vcombine.low %v5150_v32, %v5157_v34  ;;  %v5173_v37 = vcombine.high %v5150_v32, %v5157_v34  ;;  %v3063_v34 = vrot.slane %v3005_v5, %v7696_v38 }
 0xec2   :  { %5041 = vmatpush1.bf16.msra.mxu0 %v5950_v31  ;;  %5082 = vmatpush1.bf16.msra.mxu1 %v5952_v35  ;;  %v5182_v60 = vrot.slane %v5172_v36, %v7689_v20  ;;  %v5189_v61 = vrot.slane %v5173_v37, %v7689_v20  ;;  %v3071_v35 = vrot.slane %v3005_v5, %v7699_v40 }
 0xec3   :  { %v3067_v36 = vrot.slane %v3005_v5, %v7702_v41  ;;  %v3075_v37 = vrot.slane %v3005_v5, %v7705_v42 }
 0xec5   :  { %5059 = vmatmul.mubr.bf16.vlgmr.msra.gmra.mrb[56].mxu0 %v7645_v39  ;;  %5100 = vmatmul.mubr.bf16.vlgmr.msra.gmra.mrb[52].mxu1 %v7645_v39  ;;  %v3035_v39 = vrot.slane %v7675_v48, %v7702_v41 }
 0xed8   :  { %v4568_v45 = vpop.f32.mrb[32].mxu0  ;;  %v4609_v46 = vpop.f32.mrb[28].mxu1 }
 0xed9   :  { %v4569_v47 = vadd.f32 %v4568_v45, %v3031_v25  ;;  %v4610_v33 = vadd.f32 %v4609_v46, %v3039_v43  ;;  %v4570_v49 = vpop.f32.mrb[33].mxu0  ;;  %v4611_v50 = vpop.f32.mrb[29].mxu1 }
 0xeda   :  { %v4571_v1 = vadd.f32 %v4570_v49, %v3035_v39  ;;  %v4612_v6 = vadd.f32 %v4611_v50, %v3043_v44  ;;  %v4572_v52 = vpop.f32.mrb[34].mxu0  ;;  %v4613_v53 = vpop.f32.mrb[30].mxu1 }
 0xedb   :  { %v4573_v10 = vpop.f32.mrb[35].mxu0  ;;  %v4614_v54 = vpop.f32.mrb[31].mxu1 }
 0xedc   :  { %v5142_v55 = vcombine.low %v4569_v47, %v4571_v1  ;;  %v5143_v57 = vcombine.low %v4610_v33, %v4612_v6 }
 0xede   :  { %v5164_v56 = vrot.slane %v5142_v55, %v7689_v20  ;;  %v5171_v58 = vrot.slane %v5143_v57, %v7689_v20 }
 0xee0   :  { %v5174_v59 = vcombine.low %v5164_v56, %v5171_v58  ;;  %v5175_v48 = vcombine.high %v5164_v56, %v5171_v58 }
 0xee2   :  { %v5196_v62 = vrot.slane %v5174_v59, %v7689_v20  ;;  %v5203_v63 = vrot.slane %v5175_v48, %v7689_v20 }
 0xee4   :  { %v5204_v0 = vcombine.low %v5182_v60, %v5196_v62  ;;  %v5205_v4 = vcombine.low %v5189_v61, %v5203_v63 }
 0xee6   :  { %5412 = vst [vmem:[#allocation50] sm:$0xff] %v5204_v0  ;;  %5416 = vst [vmem:[#allocation50 + $0x20] sm:$0xff] %v5205_v4 }
 0xef8   :  { %v4650_v12 = vpop.f32.mrb[36].mxu0  ;;  %v4691_v13 = vpop.f32.mrb[32].mxu1 }
 0xef9   :  { %v4651_v14 = vadd.f32 %v4650_v12, %v3047_v7  ;;  %v4692_v16 = vadd.f32 %v4691_v13, %v3055_v8  ;;  %v4652_v17 = vpop.f32.mrb[37].mxu0  ;;  %v4693_v18 = vpop.f32.mrb[33].mxu1 }
 0xefa   :  { %v4653_v19 = vadd.f32 %v4652_v17, %v3051_v9  ;;  %v4694_v21 = vadd.f32 %v4693_v18, %v3059_v11  ;;  %v4654_v22 = vpop.f32.mrb[38].mxu0  ;;  %v4695_v23 = vpop.f32.mrb[34].mxu1 }
 0xefb   :  { %v4655_v24 = vpop.f32.mrb[39].mxu0  ;;  %v4696_v26 = vpop.f32.mrb[35].mxu1 }
 0xefc   :  { %v5206_v27 = vcombine.low %v4651_v14, %v4653_v19  ;;  %v5207_v28 = vcombine.low %v4692_v16, %v4694_v21 }
 0xefe   :  { %v5216_v29 = vrot.slane %v5206_v27, %v7689_v20  ;;  %v5223_v30 = vrot.slane %v5207_v28, %v7689_v20 }
 0xf00   :  { %v5238_v31 = vcombine.low %v5216_v29, %v5223_v30  ;;  %v5239_v32 = vcombine.high %v5216_v29, %v5223_v30 }
 0xf02   :  { %v5248_v56 = vrot.slane %v5238_v31, %v7689_v20  ;;  %v5255_v58 = vrot.slane %v5239_v32, %v7689_v20 }
 0xf18   :  { %v4732_v25 = vpop.f32.mrb[40].mxu0  ;;  %v4773_v43 = vpop.f32.mrb[36].mxu1 }
 0xf19   :  { %v4733_v39 = vadd.f32 %v4732_v25, %v3063_v34  ;;  %v4774_v44 = vadd.f32 %v4773_v43, %v3071_v35  ;;  %v4734_v45 = vpop.f32.mrb[41].mxu0  ;;  %v4775_v46 = vpop.f32.mrb[37].mxu1 }
 0xf1a   :  { %v4735_v47 = vadd.f32 %v4734_v45, %v3067_v36  ;;  %v4776_v33 = vadd.f32 %v4775_v46, %v3075_v37  ;;  %v4736_v49 = vpop.f32.mrb[42].mxu0  ;;  %v4777_v50 = vpop.f32.mrb[38].mxu1 }
 0xf1b   :  { %v4737_v1 = vpop.f32.mrb[43].mxu0  ;;  %v4778_v6 = vpop.f32.mrb[39].mxu1 }
 0xf1c   :  { %v5208_v52 = vcombine.low %v4733_v39, %v4735_v47  ;;  %v5209_v53 = vcombine.low %v4774_v44, %v4776_v33 }
 0xf1e   :  { %v5230_v10 = vrot.slane %v5208_v52, %v7689_v20  ;;  %v5237_v54 = vrot.slane %v5209_v53, %v7689_v20 }
 0xf20   :  { %v5240_v55 = vcombine.low %v5230_v10, %v5237_v54  ;;  %v5241_v57 = vcombine.high %v5230_v10, %v5237_v54 }
 0xf22   :  { %v5262_v59 = vrot.slane %v5240_v55, %v7689_v20  ;;  %v5269_v48 = vrot.slane %v5241_v57, %v7689_v20 }
 0xf24   :  { %v5270_v60 = vcombine.low %v5248_v56, %v5262_v59  ;;  %v5271_v61 = vcombine.low %v5255_v58, %v5269_v48 }
 0xf26   :  { %5413 = vst [vmem:[#allocation50 + $0x8] sm:$0xff] %v5270_v60  ;;  %5417 = vst [vmem:[#allocation50 + $0x28] sm:$0xff] %v5271_v61 }
 0xf27   :  { %7046 = shalt.err (!%p7043_p12)
}
 0xf28   :  { %s7047_s28 = scalar_lea.hbm %s7377_s12, 256 }
 0xf29   :  { %p7048_p13 = scmp.ne.s32.totalorder %s7377_s12, %s7047_s28  ;;  %p7051_p0 = scmp.lt.u32.totalorder %s7047_s28, %s7377_s12 }
 0xf2b   :  { %p7053_p1 = pnand %p7051_p0, %p7048_p13 }
 0xf2d   :  { %7056 = shalt.err (!%p7053_p1)
}
 0xf2e   :  { %5443 = dma.vmem_to_hbm [thread:$0]  %s5438_s14, 256, %s7377_s12, [#allocation49], %s7168_s10, %s7168_s10, %s7169_s9  }
 0xf2f   :  { %s7057_s19 = scalar_lea.vmem %s5426_s26, 128  ;;  %p7062_p3 = scmp.lt.s32.totalorder %s5426_s26, %s5426_s26 }
 0xf30   :  { %p7058_p2 = scmp.ne.s32.totalorder %s5426_s26, %s7057_s19  ;;  %p7063_p4 = scmp.lt.s32.totalorder %s7057_s19, %s7057_s19 }
 0xf32   :  { %p7064_p5 = por %p7063_p4, %p7062_p3 }
 0xf34   :  { %p7065_p6 = pnand %p7064_p5, %p7058_p2 }
 0xf36   :  { %7068 = shalt.err (!%p7065_p6)
}
 0xf37   :  { %s7069_s1 = scalar_lea.hbm %s7372_s13, 128 }
 0xf38   :  { %p7070_p7 = scmp.ne.s32.totalorder %s7372_s13, %s7069_s1  ;;  %p7073_p8 = scmp.lt.u32.totalorder %s7069_s1, %s7372_s13 }
 0xf3a   :  { %p7075_p9 = pnand %p7073_p8, %p7070_p7 }
 0xf3c   :  { %7078 = shalt.err (!%p7075_p9)
}
 0xf3d   :  { %5431 = dma.vmem_to_hbm [thread:$0]  %s5426_s26, 128, %s7372_s13, [#allocation4], %s7168_s10, %s7168_s10, %s7169_s9   ;;  %v3006_v62 = vld [vmem:[#allocation46 + $0x10] sm:$0xff]  ;;  %v4814_v7 = vpop.f32.mrb[44].mxu0  ;;  %v4855_v8 = vpop.f32.mrb[40].mxu1  ;;  %v3007_v59 = vld [vmem:[#allocation46 + $0x18] sm:$0xff] }
 0xf3e   :  { %v3079_v63 = vrot.slane %v3006_v62, %v7549_v3  ;;  %v3087_v0 = vrot.slane %v3006_v62, %v7564_v15  ;;  %v3083_v4 = vrot.slane %v3006_v62, %v7546_v2  ;;  %v3091_v5 = vrot.slane %v3006_v62, %v7678_v51  ;;  %v4816_v12 = vpop.f32.mrb[45].mxu0  ;;  %v4857_v13 = vpop.f32.mrb[41].mxu1  ;;  %s7217_s13 = smov [#allocation50]  }
 0xf3f   :  { %v4818_v17 = vpop.f32.mrb[46].mxu0  ;;  %v4859_v18 = vpop.f32.mrb[42].mxu1  ;;  %v3095_v29 = vrot.slane %v3006_v62, %v7696_v38  ;;  %v3103_v30 = vrot.slane %v3006_v62, %v7699_v40  ;;  %v3099_v31 = vrot.slane %v3006_v62, %v7702_v41  ;;  %v3107_v32 = vrot.slane %v3006_v62, %v7705_v42  ;;  %s5449_s12 = sshll.u32 %s7217_s13, 4  ;;  %s5450_s12 = int_to_ptr.vmem [resolvable:$true] %s5449_s12 }
 0xf40   :  { %v4815_v9 = vadd.f32 %v4814_v7, %v3079_v63  ;;  %v4856_v11 = vadd.f32 %v4855_v8, %v3087_v0  ;;  %v4817_v14 = vadd.f32 %v4816_v12, %v3083_v4  ;;  %v4858_v16 = vadd.f32 %v4857_v13, %v3091_v5  ;;  %v4819_v19 = vpop.f32.mrb[47].mxu0  ;;  %v4860_v21 = vpop.f32.mrb[43].mxu1  ;;  %s7079_s10 = scalar_lea.vmem %s5450_s12, 1024  ;;  %p7084_p11 = scmp.lt.s32.totalorder %s5450_s12, %s5450_s12 }
 0xf41   :  { %v3111_v48 = vrot.slane %v3007_v59, %v7549_v3  ;;  %v3119_v60 = vrot.slane %v3007_v59, %v7564_v15  ;;  %v3115_v61 = vrot.slane %v3007_v59, %v7546_v2  ;;  %v3123_v62 = vrot.slane %v3007_v59, %v7678_v51  ;;  %p7080_p10 = scmp.ne.s32.totalorder %s5450_s12, %s7079_s10  ;;  %p7085_p12 = scmp.lt.s32.totalorder %s7079_s10, %s7079_s10 }
 0xf42   :  { %v5272_v22 = vcombine.low %v4815_v9, %v4817_v14  ;;  %v5273_v23 = vcombine.low %v4856_v11, %v4858_v16  ;;  %v3127_v19 = vrot.slane %v3007_v59, %v7696_v38  ;;  %v3135_v21 = vrot.slane %v3007_v59, %v7699_v40 }
 0xf43   :  { %p7086_p13 = por %p7085_p12, %p7084_p11 }
 0xf44   :  { %v5282_v24 = vrot.slane %v5272_v22, %v7689_v20  ;;  %v5289_v26 = vrot.slane %v5273_v23, %v7689_v20  ;;  %v3131_v22 = vrot.slane %v3007_v59, %v7702_v41  ;;  %v3139_v23 = vrot.slane %v3007_v59, %v7705_v42 }
 0xf45   :  { %p7087_p0 = pnand %p7086_p13, %p7080_p10 }
 0xf46   :  { %v5304_v27 = vcombine.low %v5282_v24, %v5289_v26  ;;  %v5305_v28 = vcombine.high %v5282_v24, %v5289_v26 }
 0xf48   :  { %v5314_v10 = vrot.slane %v5304_v27, %v7689_v20  ;;  %v5321_v54 = vrot.slane %v5305_v28, %v7689_v20 }
 0xf58   :  { %v4896_v34 = vpop.f32.mrb[48].mxu0  ;;  %v4937_v35 = vpop.f32.mrb[44].mxu1 }
 0xf59   :  { %v4897_v36 = vadd.f32 %v4896_v34, %v3095_v29  ;;  %v4938_v37 = vadd.f32 %v4937_v35, %v3103_v30  ;;  %v4898_v25 = vpop.f32.mrb[49].mxu0  ;;  %v4939_v43 = vpop.f32.mrb[45].mxu1 }
 0xf5a   :  { %v4899_v39 = vadd.f32 %v4898_v25, %v3099_v31  ;;  %v4940_v44 = vadd.f32 %v4939_v43, %v3107_v32  ;;  %v4900_v45 = vpop.f32.mrb[50].mxu0  ;;  %v4941_v46 = vpop.f32.mrb[46].mxu1 }
 0xf5b   :  { %v4901_v47 = vpop.f32.mrb[51].mxu0  ;;  %v4942_v33 = vpop.f32.mrb[47].mxu1 }
 0xf5c   :  { %v5274_v49 = vcombine.low %v4897_v36, %v4899_v39  ;;  %v5275_v50 = vcombine.low %v4938_v37, %v4940_v44 }
 0xf5e   :  { %v5296_v1 = vrot.slane %v5274_v49, %v7689_v20  ;;  %v5303_v6 = vrot.slane %v5275_v50, %v7689_v20 }
 0xf60   :  { %v5306_v52 = vcombine.low %v5296_v1, %v5303_v6  ;;  %v5307_v53 = vcombine.high %v5296_v1, %v5303_v6 }
 0xf62   :  { %v5328_v55 = vrot.slane %v5306_v52, %v7689_v20  ;;  %v5335_v57 = vrot.slane %v5307_v53, %v7689_v20 }
 0xf64   :  { %v5336_v56 = vcombine.low %v5314_v10, %v5328_v55  ;;  %v5337_v58 = vcombine.low %v5321_v54, %v5335_v57 }
 0xf66   :  { %5414 = vst [vmem:[#allocation50 + $0x10] sm:$0xff] %v5336_v56  ;;  %5418 = vst [vmem:[#allocation50 + $0x30] sm:$0xff] %v5337_v58 }
 0xf78   :  { %v4978_v63 = vpop.f32.mrb[52].mxu0  ;;  %v5019_v0 = vpop.f32.mrb[48].mxu1 }
 0xf79   :  { %v4979_v4 = vadd.f32 %v4978_v63, %v3111_v48  ;;  %v5020_v5 = vadd.f32 %v5019_v0, %v3119_v60  ;;  %v4980_v7 = vpop.f32.mrb[53].mxu0  ;;  %v5021_v8 = vpop.f32.mrb[49].mxu1 }
 0xf7a   :  { %v4981_v9 = vadd.f32 %v4980_v7, %v3115_v61  ;;  %v5022_v11 = vadd.f32 %v5021_v8, %v3123_v62  ;;  %v4982_v12 = vpop.f32.mrb[54].mxu0  ;;  %v5023_v13 = vpop.f32.mrb[50].mxu1 }
 0xf7b   :  { %v4983_v14 = vpop.f32.mrb[55].mxu0  ;;  %v5024_v16 = vpop.f32.mrb[51].mxu1 }
 0xf7c   :  { %v5338_v17 = vcombine.low %v4979_v4, %v4981_v9  ;;  %v5339_v3 = vcombine.low %v5020_v5, %v5022_v11 }
 0xf7e   :  { %v5348_v15 = vrot.slane %v5338_v17, %v7689_v20  ;;  %v5355_v2 = vrot.slane %v5339_v3, %v7689_v20 }
 0xf80   :  { %v5370_v18 = vcombine.low %v5348_v15, %v5355_v2  ;;  %v5371_v51 = vcombine.high %v5348_v15, %v5355_v2 }
 0xf82   :  { %v5380_v39 = vrot.slane %v5370_v18, %v7689_v20  ;;  %v5387_v44 = vrot.slane %v5371_v51, %v7689_v20 }
 0xf98   :  { %v5060_v24 = vpop.f32.mrb[56].mxu0  ;;  %v5101_v26 = vpop.f32.mrb[52].mxu1 }
 0xf99   :  { %v5061_v27 = vadd.f32 %v5060_v24, %v3127_v19  ;;  %v5102_v28 = vadd.f32 %v5101_v26, %v3135_v21  ;;  %v5062_v29 = vpop.f32.mrb[57].mxu0  ;;  %v5103_v30 = vpop.f32.mrb[53].mxu1 }
 0xf9a   :  { %v5063_v31 = vadd.f32 %v5062_v29, %v3131_v22  ;;  %v5104_v32 = vadd.f32 %v5103_v30, %v3139_v23  ;;  %v5064_v34 = vpop.f32.mrb[58].mxu0  ;;  %v5105_v35 = vpop.f32.mrb[54].mxu1 }
 0xf9b   :  { %v5065_v36 = vpop.f32.mrb[59].mxu0  ;;  %v5106_v37 = vpop.f32.mrb[55].mxu1 }
 0xf9c   :  { %v5340_v25 = vcombine.low %v5061_v27, %v5063_v31  ;;  %v5341_v38 = vcombine.low %v5102_v28, %v5104_v32 }
 0xf9e   :  { %v5362_v40 = vrot.slane %v5340_v25, %v7689_v20  ;;  %v5369_v41 = vrot.slane %v5341_v38, %v7689_v20 }
 0xfa0   :  { %v5372_v43 = vcombine.low %v5362_v40, %v5369_v41  ;;  %v5373_v42 = vcombine.high %v5362_v40, %v5369_v41 }
 0xfa2   :  { %v5394_v45 = vrot.slane %v5372_v43, %v7689_v20  ;;  %v5401_v46 = vrot.slane %v5373_v42, %v7689_v20 }
 0xfa4   :  { %v5402_v47 = vcombine.low %v5380_v39, %v5394_v45  ;;  %v5403_v33 = vcombine.low %v5387_v44, %v5401_v46 }
 0xfa6   :  { %5415 = vst [vmem:[#allocation50 + $0x18] sm:$0xff] %v5402_v47  ;;  %5419 = vst [vmem:[#allocation50 + $0x38] sm:$0xff] %v5403_v33 }
 0xfa7   :  { %7090 = shalt.err (!%p7087_p0)
}
 0xfa8   :  { %s7091_s9 = scalar_lea.hbm %s7382_s5, 1024 }
 0xfa9   :  { %p7092_p1 = scmp.ne.s32.totalorder %s7382_s5, %s7091_s9  ;;  %p7095_p2 = scmp.lt.u32.totalorder %s7091_s9, %s7382_s5 }
 0xfab   :  { %p7097_p3 = pnand %p7095_p2, %p7092_p1 }
 0xfad   :  { %7100 = shalt.err (!%p7097_p3)
}
 0xfae   :  { %s7218_s8 = smov 512  }
 0xfaf   :  { %5455 = dma.vmem_to_hbm [thread:$0]  %s5450_s12, 1024, %s7382_s5, [#allocation49], %s7218_s8, %s7218_s8, %s7186_s15  }
 0xfb0   :  { %7131 = dma.done.wait [#allocation4], 128  }
 0xfb1   :  { %7132 = vsyncadd [#allocation4], 4294967168 }
 0xfb2   :  { %7133 = dma.done.wait [#allocation49], 1280  }
 0xfb3   :  { %7134 = vsyncadd [#allocation49], 4294966016 }
 0xfb4   :  { %5465 = vsyncpa [#allocation3], 1 }
 0xfb5   :  { %5466 = vsyncpa [#allocation6], 1 }
 0xfb6   :  { %5467 = vsyncpa [#allocation9], 1 }
 0xfb7   :  { %5468 = vsyncpa [#allocation12], 1 }
 0xfb8   :  { %5469 = vsyncpa [#allocation15], 1 }
 0xfb9   :  { %5470 = vsyncpa [#allocation18], 1 }
 0xfba   :  { %5471 = vsyncpa [#allocation21], 1 }
 0xfbb   :  { %5472 = vsyncpa [#allocation24], 1 }
 0xfbc   :  { %5473 = vsyncpa [#allocation27], 1 }
 0xfbd   :  { %5474 = vsyncpa [#allocation30], 1 }
 0xfbe   :  { %5475 = vsyncpa [#allocation33], 1 }
 0xfbf   :  { %5476 = vsyncpa [#allocation36], 1 }
 0xfc0   :  { %5477 = vsyncpa [#allocation39], 1 }
 0xfc1   :  { %5478 = vsyncpa [#allocation42], 1 }
 0xfc2   :  { %5479 = vsyncpa [#allocation45], 1 }
 0xfc3   :  { %5480 = vsyncpa [#allocation4], 1 }
 0xfc4   :  { %5481 = vsyncpa [#allocation49], 1 }

</bundles_post_ra>
